<compile_context>
chip_gen: v6e
topology: v6e:2x2x1
jax: 0.10.0
libtpu: 0.0.40
codegen_flags: <defaults>
</compile_context>

<pallas_src>
import jax
import jax.numpy as jnp
from jax.experimental import pallas as pl
from jax.experimental.pallas import tpu as pltpu

# ----------------------------- configuration --------------------------------
B = 2                      # batch size
T = 8                      # listener time steps
LISTENER_HIDDEN = 16       # listener_hidden_dim
D = 2 * LISTENER_HIDDEN    # listener feature dim (== 2*listener_hidden_dim)
H = D                      # speller_hidden_dim (must equal D for the module to typecheck)
LABEL = 16                 # output_class_dim
MLP = 32                   # mlp_dim_in_attention
LAYERS = 2                 # speller_rnn_layer
MAX_LABEL_LEN = 6          # max_label_len
IN_MAX = LABEL + H         # 48: LSTM layer-0 input width (layer>=1 uses only first H cols)
LHS = IN_MAX + H           # 80: fused [input | hidden] width fed to the MXU
G4 = 4 * H                 # 128: gate width == one full vreg lane dimension


# ------------------------------- Pallas kernel -------------------------------
def speller_kernel(listener_ref, w_fused_ref, b_rnn_ref,
                   phi_w_ref, phi_b_ref, psi_w_ref, psi_b_ref,
                   char_w_ref, char_b_ref,
                   raw_pred_ref, att_ref):
    listener = listener_ref[...]                                   # (B, T, D)

    # Listener-side attention MLP (identical every decoder step -> hoisted).
    psi_w = psi_w_ref[...]                                         # (D, MLP)
    psi_b = psi_b_ref[...]                                         # (1, MLP)
    lis2d = listener.reshape(B * T, D)
    comp_lis = jnp.maximum(
        jnp.dot(lis2d, psi_w, preferred_element_type=jnp.float32) + psi_b, 0.0
    ).reshape(B, T, MLP)

    phi_w = phi_w_ref[...]                                         # (D, MLP)
    phi_b = phi_b_ref[...]                                         # (1, MLP)
    char_w = char_w_ref[...]                                       # (2H, LABEL)
    char_b = char_b_ref[...]                                       # (1, LABEL)

    # Hoist per-layer fused LSTM weights/biases out of the step/batch loops:
    # loaded once, held in vregs (~14 vregs/layer, well under the 64-vreg budget).
    w_fused = [w_fused_ref[l] for l in range(LAYERS)]              # (LHS, 4H) each
    b_rnn = [b_rnn_ref[l] for l in range(LAYERS)]                  # (1, 4H) each

    # Initial <sos>: one-hot of class 0, concatenated with listener_feature[:, 0, :].
    onehot0 = (jax.lax.broadcasted_iota(jnp.int32, (B, LABEL), 1) == 0).astype(jnp.float32)
    rnn_input = jnp.concatenate([onehot0, listener[:, 0, :]], axis=-1)   # (B, IN_MAX)

    # LSTM state (PyTorch sees batch=1 inside the LSTM); initial hidden is None -> zeros.
    h = [jnp.zeros((1, H), jnp.float32) for _ in range(LAYERS)]
    c = [jnp.zeros((1, H), jnp.float32) for _ in range(LAYERS)]
    pad_tail = jnp.zeros((1, IN_MAX - H), jnp.float32)   # zero-pad layer>=1 inputs to IN_MAX

    preds = []
    atts = []
    for step in range(MAX_LABEL_LEN):
        # ---- multi-layer LSTM over the "sequence" axis (which is the batch axis) ----
        rnn_rows = []
        for b in range(B):
            x0 = rnn_input[b:b + 1, :]                             # (1, IN_MAX)
            for l in range(LAYERS):
                # Fused lhs = [x | h]: one (1,LHS)@(LHS,4H) MXU pass per cell
                # instead of two.  Layer>=1 inputs are zero-padded to IN_MAX
                # (matching padded w_ih rows are zero-masked at init) so every
                # cell has an identical shape.
                if l == 0:
                    lhs = jnp.concatenate([x0, h[l]], axis=-1)                 # (1, LHS)
                else:
                    lhs = jnp.concatenate([h[l - 1], pad_tail, h[l]], axis=-1)  # (1, LHS)
                gates = (jnp.dot(lhs, w_fused[l], preferred_element_type=jnp.float32)
                         + b_rnn[l])                               # (1, 4H) = one vreg
                # Activate the whole gates vreg once: 2 EUP pushes instead of 4.
                sig_all = jax.nn.sigmoid(gates)
                tanh_all = jnp.tanh(gates)
                i_g = sig_all[:, 0 * H:1 * H]
                f_g = sig_all[:, 1 * H:2 * H]
                g_g = tanh_all[:, 2 * H:3 * H]
                o_g = sig_all[:, 3 * H:4 * H]
                c[l] = f_g * c[l] + i_g * g_g
                h[l] = o_g * jnp.tanh(c[l])
            rnn_rows.append(h[LAYERS - 1])
        rnn_output = jnp.concatenate(rnn_rows, axis=0)             # (B, H)

        # ---- attention (dot mode, MLP-preprocessed, ReLU) ----
        # Reductions stay on VPU/XLU (idle units) rather than the busy MXU.
        comp_dec = jnp.maximum(
            jnp.dot(rnn_output, phi_w, preferred_element_type=jnp.float32) + phi_b, 0.0)  # (B, MLP)
        energy = jnp.sum(comp_dec[:, None, :] * comp_lis, axis=-1)  # (B, T)
        energy = energy - jnp.max(energy, axis=-1, keepdims=True)
        exp_e = jnp.exp(energy)
        score = exp_e * pl.reciprocal(jnp.sum(exp_e, axis=-1, keepdims=True),
                                      approx=True)                 # softmax over T (EUP vrcp)
        context = jnp.sum(listener * score[:, :, None], axis=1)     # (B, D)

        # ---- character distribution + log-softmax ----
        concat_feature = jnp.concatenate([rnn_output, context], axis=-1)   # (B, 2H)
        logits = jnp.dot(concat_feature, char_w, preferred_element_type=jnp.float32) + char_b
        shifted = logits - jnp.max(logits, axis=-1, keepdims=True)
        raw_pred = shifted - jnp.log(jnp.sum(jnp.exp(shifted), axis=-1, keepdims=True))  # (B, LABEL)

        preds.append(raw_pred)
        atts.append(score)

        # ---- next rnn input (no teacher forcing since ground_truth is None) ----
        rnn_input = jnp.concatenate([raw_pred, context], axis=-1)   # (B, IN_MAX)

    # Single bulk store per output instead of 2*MAX_LABEL_LEN masked partial stores.
    raw_pred_ref[...] = jnp.stack(preds, axis=0)                    # (MAX_LABEL_LEN, B, LABEL)
    att_ref[...] = jnp.stack(atts, axis=0)                          # (MAX_LABEL_LEN, B, T)


# ------------------------------- wrapper / glue -------------------------------
@jax.jit
def speller_forward(listener, params):
    inputs = (listener,) + params
    vmem = pl.BlockSpec(memory_space=pltpu.MemorySpace.VMEM)
    return pl.pallas_call(
        speller_kernel,
        out_shape=(jax.ShapeDtypeStruct((MAX_LABEL_LEN, B, LABEL), jnp.float32),
                   jax.ShapeDtypeStruct((MAX_LABEL_LEN, B, T), jnp.float32)),
        in_specs=[vmem] * len(inputs),
        out_specs=(vmem, vmem),
    )(*inputs)


def make_speller_params(key):
    ks = jax.random.split(key, 9)

    def init(k, shape, scale=0.1):
        return (scale * jax.random.normal(k, shape)).astype(jnp.float32)

    w_ih = init(ks[0], (LAYERS, IN_MAX, 4 * H))        # pre-transposed (in, 4H)
    # zero the padded input rows for layers > 0 (their true input width is H)
    thresh = jnp.where(jnp.arange(LAYERS) == 0, IN_MAX, H)
    mask = (jnp.arange(IN_MAX)[None, :, None] < thresh[:, None, None]).astype(jnp.float32)
    w_ih = w_ih * mask
    w_hh = init(ks[1], (LAYERS, H, 4 * H))
    # Fused per-layer weight: rows [0:IN_MAX] multiply the cell input,
    # rows [IN_MAX:] multiply the hidden state.  One MXU pass per cell.
    w_fused = jnp.concatenate([w_ih, w_hh], axis=1)    # (LAYERS, LHS, 4H)
    b_rnn = init(ks[2], (LAYERS, 1, 4 * H))            # b_ih + b_hh folded together
    phi_w = init(ks[3], (D, MLP))
    phi_b = init(ks[4], (1, MLP))
    psi_w = init(ks[5], (D, MLP))
    psi_b = init(ks[6], (1, MLP))
    char_w = init(ks[7], (2 * H, LABEL))
    char_b = init(ks[8], (1, LABEL))
    return (w_fused, b_rnn, phi_w, phi_b, psi_w, psi_b, char_w, char_b)


# ----------------------- pure-JAX reference (for checking) -------------------
def speller_reference(listener, params):
    w_fused, b_rnn, phi_w, phi_b, psi_w, psi_b, char_w, char_b = params
    comp_lis = jax.nn.relu(jnp.einsum('btd,dm->btm', listener, psi_w) + psi_b)
    onehot0 = jnp.zeros((B, LABEL), jnp.float32).at[:, 0].set(1.0)
    rnn_input = jnp.concatenate([onehot0, listener[:, 0, :]], axis=-1)
    h = [jnp.zeros((1, H), jnp.float32) for _ in range(LAYERS)]
    c = [jnp.zeros((1, H), jnp.float32) for _ in range(LAYERS)]
    preds, atts = [], []
    for _ in range(MAX_LABEL_LEN):
        rows = []
        for b in range(B):
            x = rnn_input[b:b + 1]
            for l in range(LAYERS):
                in_dim = IN_MAX if l == 0 else H
                w_ih = w_fused[l][:IN_MAX]
                w_hh = w_fused[l][IN_MAX:]
                gates = x[:, :in_dim] @ w_ih[:in_dim] + h[l] @ w_hh + b_rnn[l]
                i_g = jax.nn.sigmoid(gates[:, :H])
                f_g = jax.nn.sigmoid(gates[:, H:2 * H])
                g_g = jnp.tanh(gates[:, 2 * H:3 * H])
                o_g = jax.nn.sigmoid(gates[:, 3 * H:])
                c[l] = f_g * c[l] + i_g * g_g
                h[l] = o_g * jnp.tanh(c[l])
                x = h[l]
            rows.append(h[-1])
        rnn_output = jnp.concatenate(rows, axis=0)
        comp_dec = jax.nn.relu(rnn_output @ phi_w + phi_b)
        energy = jnp.einsum('bm,btm->bt', comp_dec, comp_lis)
        score = jax.nn.softmax(energy, axis=-1)
        context = jnp.sum(listener * score[:, :, None], axis=1)
        concat_feature = jnp.concatenate([rnn_output, context], axis=-1)
        raw_pred = jax.nn.log_softmax(concat_feature @ char_w + char_b, axis=-1)
        preds.append(raw_pred)
        atts.append(score)
        rnn_input = jnp.concatenate([raw_pred, context], axis=-1)
    return jnp.stack(preds), jnp.stack(atts)


if __name__ == "__main__":
    key = jax.random.PRNGKey(0)
    k_lis, k_par = jax.random.split(key)
    listener = (0.5 * jax.random.normal(k_lis, (B, T, D))).astype(jnp.float32)
    params = make_speller_params(k_par)

    raw_pred_seq, att_record = speller_forward(listener, params)
    jax.block_until_ready((raw_pred_seq, att_record))

    assert raw_pred_seq.shape == (MAX_LABEL_LEN, B, LABEL)
    assert att_record.shape == (MAX_LABEL_LEN, B, T)

    ref_pred, ref_att = speller_reference(listener, params)
    # Tolerance is slightly looser than before because the attention softmax
    # denominator now uses the approximate EUP reciprocal (pl.reciprocal).
    assert jnp.allclose(raw_pred_seq, ref_pred, atol=2e-3, rtol=2e-3)
    assert jnp.allclose(att_record, ref_att, atol=2e-3, rtol=2e-3)

    print("KERNEL_OK")
</pallas_src>

<mosaic_0001>
module attributes {stable_mosaic.version = 11 : i64} {
  func.func @speller_kernel(%arg0: memref<2x8x32xf32, #tpu.memory_space<vmem>>, %arg1: memref<2x80x128xf32, #tpu.memory_space<vmem>>, %arg2: memref<2x1x128xf32, #tpu.memory_space<vmem>>, %arg3: memref<32x32xf32, #tpu.memory_space<vmem>>, %arg4: memref<1x32xf32, #tpu.memory_space<vmem>>, %arg5: memref<32x32xf32, #tpu.memory_space<vmem>>, %arg6: memref<1x32xf32, #tpu.memory_space<vmem>>, %arg7: memref<64x16xf32, #tpu.memory_space<vmem>>, %arg8: memref<1x16xf32, #tpu.memory_space<vmem>>, %arg9: memref<6x2x16xf32, #tpu.memory_space<vmem>>, %arg10: memref<6x2x8xf32, #tpu.memory_space<vmem>>) attributes {dimension_semantics = [], scalar_prefetch = 0 : i64, scratch_operands = 0 : i64, tpu.core_type = #tpu.core_type<tc>} {
    %c0 = arith.constant 0 : index
    %c0_0 = arith.constant 0 : index
    %c0_1 = arith.constant 0 : index
    %0 = vector.load %arg0[%c0, %c0_0, %c0_1] : memref<2x8x32xf32, #tpu.memory_space<vmem>>, vector<2x8x32xf32>
    %c0_2 = arith.constant 0 : index
    %c0_3 = arith.constant 0 : index
    %1 = vector.load %arg5[%c0_2, %c0_3] : memref<32x32xf32, #tpu.memory_space<vmem>>, vector<32x32xf32>
    %c0_4 = arith.constant 0 : index
    %c0_5 = arith.constant 0 : index
    %2 = vector.load %arg6[%c0_4, %c0_5] : memref<1x32xf32, #tpu.memory_space<vmem>>, vector<1x32xf32>
    %3 = vector.shape_cast %0 : vector<2x8x32xf32> to vector<16x32xf32>
    %cst = arith.constant dense<0.000000e+00> : vector<16x32xf32>
    %4 = tpu.matmul %3, %1, %cst {dimension_numbers = #tpu.dot_dimension_numbers<[1], [0], [0], [1], [0, 0, 1, 1], [], []>} : vector<16x32xf32>, vector<32x32xf32>, vector<16x32xf32> -> vector<16x32xf32>
    %5 = vector.broadcast %2 : vector<1x32xf32> to vector<16x32xf32>
    %6 = arith.addf %4, %5 : vector<16x32xf32>
    %cst_6 = arith.constant 0.000000e+00 : f32
    %7 = vector.broadcast %cst_6 : f32 to vector<16x32xf32>
    %8 = arith.maximumf %6, %7 : vector<16x32xf32>
    %9 = vector.shape_cast %8 : vector<16x32xf32> to vector<2x8x32xf32>
    %c0_7 = arith.constant 0 : index
    %c0_8 = arith.constant 0 : index
    %10 = vector.load %arg3[%c0_7, %c0_8] : memref<32x32xf32, #tpu.memory_space<vmem>>, vector<32x32xf32>
    %c0_9 = arith.constant 0 : index
    %c0_10 = arith.constant 0 : index
    %11 = vector.load %arg4[%c0_9, %c0_10] : memref<1x32xf32, #tpu.memory_space<vmem>>, vector<1x32xf32>
    %c0_11 = arith.constant 0 : index
    %c0_12 = arith.constant 0 : index
    %12 = vector.load %arg7[%c0_11, %c0_12] : memref<64x16xf32, #tpu.memory_space<vmem>>, vector<64x16xf32>
    %c0_13 = arith.constant 0 : index
    %c0_14 = arith.constant 0 : index
    %13 = vector.load %arg8[%c0_13, %c0_14] : memref<1x16xf32, #tpu.memory_space<vmem>>, vector<1x16xf32>
    %c0_15 = arith.constant 0 : index
    %c0_16 = arith.constant 0 : index
    %c0_17 = arith.constant 0 : index
    %14 = vector.load %arg1[%c0_15, %c0_16, %c0_17] : memref<2x80x128xf32, #tpu.memory_space<vmem>>, vector<1x80x128xf32>
    %15 = vector.shape_cast %14 : vector<1x80x128xf32> to vector<80x128xf32>
    %c1 = arith.constant 1 : index
    %c0_18 = arith.constant 0 : index
    %c0_19 = arith.constant 0 : index
    %16 = vector.load %arg1[%c1, %c0_18, %c0_19] : memref<2x80x128xf32, #tpu.memory_space<vmem>>, vector<1x80x128xf32>
    %17 = vector.shape_cast %16 : vector<1x80x128xf32> to vector<80x128xf32>
    %c0_20 = arith.constant 0 : index
    %c0_21 = arith.constant 0 : index
    %c0_22 = arith.constant 0 : index
    %18 = vector.load %arg2[%c0_20, %c0_21, %c0_22] : memref<2x1x128xf32, #tpu.memory_space<vmem>>, vector<1x1x128xf32>
    %19 = vector.shape_cast %18 : vector<1x1x128xf32> to vector<1x128xf32>
    %c1_23 = arith.constant 1 : index
    %c0_24 = arith.constant 0 : index
    %c0_25 = arith.constant 0 : index
    %20 = vector.load %arg2[%c1_23, %c0_24, %c0_25] : memref<2x1x128xf32, #tpu.memory_space<vmem>>, vector<1x1x128xf32>
    %21 = vector.shape_cast %20 : vector<1x1x128xf32> to vector<1x128xf32>
    %22 = tpu.iota {dimensions = array<i32: 1>} : vector<2x16xi32>
    %c0_i32 = arith.constant 0 : i32
    %23 = vector.broadcast %c0_i32 : i32 to vector<2x16xi32>
    %24 = arith.cmpi eq, %22, %23 : vector<2x16xi32>
    %25 = arith.extui %24 : vector<2x16xi1> to vector<2x16xi32>
    %26 = arith.sitofp %25 : vector<2x16xi32> to vector<2x16xf32>
    %27 = vector.extract_strided_slice %0 {offsets = [0, 0, 0], sizes = [2, 1, 32], strides = [1, 1, 1]} : vector<2x8x32xf32> to vector<2x1x32xf32>
    %28 = vector.shape_cast %27 : vector<2x1x32xf32> to vector<2x32xf32>
    %29 = tpu.concatenate %26, %28 in 1 : vector<2x16xf32>, vector<2x32xf32> -> vector<2x48xf32>
    %cst_26 = arith.constant 0.000000e+00 : f32
    %30 = vector.broadcast %cst_26 : f32 to vector<1x32xf32>
    %cst_27 = arith.constant 0.000000e+00 : f32
    %31 = vector.broadcast %cst_27 : f32 to vector<1x32xf32>
    %cst_28 = arith.constant 0.000000e+00 : f32
    %32 = vector.broadcast %cst_28 : f32 to vector<1x32xf32>
    %cst_29 = arith.constant 0.000000e+00 : f32
    %33 = vector.broadcast %cst_29 : f32 to vector<1x32xf32>
    %cst_30 = arith.constant 0.000000e+00 : f32
    %34 = vector.broadcast %cst_30 : f32 to vector<1x16xf32>
    %35 = vector.extract_strided_slice %29 {offsets = [0, 0], sizes = [1, 48], strides = [1, 1]} : vector<2x48xf32> to vector<1x48xf32>
    %36 = tpu.concatenate %35, %30 in 1 : vector<1x48xf32>, vector<1x32xf32> -> vector<1x80xf32>
    %cst_31 = arith.constant dense<0.000000e+00> : vector<1x128xf32>
    %37 = tpu.matmul %36, %15, %cst_31 {dimension_numbers = #tpu.dot_dimension_numbers<[1], [0], [0], [1], [0, 0, 1, 1], [], []>} : vector<1x80xf32>, vector<80x128xf32>, vector<1x128xf32> -> vector<1x128xf32>
    %38 = arith.addf %37, %19 : vector<1x128xf32>
    %39 = arith.negf %38 : vector<1x128xf32>
    %40 = math.exp %39 : vector<1x128xf32>
    %cst_32 = arith.constant 1.000000e+00 : f32
    %41 = vector.broadcast %cst_32 : f32 to vector<1x128xf32>
    %42 = arith.addf %41, %40 : vector<1x128xf32>
    %43 = arith.divf %41, %42 : vector<1x128xf32>
    %44 = math.tanh %38 : vector<1x128xf32>
    %45 = vector.extract_strided_slice %43 {offsets = [0, 0], sizes = [1, 32], strides = [1, 1]} : vector<1x128xf32> to vector<1x32xf32>
    %46 = vector.extract_strided_slice %43 {offsets = [0, 32], sizes = [1, 32], strides = [1, 1]} : vector<1x128xf32> to vector<1x32xf32>
    %47 = vector.extract_strided_slice %44 {offsets = [0, 64], sizes = [1, 32], strides = [1, 1]} : vector<1x128xf32> to vector<1x32xf32>
    %48 = vector.extract_strided_slice %43 {offsets = [0, 96], sizes = [1, 32], strides = [1, 1]} : vector<1x128xf32> to vector<1x32xf32>
    %49 = arith.mulf %46, %32 : vector<1x32xf32>
    %50 = arith.mulf %45, %47 : vector<1x32xf32>
    %51 = arith.addf %49, %50 : vector<1x32xf32>
    %52 = math.tanh %51 : vector<1x32xf32>
    %53 = arith.mulf %48, %52 : vector<1x32xf32>
    %54 = tpu.concatenate %53, %34, %31 in 1 : vector<1x32xf32>, vector<1x16xf32>, vector<1x32xf32> -> vector<1x80xf32>
    %cst_33 = arith.constant dense<0.000000e+00> : vector<1x128xf32>
    %55 = tpu.matmul %54, %17, %cst_33 {dimension_numbers = #tpu.dot_dimension_numbers<[1], [0], [0], [1], [0, 0, 1, 1], [], []>} : vector<1x80xf32>, vector<80x128xf32>, vector<1x128xf32> -> vector<1x128xf32>
    %56 = arith.addf %55, %21 : vector<1x128xf32>
    %57 = arith.negf %56 : vector<1x128xf32>
    %58 = math.exp %57 : vector<1x128xf32>
    %cst_34 = arith.constant 1.000000e+00 : f32
    %59 = vector.broadcast %cst_34 : f32 to vector<1x128xf32>
    %60 = arith.addf %59, %58 : vector<1x128xf32>
    %61 = arith.divf %59, %60 : vector<1x128xf32>
    %62 = math.tanh %56 : vector<1x128xf32>
    %63 = vector.extract_strided_slice %61 {offsets = [0, 0], sizes = [1, 32], strides = [1, 1]} : vector<1x128xf32> to vector<1x32xf32>
    %64 = vector.extract_strided_slice %61 {offsets = [0, 32], sizes = [1, 32], strides = [1, 1]} : vector<1x128xf32> to vector<1x32xf32>
    %65 = vector.extract_strided_slice %62 {offsets = [0, 64], sizes = [1, 32], strides = [1, 1]} : vector<1x128xf32> to vector<1x32xf32>
    %66 = vector.extract_strided_slice %61 {offsets = [0, 96], sizes = [1, 32], strides = [1, 1]} : vector<1x128xf32> to vector<1x32xf32>
    %67 = arith.mulf %64, %33 : vector<1x32xf32>
    %68 = arith.mulf %63, %65 : vector<1x32xf32>
    %69 = arith.addf %67, %68 : vector<1x32xf32>
    %70 = math.tanh %69 : vector<1x32xf32>
    %71 = arith.mulf %66, %70 : vector<1x32xf32>
    %72 = vector.extract_strided_slice %29 {offsets = [1, 0], sizes = [1, 48], strides = [1, 1]} : vector<2x48xf32> to vector<1x48xf32>
    %73 = tpu.concatenate %72, %53 in 1 : vector<1x48xf32>, vector<1x32xf32> -> vector<1x80xf32>
    %cst_35 = arith.constant dense<0.000000e+00> : vector<1x128xf32>
    %74 = tpu.matmul %73, %15, %cst_35 {dimension_numbers = #tpu.dot_dimension_numbers<[1], [0], [0], [1], [0, 0, 1, 1], [], []>} : vector<1x80xf32>, vector<80x128xf32>, vector<1x128xf32> -> vector<1x128xf32>
    %75 = arith.addf %74, %19 : vector<1x128xf32>
    %76 = arith.negf %75 : vector<1x128xf32>
    %77 = math.exp %76 : vector<1x128xf32>
    %cst_36 = arith.constant 1.000000e+00 : f32
    %78 = vector.broadcast %cst_36 : f32 to vector<1x128xf32>
    %79 = arith.addf %78, %77 : vector<1x128xf32>
    %80 = arith.divf %78, %79 : vector<1x128xf32>
    %81 = math.tanh %75 : vector<1x128xf32>
    %82 = vector.extract_strided_slice %80 {offsets = [0, 0], sizes = [1, 32], strides = [1, 1]} : vector<1x128xf32> to vector<1x32xf32>
    %83 = vector.extract_strided_slice %80 {offsets = [0, 32], sizes = [1, 32], strides = [1, 1]} : vector<1x128xf32> to vector<1x32xf32>
    %84 = vector.extract_strided_slice %81 {offsets = [0, 64], sizes = [1, 32], strides = [1, 1]} : vector<1x128xf32> to vector<1x32xf32>
    %85 = vector.extract_strided_slice %80 {offsets = [0, 96], sizes = [1, 32], strides = [1, 1]} : vector<1x128xf32> to vector<1x32xf32>
    %86 = arith.mulf %83, %51 : vector<1x32xf32>
    %87 = arith.mulf %82, %84 : vector<1x32xf32>
    %88 = arith.addf %86, %87 : vector<1x32xf32>
    %89 = math.tanh %88 : vector<1x32xf32>
    %90 = arith.mulf %85, %89 : vector<1x32xf32>
    %91 = tpu.concatenate %90, %34, %71 in 1 : vector<1x32xf32>, vector<1x16xf32>, vector<1x32xf32> -> vector<1x80xf32>
    %cst_37 = arith.constant dense<0.000000e+00> : vector<1x128xf32>
    %92 = tpu.matmul %91, %17, %cst_37 {dimension_numbers = #tpu.dot_dimension_numbers<[1], [0], [0], [1], [0, 0, 1, 1], [], []>} : vector<1x80xf32>, vector<80x128xf32>, vector<1x128xf32> -> vector<1x128xf32>
    %93 = arith.addf %92, %21 : vector<1x128xf32>
    %94 = arith.negf %93 : vector<1x128xf32>
    %95 = math.exp %94 : vector<1x128xf32>
    %cst_38 = arith.constant 1.000000e+00 : f32
    %96 = vector.broadcast %cst_38 : f32 to vector<1x128xf32>
    %97 = arith.addf %96, %95 : vector<1x128xf32>
    %98 = arith.divf %96, %97 : vector<1x128xf32>
    %99 = math.tanh %93 : vector<1x128xf32>
    %100 = vector.extract_strided_slice %98 {offsets = [0, 0], sizes = [1, 32], strides = [1, 1]} : vector<1x128xf32> to vector<1x32xf32>
    %101 = vector.extract_strided_slice %98 {offsets = [0, 32], sizes = [1, 32], strides = [1, 1]} : vector<1x128xf32> to vector<1x32xf32>
    %102 = vector.extract_strided_slice %99 {offsets = [0, 64], sizes = [1, 32], strides = [1, 1]} : vector<1x128xf32> to vector<1x32xf32>
    %103 = vector.extract_strided_slice %98 {offsets = [0, 96], sizes = [1, 32], strides = [1, 1]} : vector<1x128xf32> to vector<1x32xf32>
    %104 = arith.mulf %101, %69 : vector<1x32xf32>
    %105 = arith.mulf %100, %102 : vector<1x32xf32>
    %106 = arith.addf %104, %105 : vector<1x32xf32>
    %107 = math.tanh %106 : vector<1x32xf32>
    %108 = arith.mulf %103, %107 : vector<1x32xf32>
    %109 = tpu.concatenate %71, %108 in 0 : vector<1x32xf32>, vector<1x32xf32> -> vector<2x32xf32>
    %cst_39 = arith.constant dense<0.000000e+00> : vector<2x32xf32>
    %110 = tpu.matmul %109, %10, %cst_39 {dimension_numbers = #tpu.dot_dimension_numbers<[1], [0], [0], [1], [0, 0, 1, 1], [], []>} : vector<2x32xf32>, vector<32x32xf32>, vector<2x32xf32> -> vector<2x32xf32>
    %111 = vector.broadcast %11 : vector<1x32xf32> to vector<2x32xf32>
    %112 = arith.addf %110, %111 : vector<2x32xf32>
    %cst_40 = arith.constant 0.000000e+00 : f32
    %113 = vector.broadcast %cst_40 : f32 to vector<2x32xf32>
    %114 = arith.maximumf %112, %113 : vector<2x32xf32>
    %115 = vector.shape_cast %114 : vector<2x32xf32> to vector<2x1x32xf32>
    %116 = vector.broadcast %115 : vector<2x1x32xf32> to vector<2x8x32xf32>
    %117 = arith.mulf %116, %9 : vector<2x8x32xf32>
    %cst_41 = arith.constant dense<0.000000e+00> : vector<2x8xf32>
    %118 = vector.multi_reduction <add>, %117, %cst_41 [2] : vector<2x8x32xf32> to vector<2x8xf32>
    %cst_42 = arith.constant dense<0xFF800000> : vector<2xf32>
    %119 = vector.multi_reduction <maximumf>, %118, %cst_42 [1] : vector<2x8xf32> to vector<2xf32>
    %120 = vector.shape_cast %119 : vector<2xf32> to vector<2x1xf32>
    %121 = vector.broadcast %120 : vector<2x1xf32> to vector<2x8xf32>
    %122 = arith.subf %118, %121 : vector<2x8xf32>
    %123 = math.exp %122 : vector<2x8xf32>
    %cst_43 = arith.constant dense<0.000000e+00> : vector<2xf32>
    %124 = vector.multi_reduction <add>, %123, %cst_43 [1] : vector<2x8xf32> to vector<2xf32>
    %125 = vector.shape_cast %124 : vector<2xf32> to vector<2x1xf32>
    %126 = tpu.reciprocal %125 {approx = true} : vector<2x1xf32> -> vector<2x1xf32>
    %127 = vector.broadcast %126 : vector<2x1xf32> to vector<2x8xf32>
    %128 = arith.mulf %123, %127 : vector<2x8xf32>
    %129 = vector.shape_cast %128 : vector<2x8xf32> to vector<2x8x1xf32>
    %130 = vector.broadcast %129 : vector<2x8x1xf32> to vector<2x8x32xf32>
    %131 = arith.mulf %0, %130 : vector<2x8x32xf32>
    %cst_44 = arith.constant dense<0.000000e+00> : vector<2x32xf32>
    %132 = vector.multi_reduction <add>, %131, %cst_44 [1] : vector<2x8x32xf32> to vector<2x32xf32>
    %133 = tpu.concatenate %109, %132 in 1 : vector<2x32xf32>, vector<2x32xf32> -> vector<2x64xf32>
    %cst_45 = arith.constant dense<0.000000e+00> : vector<2x16xf32>
    %134 = tpu.matmul %133, %12, %cst_45 {dimension_numbers = #tpu.dot_dimension_numbers<[1], [0], [0], [1], [0, 0, 1, 1], [], []>} : vector<2x64xf32>, vector<64x16xf32>, vector<2x16xf32> -> vector<2x16xf32>
    %135 = vector.broadcast %13 : vector<1x16xf32> to vector<2x16xf32>
    %136 = arith.addf %134, %135 : vector<2x16xf32>
    %cst_46 = arith.constant dense<0xFF800000> : vector<2xf32>
    %137 = vector.multi_reduction <maximumf>, %136, %cst_46 [1] : vector<2x16xf32> to vector<2xf32>
    %138 = vector.shape_cast %137 : vector<2xf32> to vector<2x1xf32>
    %139 = vector.broadcast %138 : vector<2x1xf32> to vector<2x16xf32>
    %140 = arith.subf %136, %139 : vector<2x16xf32>
    %141 = math.exp %140 : vector<2x16xf32>
    %cst_47 = arith.constant dense<0.000000e+00> : vector<2xf32>
    %142 = vector.multi_reduction <add>, %141, %cst_47 [1] : vector<2x16xf32> to vector<2xf32>
    %143 = vector.shape_cast %142 : vector<2xf32> to vector<2x1xf32>
    %144 = math.log %143 : vector<2x1xf32>
    %145 = vector.broadcast %144 : vector<2x1xf32> to vector<2x16xf32>
    %146 = arith.subf %140, %145 : vector<2x16xf32>
    %147 = tpu.concatenate %146, %132 in 1 : vector<2x16xf32>, vector<2x32xf32> -> vector<2x48xf32>
    %148 = vector.extract_strided_slice %147 {offsets = [0, 0], sizes = [1, 48], strides = [1, 1]} : vector<2x48xf32> to vector<1x48xf32>
    %149 = tpu.concatenate %148, %90 in 1 : vector<1x48xf32>, vector<1x32xf32> -> vector<1x80xf32>
    %cst_48 = arith.constant dense<0.000000e+00> : vector<1x128xf32>
    %150 = tpu.matmul %149, %15, %cst_48 {dimension_numbers = #tpu.dot_dimension_numbers<[1], [0], [0], [1], [0, 0, 1, 1], [], []>} : vector<1x80xf32>, vector<80x128xf32>, vector<1x128xf32> -> vector<1x128xf32>
    %151 = arith.addf %150, %19 : vector<1x128xf32>
    %152 = arith.negf %151 : vector<1x128xf32>
    %153 = math.exp %152 : vector<1x128xf32>
    %cst_49 = arith.constant 1.000000e+00 : f32
    %154 = vector.broadcast %cst_49 : f32 to vector<1x128xf32>
    %155 = arith.addf %154, %153 : vector<1x128xf32>
    %156 = arith.divf %154, %155 : vector<1x128xf32>
    %157 = math.tanh %151 : vector<1x128xf32>
    %158 = vector.extract_strided_slice %156 {offsets = [0, 0], sizes = [1, 32], strides = [1, 1]} : vector<1x128xf32> to vector<1x32xf32>
    %159 = vector.extract_strided_slice %156 {offsets = [0, 32], sizes = [1, 32], strides = [1, 1]} : vector<1x128xf32> to vector<1x32xf32>
    %160 = vector.extract_strided_slice %157 {offsets = [0, 64], sizes = [1, 32], strides = [1, 1]} : vector<1x128xf32> to vector<1x32xf32>
    %161 = vector.extract_strided_slice %156 {offsets = [0, 96], sizes = [1, 32], strides = [1, 1]} : vector<1x128xf32> to vector<1x32xf32>
    %162 = arith.mulf %159, %88 : vector<1x32xf32>
    %163 = arith.mulf %158, %160 : vector<1x32xf32>
    %164 = arith.addf %162, %163 : vector<1x32xf32>
    %165 = math.tanh %164 : vector<1x32xf32>
    %166 = arith.mulf %161, %165 : vector<1x32xf32>
    %167 = tpu.concatenate %166, %34, %108 in 1 : vector<1x32xf32>, vector<1x16xf32>, vector<1x32xf32> -> vector<1x80xf32>
    %cst_50 = arith.constant dense<0.000000e+00> : vector<1x128xf32>
    %168 = tpu.matmul %167, %17, %cst_50 {dimension_numbers = #tpu.dot_dimension_numbers<[1], [0], [0], [1], [0, 0, 1, 1], [], []>} : vector<1x80xf32>, vector<80x128xf32>, vector<1x128xf32> -> vector<1x128xf32>
    %169 = arith.addf %168, %21 : vector<1x128xf32>
    %170 = arith.negf %169 : vector<1x128xf32>
    %171 = math.exp %170 : vector<1x128xf32>
    %cst_51 = arith.constant 1.000000e+00 : f32
    %172 = vector.broadcast %cst_51 : f32 to vector<1x128xf32>
    %173 = arith.addf %172, %171 : vector<1x128xf32>
    %174 = arith.divf %172, %173 : vector<1x128xf32>
    %175 = math.tanh %169 : vector<1x128xf32>
    %176 = vector.extract_strided_slice %174 {offsets = [0, 0], sizes = [1, 32], strides = [1, 1]} : vector<1x128xf32> to vector<1x32xf32>
    %177 = vector.extract_strided_slice %174 {offsets = [0, 32], sizes = [1, 32], strides = [1, 1]} : vector<1x128xf32> to vector<1x32xf32>
    %178 = vector.extract_strided_slice %175 {offsets = [0, 64], sizes = [1, 32], strides = [1, 1]} : vector<1x128xf32> to vector<1x32xf32>
    %179 = vector.extract_strided_slice %174 {offsets = [0, 96], sizes = [1, 32], strides = [1, 1]} : vector<1x128xf32> to vector<1x32xf32>
    %180 = arith.mulf %177, %106 : vector<1x32xf32>
    %181 = arith.mulf %176, %178 : vector<1x32xf32>
    %182 = arith.addf %180, %181 : vector<1x32xf32>
    %183 = math.tanh %182 : vector<1x32xf32>
    %184 = arith.mulf %179, %183 : vector<1x32xf32>
    %185 = vector.extract_strided_slice %147 {offsets = [1, 0], sizes = [1, 48], strides = [1, 1]} : vector<2x48xf32> to vector<1x48xf32>
    %186 = tpu.concatenate %185, %166 in 1 : vector<1x48xf32>, vector<1x32xf32> -> vector<1x80xf32>
    %cst_52 = arith.constant dense<0.000000e+00> : vector<1x128xf32>
    %187 = tpu.matmul %186, %15, %cst_52 {dimension_numbers = #tpu.dot_dimension_numbers<[1], [0], [0], [1], [0, 0, 1, 1], [], []>} : vector<1x80xf32>, vector<80x128xf32>, vector<1x128xf32> -> vector<1x128xf32>
    %188 = arith.addf %187, %19 : vector<1x128xf32>
    %189 = arith.negf %188 : vector<1x128xf32>
    %190 = math.exp %189 : vector<1x128xf32>
    %cst_53 = arith.constant 1.000000e+00 : f32
    %191 = vector.broadcast %cst_53 : f32 to vector<1x128xf32>
    %192 = arith.addf %191, %190 : vector<1x128xf32>
    %193 = arith.divf %191, %192 : vector<1x128xf32>
    %194 = math.tanh %188 : vector<1x128xf32>
    %195 = vector.extract_strided_slice %193 {offsets = [0, 0], sizes = [1, 32], strides = [1, 1]} : vector<1x128xf32> to vector<1x32xf32>
    %196 = vector.extract_strided_slice %193 {offsets = [0, 32], sizes = [1, 32], strides = [1, 1]} : vector<1x128xf32> to vector<1x32xf32>
    %197 = vector.extract_strided_slice %194 {offsets = [0, 64], sizes = [1, 32], strides = [1, 1]} : vector<1x128xf32> to vector<1x32xf32>
    %198 = vector.extract_strided_slice %193 {offsets = [0, 96], sizes = [1, 32], strides = [1, 1]} : vector<1x128xf32> to vector<1x32xf32>
    %199 = arith.mulf %196, %164 : vector<1x32xf32>
    %200 = arith.mulf %195, %197 : vector<1x32xf32>
    %201 = arith.addf %199, %200 : vector<1x32xf32>
    %202 = math.tanh %201 : vector<1x32xf32>
    %203 = arith.mulf %198, %202 : vector<1x32xf32>
    %204 = tpu.concatenate %203, %34, %184 in 1 : vector<1x32xf32>, vector<1x16xf32>, vector<1x32xf32> -> vector<1x80xf32>
    %cst_54 = arith.constant dense<0.000000e+00> : vector<1x128xf32>
    %205 = tpu.matmul %204, %17, %cst_54 {dimension_numbers = #tpu.dot_dimension_numbers<[1], [0], [0], [1], [0, 0, 1, 1], [], []>} : vector<1x80xf32>, vector<80x128xf32>, vector<1x128xf32> -> vector<1x128xf32>
    %206 = arith.addf %205, %21 : vector<1x128xf32>
    %207 = arith.negf %206 : vector<1x128xf32>
    %208 = math.exp %207 : vector<1x128xf32>
    %cst_55 = arith.constant 1.000000e+00 : f32
    %209 = vector.broadcast %cst_55 : f32 to vector<1x128xf32>
    %210 = arith.addf %209, %208 : vector<1x128xf32>
    %211 = arith.divf %209, %210 : vector<1x128xf32>
    %212 = math.tanh %206 : vector<1x128xf32>
    %213 = vector.extract_strided_slice %211 {offsets = [0, 0], sizes = [1, 32], strides = [1, 1]} : vector<1x128xf32> to vector<1x32xf32>
    %214 = vector.extract_strided_slice %211 {offsets = [0, 32], sizes = [1, 32], strides = [1, 1]} : vector<1x128xf32> to vector<1x32xf32>
    %215 = vector.extract_strided_slice %212 {offsets = [0, 64], sizes = [1, 32], strides = [1, 1]} : vector<1x128xf32> to vector<1x32xf32>
    %216 = vector.extract_strided_slice %211 {offsets = [0, 96], sizes = [1, 32], strides = [1, 1]} : vector<1x128xf32> to vector<1x32xf32>
    %217 = arith.mulf %214, %182 : vector<1x32xf32>
    %218 = arith.mulf %213, %215 : vector<1x32xf32>
    %219 = arith.addf %217, %218 : vector<1x32xf32>
    %220 = math.tanh %219 : vector<1x32xf32>
    %221 = arith.mulf %216, %220 : vector<1x32xf32>
    %222 = tpu.concatenate %184, %221 in 0 : vector<1x32xf32>, vector<1x32xf32> -> vector<2x32xf32>
    %cst_56 = arith.constant dense<0.000000e+00> : vector<2x32xf32>
    %223 = tpu.matmul %222, %10, %cst_56 {dimension_numbers = #tpu.dot_dimension_numbers<[1], [0], [0], [1], [0, 0, 1, 1], [], []>} : vector<2x32xf32>, vector<32x32xf32>, vector<2x32xf32> -> vector<2x32xf32>
    %224 = vector.broadcast %11 : vector<1x32xf32> to vector<2x32xf32>
    %225 = arith.addf %223, %224 : vector<2x32xf32>
    %cst_57 = arith.constant 0.000000e+00 : f32
    %226 = vector.broadcast %cst_57 : f32 to vector<2x32xf32>
    %227 = arith.maximumf %225, %226 : vector<2x32xf32>
    %228 = vector.shape_cast %227 : vector<2x32xf32> to vector<2x1x32xf32>
    %229 = vector.broadcast %228 : vector<2x1x32xf32> to vector<2x8x32xf32>
    %230 = arith.mulf %229, %9 : vector<2x8x32xf32>
    %cst_58 = arith.constant dense<0.000000e+00> : vector<2x8xf32>
    %231 = vector.multi_reduction <add>, %230, %cst_58 [2] : vector<2x8x32xf32> to vector<2x8xf32>
    %cst_59 = arith.constant dense<0xFF800000> : vector<2xf32>
    %232 = vector.multi_reduction <maximumf>, %231, %cst_59 [1] : vector<2x8xf32> to vector<2xf32>
    %233 = vector.shape_cast %232 : vector<2xf32> to vector<2x1xf32>
    %234 = vector.broadcast %233 : vector<2x1xf32> to vector<2x8xf32>
    %235 = arith.subf %231, %234 : vector<2x8xf32>
    %236 = math.exp %235 : vector<2x8xf32>
    %cst_60 = arith.constant dense<0.000000e+00> : vector<2xf32>
    %237 = vector.multi_reduction <add>, %236, %cst_60 [1] : vector<2x8xf32> to vector<2xf32>
    %238 = vector.shape_cast %237 : vector<2xf32> to vector<2x1xf32>
    %239 = tpu.reciprocal %238 {approx = true} : vector<2x1xf32> -> vector<2x1xf32>
    %240 = vector.broadcast %239 : vector<2x1xf32> to vector<2x8xf32>
    %241 = arith.mulf %236, %240 : vector<2x8xf32>
    %242 = vector.shape_cast %241 : vector<2x8xf32> to vector<2x8x1xf32>
    %243 = vector.broadcast %242 : vector<2x8x1xf32> to vector<2x8x32xf32>
    %244 = arith.mulf %0, %243 : vector<2x8x32xf32>
    %cst_61 = arith.constant dense<0.000000e+00> : vector<2x32xf32>
    %245 = vector.multi_reduction <add>, %244, %cst_61 [1] : vector<2x8x32xf32> to vector<2x32xf32>
    %246 = tpu.concatenate %222, %245 in 1 : vector<2x32xf32>, vector<2x32xf32> -> vector<2x64xf32>
    %cst_62 = arith.constant dense<0.000000e+00> : vector<2x16xf32>
    %247 = tpu.matmul %246, %12, %cst_62 {dimension_numbers = #tpu.dot_dimension_numbers<[1], [0], [0], [1], [0, 0, 1, 1], [], []>} : vector<2x64xf32>, vector<64x16xf32>, vector<2x16xf32> -> vector<2x16xf32>
    %248 = vector.broadcast %13 : vector<1x16xf32> to vector<2x16xf32>
    %249 = arith.addf %247, %248 : vector<2x16xf32>
    %cst_63 = arith.constant dense<0xFF800000> : vector<2xf32>
    %250 = vector.multi_reduction <maximumf>, %249, %cst_63 [1] : vector<2x16xf32> to vector<2xf32>
    %251 = vector.shape_cast %250 : vector<2xf32> to vector<2x1xf32>
    %252 = vector.broadcast %251 : vector<2x1xf32> to vector<2x16xf32>
    %253 = arith.subf %249, %252 : vector<2x16xf32>
    %254 = math.exp %253 : vector<2x16xf32>
    %cst_64 = arith.constant dense<0.000000e+00> : vector<2xf32>
    %255 = vector.multi_reduction <add>, %254, %cst_64 [1] : vector<2x16xf32> to vector<2xf32>
    %256 = vector.shape_cast %255 : vector<2xf32> to vector<2x1xf32>
    %257 = math.log %256 : vector<2x1xf32>
    %258 = vector.broadcast %257 : vector<2x1xf32> to vector<2x16xf32>
    %259 = arith.subf %253, %258 : vector<2x16xf32>
    %260 = tpu.concatenate %259, %245 in 1 : vector<2x16xf32>, vector<2x32xf32> -> vector<2x48xf32>
    %261 = vector.extract_strided_slice %260 {offsets = [0, 0], sizes = [1, 48], strides = [1, 1]} : vector<2x48xf32> to vector<1x48xf32>
    %262 = tpu.concatenate %261, %203 in 1 : vector<1x48xf32>, vector<1x32xf32> -> vector<1x80xf32>
    %cst_65 = arith.constant dense<0.000000e+00> : vector<1x128xf32>
    %263 = tpu.matmul %262, %15, %cst_65 {dimension_numbers = #tpu.dot_dimension_numbers<[1], [0], [0], [1], [0, 0, 1, 1], [], []>} : vector<1x80xf32>, vector<80x128xf32>, vector<1x128xf32> -> vector<1x128xf32>
    %264 = arith.addf %263, %19 : vector<1x128xf32>
    %265 = arith.negf %264 : vector<1x128xf32>
    %266 = math.exp %265 : vector<1x128xf32>
    %cst_66 = arith.constant 1.000000e+00 : f32
    %267 = vector.broadcast %cst_66 : f32 to vector<1x128xf32>
    %268 = arith.addf %267, %266 : vector<1x128xf32>
    %269 = arith.divf %267, %268 : vector<1x128xf32>
    %270 = math.tanh %264 : vector<1x128xf32>
    %271 = vector.extract_strided_slice %269 {offsets = [0, 0], sizes = [1, 32], strides = [1, 1]} : vector<1x128xf32> to vector<1x32xf32>
    %272 = vector.extract_strided_slice %269 {offsets = [0, 32], sizes = [1, 32], strides = [1, 1]} : vector<1x128xf32> to vector<1x32xf32>
    %273 = vector.extract_strided_slice %270 {offsets = [0, 64], sizes = [1, 32], strides = [1, 1]} : vector<1x128xf32> to vector<1x32xf32>
    %274 = vector.extract_strided_slice %269 {offsets = [0, 96], sizes = [1, 32], strides = [1, 1]} : vector<1x128xf32> to vector<1x32xf32>
    %275 = arith.mulf %272, %201 : vector<1x32xf32>
    %276 = arith.mulf %271, %273 : vector<1x32xf32>
    %277 = arith.addf %275, %276 : vector<1x32xf32>
    %278 = math.tanh %277 : vector<1x32xf32>
    %279 = arith.mulf %274, %278 : vector<1x32xf32>
    %280 = tpu.concatenate %279, %34, %221 in 1 : vector<1x32xf32>, vector<1x16xf32>, vector<1x32xf32> -> vector<1x80xf32>
    %cst_67 = arith.constant dense<0.000000e+00> : vector<1x128xf32>
    %281 = tpu.matmul %280, %17, %cst_67 {dimension_numbers = #tpu.dot_dimension_numbers<[1], [0], [0], [1], [0, 0, 1, 1], [], []>} : vector<1x80xf32>, vector<80x128xf32>, vector<1x128xf32> -> vector<1x128xf32>
    %282 = arith.addf %281, %21 : vector<1x128xf32>
    %283 = arith.negf %282 : vector<1x128xf32>
    %284 = math.exp %283 : vector<1x128xf32>
    %cst_68 = arith.constant 1.000000e+00 : f32
    %285 = vector.broadcast %cst_68 : f32 to vector<1x128xf32>
    %286 = arith.addf %285, %284 : vector<1x128xf32>
    %287 = arith.divf %285, %286 : vector<1x128xf32>
    %288 = math.tanh %282 : vector<1x128xf32>
    %289 = vector.extract_strided_slice %287 {offsets = [0, 0], sizes = [1, 32], strides = [1, 1]} : vector<1x128xf32> to vector<1x32xf32>
    %290 = vector.extract_strided_slice %287 {offsets = [0, 32], sizes = [1, 32], strides = [1, 1]} : vector<1x128xf32> to vector<1x32xf32>
    %291 = vector.extract_strided_slice %288 {offsets = [0, 64], sizes = [1, 32], strides = [1, 1]} : vector<1x128xf32> to vector<1x32xf32>
    %292 = vector.extract_strided_slice %287 {offsets = [0, 96], sizes = [1, 32], strides = [1, 1]} : vector<1x128xf32> to vector<1x32xf32>
    %293 = arith.mulf %290, %219 : vector<1x32xf32>
    %294 = arith.mulf %289, %291 : vector<1x32xf32>
    %295 = arith.addf %293, %294 : vector<1x32xf32>
    %296 = math.tanh %295 : vector<1x32xf32>
    %297 = arith.mulf %292, %296 : vector<1x32xf32>
    %298 = vector.extract_strided_slice %260 {offsets = [1, 0], sizes = [1, 48], strides = [1, 1]} : vector<2x48xf32> to vector<1x48xf32>
    %299 = tpu.concatenate %298, %279 in 1 : vector<1x48xf32>, vector<1x32xf32> -> vector<1x80xf32>
    %cst_69 = arith.constant dense<0.000000e+00> : vector<1x128xf32>
    %300 = tpu.matmul %299, %15, %cst_69 {dimension_numbers = #tpu.dot_dimension_numbers<[1], [0], [0], [1], [0, 0, 1, 1], [], []>} : vector<1x80xf32>, vector<80x128xf32>, vector<1x128xf32> -> vector<1x128xf32>
    %301 = arith.addf %300, %19 : vector<1x128xf32>
    %302 = arith.negf %301 : vector<1x128xf32>
    %303 = math.exp %302 : vector<1x128xf32>
    %cst_70 = arith.constant 1.000000e+00 : f32
    %304 = vector.broadcast %cst_70 : f32 to vector<1x128xf32>
    %305 = arith.addf %304, %303 : vector<1x128xf32>
    %306 = arith.divf %304, %305 : vector<1x128xf32>
    %307 = math.tanh %301 : vector<1x128xf32>
    %308 = vector.extract_strided_slice %306 {offsets = [0, 0], sizes = [1, 32], strides = [1, 1]} : vector<1x128xf32> to vector<1x32xf32>
    %309 = vector.extract_strided_slice %306 {offsets = [0, 32], sizes = [1, 32], strides = [1, 1]} : vector<1x128xf32> to vector<1x32xf32>
    %310 = vector.extract_strided_slice %307 {offsets = [0, 64], sizes = [1, 32], strides = [1, 1]} : vector<1x128xf32> to vector<1x32xf32>
    %311 = vector.extract_strided_slice %306 {offsets = [0, 96], sizes = [1, 32], strides = [1, 1]} : vector<1x128xf32> to vector<1x32xf32>
    %312 = arith.mulf %309, %277 : vector<1x32xf32>
    %313 = arith.mulf %308, %310 : vector<1x32xf32>
    %314 = arith.addf %312, %313 : vector<1x32xf32>
    %315 = math.tanh %314 : vector<1x32xf32>
    %316 = arith.mulf %311, %315 : vector<1x32xf32>
    %317 = tpu.concatenate %316, %34, %297 in 1 : vector<1x32xf32>, vector<1x16xf32>, vector<1x32xf32> -> vector<1x80xf32>
    %cst_71 = arith.constant dense<0.000000e+00> : vector<1x128xf32>
    %318 = tpu.matmul %317, %17, %cst_71 {dimension_numbers = #tpu.dot_dimension_numbers<[1], [0], [0], [1], [0, 0, 1, 1], [], []>} : vector<1x80xf32>, vector<80x128xf32>, vector<1x128xf32> -> vector<1x128xf32>
    %319 = arith.addf %318, %21 : vector<1x128xf32>
    %320 = arith.negf %319 : vector<1x128xf32>
    %321 = math.exp %320 : vector<1x128xf32>
    %cst_72 = arith.constant 1.000000e+00 : f32
    %322 = vector.broadcast %cst_72 : f32 to vector<1x128xf32>
    %323 = arith.addf %322, %321 : vector<1x128xf32>
    %324 = arith.divf %322, %323 : vector<1x128xf32>
    %325 = math.tanh %319 : vector<1x128xf32>
    %326 = vector.extract_strided_slice %324 {offsets = [0, 0], sizes = [1, 32], strides = [1, 1]} : vector<1x128xf32> to vector<1x32xf32>
    %327 = vector.extract_strided_slice %324 {offsets = [0, 32], sizes = [1, 32], strides = [1, 1]} : vector<1x128xf32> to vector<1x32xf32>
    %328 = vector.extract_strided_slice %325 {offsets = [0, 64], sizes = [1, 32], strides = [1, 1]} : vector<1x128xf32> to vector<1x32xf32>
    %329 = vector.extract_strided_slice %324 {offsets = [0, 96], sizes = [1, 32], strides = [1, 1]} : vector<1x128xf32> to vector<1x32xf32>
    %330 = arith.mulf %327, %295 : vector<1x32xf32>
    %331 = arith.mulf %326, %328 : vector<1x32xf32>
    %332 = arith.addf %330, %331 : vector<1x32xf32>
    %333 = math.tanh %332 : vector<1x32xf32>
    %334 = arith.mulf %329, %333 : vector<1x32xf32>
    %335 = tpu.concatenate %297, %334 in 0 : vector<1x32xf32>, vector<1x32xf32> -> vector<2x32xf32>
    %cst_73 = arith.constant dense<0.000000e+00> : vector<2x32xf32>
    %336 = tpu.matmul %335, %10, %cst_73 {dimension_numbers = #tpu.dot_dimension_numbers<[1], [0], [0], [1], [0, 0, 1, 1], [], []>} : vector<2x32xf32>, vector<32x32xf32>, vector<2x32xf32> -> vector<2x32xf32>
    %337 = vector.broadcast %11 : vector<1x32xf32> to vector<2x32xf32>
    %338 = arith.addf %336, %337 : vector<2x32xf32>
    %cst_74 = arith.constant 0.000000e+00 : f32
    %339 = vector.broadcast %cst_74 : f32 to vector<2x32xf32>
    %340 = arith.maximumf %338, %339 : vector<2x32xf32>
    %341 = vector.shape_cast %340 : vector<2x32xf32> to vector<2x1x32xf32>
    %342 = vector.broadcast %341 : vector<2x1x32xf32> to vector<2x8x32xf32>
    %343 = arith.mulf %342, %9 : vector<2x8x32xf32>
    %cst_75 = arith.constant dense<0.000000e+00> : vector<2x8xf32>
    %344 = vector.multi_reduction <add>, %343, %cst_75 [2] : vector<2x8x32xf32> to vector<2x8xf32>
    %cst_76 = arith.constant dense<0xFF800000> : vector<2xf32>
    %345 = vector.multi_reduction <maximumf>, %344, %cst_76 [1] : vector<2x8xf32> to vector<2xf32>
    %346 = vector.shape_cast %345 : vector<2xf32> to vector<2x1xf32>
    %347 = vector.broadcast %346 : vector<2x1xf32> to vector<2x8xf32>
    %348 = arith.subf %344, %347 : vector<2x8xf32>
    %349 = math.exp %348 : vector<2x8xf32>
    %cst_77 = arith.constant dense<0.000000e+00> : vector<2xf32>
    %350 = vector.multi_reduction <add>, %349, %cst_77 [1] : vector<2x8xf32> to vector<2xf32>
    %351 = vector.shape_cast %350 : vector<2xf32> to vector<2x1xf32>
    %352 = tpu.reciprocal %351 {approx = true} : vector<2x1xf32> -> vector<2x1xf32>
    %353 = vector.broadcast %352 : vector<2x1xf32> to vector<2x8xf32>
    %354 = arith.mulf %349, %353 : vector<2x8xf32>
    %355 = vector.shape_cast %354 : vector<2x8xf32> to vector<2x8x1xf32>
    %356 = vector.broadcast %355 : vector<2x8x1xf32> to vector<2x8x32xf32>
    %357 = arith.mulf %0, %356 : vector<2x8x32xf32>
    %cst_78 = arith.constant dense<0.000000e+00> : vector<2x32xf32>
    %358 = vector.multi_reduction <add>, %357, %cst_78 [1] : vector<2x8x32xf32> to vector<2x32xf32>
    %359 = tpu.concatenate %335, %358 in 1 : vector<2x32xf32>, vector<2x32xf32> -> vector<2x64xf32>
    %cst_79 = arith.constant dense<0.000000e+00> : vector<2x16xf32>
    %360 = tpu.matmul %359, %12, %cst_79 {dimension_numbers = #tpu.dot_dimension_numbers<[1], [0], [0], [1], [0, 0, 1, 1], [], []>} : vector<2x64xf32>, vector<64x16xf32>, vector<2x16xf32> -> vector<2x16xf32>
    %361 = vector.broadcast %13 : vector<1x16xf32> to vector<2x16xf32>
    %362 = arith.addf %360, %361 : vector<2x16xf32>
    %cst_80 = arith.constant dense<0xFF800000> : vector<2xf32>
    %363 = vector.multi_reduction <maximumf>, %362, %cst_80 [1] : vector<2x16xf32> to vector<2xf32>
    %364 = vector.shape_cast %363 : vector<2xf32> to vector<2x1xf32>
    %365 = vector.broadcast %364 : vector<2x1xf32> to vector<2x16xf32>
    %366 = arith.subf %362, %365 : vector<2x16xf32>
    %367 = math.exp %366 : vector<2x16xf32>
    %cst_81 = arith.constant dense<0.000000e+00> : vector<2xf32>
    %368 = vector.multi_reduction <add>, %367, %cst_81 [1] : vector<2x16xf32> to vector<2xf32>
    %369 = vector.shape_cast %368 : vector<2xf32> to vector<2x1xf32>
    %370 = math.log %369 : vector<2x1xf32>
    %371 = vector.broadcast %370 : vector<2x1xf32> to vector<2x16xf32>
    %372 = arith.subf %366, %371 : vector<2x16xf32>
    %373 = tpu.concatenate %372, %358 in 1 : vector<2x16xf32>, vector<2x32xf32> -> vector<2x48xf32>
    %374 = vector.extract_strided_slice %373 {offsets = [0, 0], sizes = [1, 48], strides = [1, 1]} : vector<2x48xf32> to vector<1x48xf32>
    %375 = tpu.concatenate %374, %316 in 1 : vector<1x48xf32>, vector<1x32xf32> -> vector<1x80xf32>
    %cst_82 = arith.constant dense<0.000000e+00> : vector<1x128xf32>
    %376 = tpu.matmul %375, %15, %cst_82 {dimension_numbers = #tpu.dot_dimension_numbers<[1], [0], [0], [1], [0, 0, 1, 1], [], []>} : vector<1x80xf32>, vector<80x128xf32>, vector<1x128xf32> -> vector<1x128xf32>
    %377 = arith.addf %376, %19 : vector<1x128xf32>
    %378 = arith.negf %377 : vector<1x128xf32>
    %379 = math.exp %378 : vector<1x128xf32>
    %cst_83 = arith.constant 1.000000e+00 : f32
    %380 = vector.broadcast %cst_83 : f32 to vector<1x128xf32>
    %381 = arith.addf %380, %379 : vector<1x128xf32>
    %382 = arith.divf %380, %381 : vector<1x128xf32>
    %383 = math.tanh %377 : vector<1x128xf32>
    %384 = vector.extract_strided_slice %382 {offsets = [0, 0], sizes = [1, 32], strides = [1, 1]} : vector<1x128xf32> to vector<1x32xf32>
    %385 = vector.extract_strided_slice %382 {offsets = [0, 32], sizes = [1, 32], strides = [1, 1]} : vector<1x128xf32> to vector<1x32xf32>
    %386 = vector.extract_strided_slice %383 {offsets = [0, 64], sizes = [1, 32], strides = [1, 1]} : vector<1x128xf32> to vector<1x32xf32>
    %387 = vector.extract_strided_slice %382 {offsets = [0, 96], sizes = [1, 32], strides = [1, 1]} : vector<1x128xf32> to vector<1x32xf32>
    %388 = arith.mulf %385, %314 : vector<1x32xf32>
    %389 = arith.mulf %384, %386 : vector<1x32xf32>
    %390 = arith.addf %388, %389 : vector<1x32xf32>
    %391 = math.tanh %390 : vector<1x32xf32>
    %392 = arith.mulf %387, %391 : vector<1x32xf32>
    %393 = tpu.concatenate %392, %34, %334 in 1 : vector<1x32xf32>, vector<1x16xf32>, vector<1x32xf32> -> vector<1x80xf32>
    %cst_84 = arith.constant dense<0.000000e+00> : vector<1x128xf32>
    %394 = tpu.matmul %393, %17, %cst_84 {dimension_numbers = #tpu.dot_dimension_numbers<[1], [0], [0], [1], [0, 0, 1, 1], [], []>} : vector<1x80xf32>, vector<80x128xf32>, vector<1x128xf32> -> vector<1x128xf32>
    %395 = arith.addf %394, %21 : vector<1x128xf32>
    %396 = arith.negf %395 : vector<1x128xf32>
    %397 = math.exp %396 : vector<1x128xf32>
    %cst_85 = arith.constant 1.000000e+00 : f32
    %398 = vector.broadcast %cst_85 : f32 to vector<1x128xf32>
    %399 = arith.addf %398, %397 : vector<1x128xf32>
    %400 = arith.divf %398, %399 : vector<1x128xf32>
    %401 = math.tanh %395 : vector<1x128xf32>
    %402 = vector.extract_strided_slice %400 {offsets = [0, 0], sizes = [1, 32], strides = [1, 1]} : vector<1x128xf32> to vector<1x32xf32>
    %403 = vector.extract_strided_slice %400 {offsets = [0, 32], sizes = [1, 32], strides = [1, 1]} : vector<1x128xf32> to vector<1x32xf32>
    %404 = vector.extract_strided_slice %401 {offsets = [0, 64], sizes = [1, 32], strides = [1, 1]} : vector<1x128xf32> to vector<1x32xf32>
    %405 = vector.extract_strided_slice %400 {offsets = [0, 96], sizes = [1, 32], strides = [1, 1]} : vector<1x128xf32> to vector<1x32xf32>
    %406 = arith.mulf %403, %332 : vector<1x32xf32>
    %407 = arith.mulf %402, %404 : vector<1x32xf32>
    %408 = arith.addf %406, %407 : vector<1x32xf32>
    %409 = math.tanh %408 : vector<1x32xf32>
    %410 = arith.mulf %405, %409 : vector<1x32xf32>
    %411 = vector.extract_strided_slice %373 {offsets = [1, 0], sizes = [1, 48], strides = [1, 1]} : vector<2x48xf32> to vector<1x48xf32>
    %412 = tpu.concatenate %411, %392 in 1 : vector<1x48xf32>, vector<1x32xf32> -> vector<1x80xf32>
    %cst_86 = arith.constant dense<0.000000e+00> : vector<1x128xf32>
    %413 = tpu.matmul %412, %15, %cst_86 {dimension_numbers = #tpu.dot_dimension_numbers<[1], [0], [0], [1], [0, 0, 1, 1], [], []>} : vector<1x80xf32>, vector<80x128xf32>, vector<1x128xf32> -> vector<1x128xf32>
    %414 = arith.addf %413, %19 : vector<1x128xf32>
    %415 = arith.negf %414 : vector<1x128xf32>
    %416 = math.exp %415 : vector<1x128xf32>
    %cst_87 = arith.constant 1.000000e+00 : f32
    %417 = vector.broadcast %cst_87 : f32 to vector<1x128xf32>
    %418 = arith.addf %417, %416 : vector<1x128xf32>
    %419 = arith.divf %417, %418 : vector<1x128xf32>
    %420 = math.tanh %414 : vector<1x128xf32>
    %421 = vector.extract_strided_slice %419 {offsets = [0, 0], sizes = [1, 32], strides = [1, 1]} : vector<1x128xf32> to vector<1x32xf32>
    %422 = vector.extract_strided_slice %419 {offsets = [0, 32], sizes = [1, 32], strides = [1, 1]} : vector<1x128xf32> to vector<1x32xf32>
    %423 = vector.extract_strided_slice %420 {offsets = [0, 64], sizes = [1, 32], strides = [1, 1]} : vector<1x128xf32> to vector<1x32xf32>
    %424 = vector.extract_strided_slice %419 {offsets = [0, 96], sizes = [1, 32], strides = [1, 1]} : vector<1x128xf32> to vector<1x32xf32>
    %425 = arith.mulf %422, %390 : vector<1x32xf32>
    %426 = arith.mulf %421, %423 : vector<1x32xf32>
    %427 = arith.addf %425, %426 : vector<1x32xf32>
    %428 = math.tanh %427 : vector<1x32xf32>
    %429 = arith.mulf %424, %428 : vector<1x32xf32>
    %430 = tpu.concatenate %429, %34, %410 in 1 : vector<1x32xf32>, vector<1x16xf32>, vector<1x32xf32> -> vector<1x80xf32>
    %cst_88 = arith.constant dense<0.000000e+00> : vector<1x128xf32>
    %431 = tpu.matmul %430, %17, %cst_88 {dimension_numbers = #tpu.dot_dimension_numbers<[1], [0], [0], [1], [0, 0, 1, 1], [], []>} : vector<1x80xf32>, vector<80x128xf32>, vector<1x128xf32> -> vector<1x128xf32>
    %432 = arith.addf %431, %21 : vector<1x128xf32>
    %433 = arith.negf %432 : vector<1x128xf32>
    %434 = math.exp %433 : vector<1x128xf32>
    %cst_89 = arith.constant 1.000000e+00 : f32
    %435 = vector.broadcast %cst_89 : f32 to vector<1x128xf32>
    %436 = arith.addf %435, %434 : vector<1x128xf32>
    %437 = arith.divf %435, %436 : vector<1x128xf32>
    %438 = math.tanh %432 : vector<1x128xf32>
    %439 = vector.extract_strided_slice %437 {offsets = [0, 0], sizes = [1, 32], strides = [1, 1]} : vector<1x128xf32> to vector<1x32xf32>
    %440 = vector.extract_strided_slice %437 {offsets = [0, 32], sizes = [1, 32], strides = [1, 1]} : vector<1x128xf32> to vector<1x32xf32>
    %441 = vector.extract_strided_slice %438 {offsets = [0, 64], sizes = [1, 32], strides = [1, 1]} : vector<1x128xf32> to vector<1x32xf32>
    %442 = vector.extract_strided_slice %437 {offsets = [0, 96], sizes = [1, 32], strides = [1, 1]} : vector<1x128xf32> to vector<1x32xf32>
    %443 = arith.mulf %440, %408 : vector<1x32xf32>
    %444 = arith.mulf %439, %441 : vector<1x32xf32>
    %445 = arith.addf %443, %444 : vector<1x32xf32>
    %446 = math.tanh %445 : vector<1x32xf32>
    %447 = arith.mulf %442, %446 : vector<1x32xf32>
    %448 = tpu.concatenate %410, %447 in 0 : vector<1x32xf32>, vector<1x32xf32> -> vector<2x32xf32>
    %cst_90 = arith.constant dense<0.000000e+00> : vector<2x32xf32>
    %449 = tpu.matmul %448, %10, %cst_90 {dimension_numbers = #tpu.dot_dimension_numbers<[1], [0], [0], [1], [0, 0, 1, 1], [], []>} : vector<2x32xf32>, vector<32x32xf32>, vector<2x32xf32> -> vector<2x32xf32>
    %450 = vector.broadcast %11 : vector<1x32xf32> to vector<2x32xf32>
    %451 = arith.addf %449, %450 : vector<2x32xf32>
    %cst_91 = arith.constant 0.000000e+00 : f32
    %452 = vector.broadcast %cst_91 : f32 to vector<2x32xf32>
    %453 = arith.maximumf %451, %452 : vector<2x32xf32>
    %454 = vector.shape_cast %453 : vector<2x32xf32> to vector<2x1x32xf32>
    %455 = vector.broadcast %454 : vector<2x1x32xf32> to vector<2x8x32xf32>
    %456 = arith.mulf %455, %9 : vector<2x8x32xf32>
    %cst_92 = arith.constant dense<0.000000e+00> : vector<2x8xf32>
    %457 = vector.multi_reduction <add>, %456, %cst_92 [2] : vector<2x8x32xf32> to vector<2x8xf32>
    %cst_93 = arith.constant dense<0xFF800000> : vector<2xf32>
    %458 = vector.multi_reduction <maximumf>, %457, %cst_93 [1] : vector<2x8xf32> to vector<2xf32>
    %459 = vector.shape_cast %458 : vector<2xf32> to vector<2x1xf32>
    %460 = vector.broadcast %459 : vector<2x1xf32> to vector<2x8xf32>
    %461 = arith.subf %457, %460 : vector<2x8xf32>
    %462 = math.exp %461 : vector<2x8xf32>
    %cst_94 = arith.constant dense<0.000000e+00> : vector<2xf32>
    %463 = vector.multi_reduction <add>, %462, %cst_94 [1] : vector<2x8xf32> to vector<2xf32>
    %464 = vector.shape_cast %463 : vector<2xf32> to vector<2x1xf32>
    %465 = tpu.reciprocal %464 {approx = true} : vector<2x1xf32> -> vector<2x1xf32>
    %466 = vector.broadcast %465 : vector<2x1xf32> to vector<2x8xf32>
    %467 = arith.mulf %462, %466 : vector<2x8xf32>
    %468 = vector.shape_cast %467 : vector<2x8xf32> to vector<2x8x1xf32>
    %469 = vector.broadcast %468 : vector<2x8x1xf32> to vector<2x8x32xf32>
    %470 = arith.mulf %0, %469 : vector<2x8x32xf32>
    %cst_95 = arith.constant dense<0.000000e+00> : vector<2x32xf32>
    %471 = vector.multi_reduction <add>, %470, %cst_95 [1] : vector<2x8x32xf32> to vector<2x32xf32>
    %472 = tpu.concatenate %448, %471 in 1 : vector<2x32xf32>, vector<2x32xf32> -> vector<2x64xf32>
    %cst_96 = arith.constant dense<0.000000e+00> : vector<2x16xf32>
    %473 = tpu.matmul %472, %12, %cst_96 {dimension_numbers = #tpu.dot_dimension_numbers<[1], [0], [0], [1], [0, 0, 1, 1], [], []>} : vector<2x64xf32>, vector<64x16xf32>, vector<2x16xf32> -> vector<2x16xf32>
    %474 = vector.broadcast %13 : vector<1x16xf32> to vector<2x16xf32>
    %475 = arith.addf %473, %474 : vector<2x16xf32>
    %cst_97 = arith.constant dense<0xFF800000> : vector<2xf32>
    %476 = vector.multi_reduction <maximumf>, %475, %cst_97 [1] : vector<2x16xf32> to vector<2xf32>
    %477 = vector.shape_cast %476 : vector<2xf32> to vector<2x1xf32>
    %478 = vector.broadcast %477 : vector<2x1xf32> to vector<2x16xf32>
    %479 = arith.subf %475, %478 : vector<2x16xf32>
    %480 = math.exp %479 : vector<2x16xf32>
    %cst_98 = arith.constant dense<0.000000e+00> : vector<2xf32>
    %481 = vector.multi_reduction <add>, %480, %cst_98 [1] : vector<2x16xf32> to vector<2xf32>
    %482 = vector.shape_cast %481 : vector<2xf32> to vector<2x1xf32>
    %483 = math.log %482 : vector<2x1xf32>
    %484 = vector.broadcast %483 : vector<2x1xf32> to vector<2x16xf32>
    %485 = arith.subf %479, %484 : vector<2x16xf32>
    %486 = tpu.concatenate %485, %471 in 1 : vector<2x16xf32>, vector<2x32xf32> -> vector<2x48xf32>
    %487 = vector.extract_strided_slice %486 {offsets = [0, 0], sizes = [1, 48], strides = [1, 1]} : vector<2x48xf32> to vector<1x48xf32>
    %488 = tpu.concatenate %487, %429 in 1 : vector<1x48xf32>, vector<1x32xf32> -> vector<1x80xf32>
    %cst_99 = arith.constant dense<0.000000e+00> : vector<1x128xf32>
    %489 = tpu.matmul %488, %15, %cst_99 {dimension_numbers = #tpu.dot_dimension_numbers<[1], [0], [0], [1], [0, 0, 1, 1], [], []>} : vector<1x80xf32>, vector<80x128xf32>, vector<1x128xf32> -> vector<1x128xf32>
    %490 = arith.addf %489, %19 : vector<1x128xf32>
    %491 = arith.negf %490 : vector<1x128xf32>
    %492 = math.exp %491 : vector<1x128xf32>
    %cst_100 = arith.constant 1.000000e+00 : f32
    %493 = vector.broadcast %cst_100 : f32 to vector<1x128xf32>
    %494 = arith.addf %493, %492 : vector<1x128xf32>
    %495 = arith.divf %493, %494 : vector<1x128xf32>
    %496 = math.tanh %490 : vector<1x128xf32>
    %497 = vector.extract_strided_slice %495 {offsets = [0, 0], sizes = [1, 32], strides = [1, 1]} : vector<1x128xf32> to vector<1x32xf32>
    %498 = vector.extract_strided_slice %495 {offsets = [0, 32], sizes = [1, 32], strides = [1, 1]} : vector<1x128xf32> to vector<1x32xf32>
    %499 = vector.extract_strided_slice %496 {offsets = [0, 64], sizes = [1, 32], strides = [1, 1]} : vector<1x128xf32> to vector<1x32xf32>
    %500 = vector.extract_strided_slice %495 {offsets = [0, 96], sizes = [1, 32], strides = [1, 1]} : vector<1x128xf32> to vector<1x32xf32>
    %501 = arith.mulf %498, %427 : vector<1x32xf32>
    %502 = arith.mulf %497, %499 : vector<1x32xf32>
    %503 = arith.addf %501, %502 : vector<1x32xf32>
    %504 = math.tanh %503 : vector<1x32xf32>
    %505 = arith.mulf %500, %504 : vector<1x32xf32>
    %506 = tpu.concatenate %505, %34, %447 in 1 : vector<1x32xf32>, vector<1x16xf32>, vector<1x32xf32> -> vector<1x80xf32>
    %cst_101 = arith.constant dense<0.000000e+00> : vector<1x128xf32>
    %507 = tpu.matmul %506, %17, %cst_101 {dimension_numbers = #tpu.dot_dimension_numbers<[1], [0], [0], [1], [0, 0, 1, 1], [], []>} : vector<1x80xf32>, vector<80x128xf32>, vector<1x128xf32> -> vector<1x128xf32>
    %508 = arith.addf %507, %21 : vector<1x128xf32>
    %509 = arith.negf %508 : vector<1x128xf32>
    %510 = math.exp %509 : vector<1x128xf32>
    %cst_102 = arith.constant 1.000000e+00 : f32
    %511 = vector.broadcast %cst_102 : f32 to vector<1x128xf32>
    %512 = arith.addf %511, %510 : vector<1x128xf32>
    %513 = arith.divf %511, %512 : vector<1x128xf32>
    %514 = math.tanh %508 : vector<1x128xf32>
    %515 = vector.extract_strided_slice %513 {offsets = [0, 0], sizes = [1, 32], strides = [1, 1]} : vector<1x128xf32> to vector<1x32xf32>
    %516 = vector.extract_strided_slice %513 {offsets = [0, 32], sizes = [1, 32], strides = [1, 1]} : vector<1x128xf32> to vector<1x32xf32>
    %517 = vector.extract_strided_slice %514 {offsets = [0, 64], sizes = [1, 32], strides = [1, 1]} : vector<1x128xf32> to vector<1x32xf32>
    %518 = vector.extract_strided_slice %513 {offsets = [0, 96], sizes = [1, 32], strides = [1, 1]} : vector<1x128xf32> to vector<1x32xf32>
    %519 = arith.mulf %516, %445 : vector<1x32xf32>
    %520 = arith.mulf %515, %517 : vector<1x32xf32>
    %521 = arith.addf %519, %520 : vector<1x32xf32>
    %522 = math.tanh %521 : vector<1x32xf32>
    %523 = arith.mulf %518, %522 : vector<1x32xf32>
    %524 = vector.extract_strided_slice %486 {offsets = [1, 0], sizes = [1, 48], strides = [1, 1]} : vector<2x48xf32> to vector<1x48xf32>
    %525 = tpu.concatenate %524, %505 in 1 : vector<1x48xf32>, vector<1x32xf32> -> vector<1x80xf32>
    %cst_103 = arith.constant dense<0.000000e+00> : vector<1x128xf32>
    %526 = tpu.matmul %525, %15, %cst_103 {dimension_numbers = #tpu.dot_dimension_numbers<[1], [0], [0], [1], [0, 0, 1, 1], [], []>} : vector<1x80xf32>, vector<80x128xf32>, vector<1x128xf32> -> vector<1x128xf32>
    %527 = arith.addf %526, %19 : vector<1x128xf32>
    %528 = arith.negf %527 : vector<1x128xf32>
    %529 = math.exp %528 : vector<1x128xf32>
    %cst_104 = arith.constant 1.000000e+00 : f32
    %530 = vector.broadcast %cst_104 : f32 to vector<1x128xf32>
    %531 = arith.addf %530, %529 : vector<1x128xf32>
    %532 = arith.divf %530, %531 : vector<1x128xf32>
    %533 = math.tanh %527 : vector<1x128xf32>
    %534 = vector.extract_strided_slice %532 {offsets = [0, 0], sizes = [1, 32], strides = [1, 1]} : vector<1x128xf32> to vector<1x32xf32>
    %535 = vector.extract_strided_slice %532 {offsets = [0, 32], sizes = [1, 32], strides = [1, 1]} : vector<1x128xf32> to vector<1x32xf32>
    %536 = vector.extract_strided_slice %533 {offsets = [0, 64], sizes = [1, 32], strides = [1, 1]} : vector<1x128xf32> to vector<1x32xf32>
    %537 = vector.extract_strided_slice %532 {offsets = [0, 96], sizes = [1, 32], strides = [1, 1]} : vector<1x128xf32> to vector<1x32xf32>
    %538 = arith.mulf %535, %503 : vector<1x32xf32>
    %539 = arith.mulf %534, %536 : vector<1x32xf32>
    %540 = arith.addf %538, %539 : vector<1x32xf32>
    %541 = math.tanh %540 : vector<1x32xf32>
    %542 = arith.mulf %537, %541 : vector<1x32xf32>
    %543 = tpu.concatenate %542, %34, %523 in 1 : vector<1x32xf32>, vector<1x16xf32>, vector<1x32xf32> -> vector<1x80xf32>
    %cst_105 = arith.constant dense<0.000000e+00> : vector<1x128xf32>
    %544 = tpu.matmul %543, %17, %cst_105 {dimension_numbers = #tpu.dot_dimension_numbers<[1], [0], [0], [1], [0, 0, 1, 1], [], []>} : vector<1x80xf32>, vector<80x128xf32>, vector<1x128xf32> -> vector<1x128xf32>
    %545 = arith.addf %544, %21 : vector<1x128xf32>
    %546 = arith.negf %545 : vector<1x128xf32>
    %547 = math.exp %546 : vector<1x128xf32>
    %cst_106 = arith.constant 1.000000e+00 : f32
    %548 = vector.broadcast %cst_106 : f32 to vector<1x128xf32>
    %549 = arith.addf %548, %547 : vector<1x128xf32>
    %550 = arith.divf %548, %549 : vector<1x128xf32>
    %551 = math.tanh %545 : vector<1x128xf32>
    %552 = vector.extract_strided_slice %550 {offsets = [0, 0], sizes = [1, 32], strides = [1, 1]} : vector<1x128xf32> to vector<1x32xf32>
    %553 = vector.extract_strided_slice %550 {offsets = [0, 32], sizes = [1, 32], strides = [1, 1]} : vector<1x128xf32> to vector<1x32xf32>
    %554 = vector.extract_strided_slice %551 {offsets = [0, 64], sizes = [1, 32], strides = [1, 1]} : vector<1x128xf32> to vector<1x32xf32>
    %555 = vector.extract_strided_slice %550 {offsets = [0, 96], sizes = [1, 32], strides = [1, 1]} : vector<1x128xf32> to vector<1x32xf32>
    %556 = arith.mulf %553, %521 : vector<1x32xf32>
    %557 = arith.mulf %552, %554 : vector<1x32xf32>
    %558 = arith.addf %556, %557 : vector<1x32xf32>
    %559 = math.tanh %558 : vector<1x32xf32>
    %560 = arith.mulf %555, %559 : vector<1x32xf32>
    %561 = tpu.concatenate %523, %560 in 0 : vector<1x32xf32>, vector<1x32xf32> -> vector<2x32xf32>
    %cst_107 = arith.constant dense<0.000000e+00> : vector<2x32xf32>
    %562 = tpu.matmul %561, %10, %cst_107 {dimension_numbers = #tpu.dot_dimension_numbers<[1], [0], [0], [1], [0, 0, 1, 1], [], []>} : vector<2x32xf32>, vector<32x32xf32>, vector<2x32xf32> -> vector<2x32xf32>
    %563 = vector.broadcast %11 : vector<1x32xf32> to vector<2x32xf32>
    %564 = arith.addf %562, %563 : vector<2x32xf32>
    %cst_108 = arith.constant 0.000000e+00 : f32
    %565 = vector.broadcast %cst_108 : f32 to vector<2x32xf32>
    %566 = arith.maximumf %564, %565 : vector<2x32xf32>
    %567 = vector.shape_cast %566 : vector<2x32xf32> to vector<2x1x32xf32>
    %568 = vector.broadcast %567 : vector<2x1x32xf32> to vector<2x8x32xf32>
    %569 = arith.mulf %568, %9 : vector<2x8x32xf32>
    %cst_109 = arith.constant dense<0.000000e+00> : vector<2x8xf32>
    %570 = vector.multi_reduction <add>, %569, %cst_109 [2] : vector<2x8x32xf32> to vector<2x8xf32>
    %cst_110 = arith.constant dense<0xFF800000> : vector<2xf32>
    %571 = vector.multi_reduction <maximumf>, %570, %cst_110 [1] : vector<2x8xf32> to vector<2xf32>
    %572 = vector.shape_cast %571 : vector<2xf32> to vector<2x1xf32>
    %573 = vector.broadcast %572 : vector<2x1xf32> to vector<2x8xf32>
    %574 = arith.subf %570, %573 : vector<2x8xf32>
    %575 = math.exp %574 : vector<2x8xf32>
    %cst_111 = arith.constant dense<0.000000e+00> : vector<2xf32>
    %576 = vector.multi_reduction <add>, %575, %cst_111 [1] : vector<2x8xf32> to vector<2xf32>
    %577 = vector.shape_cast %576 : vector<2xf32> to vector<2x1xf32>
    %578 = tpu.reciprocal %577 {approx = true} : vector<2x1xf32> -> vector<2x1xf32>
    %579 = vector.broadcast %578 : vector<2x1xf32> to vector<2x8xf32>
    %580 = arith.mulf %575, %579 : vector<2x8xf32>
    %581 = vector.shape_cast %580 : vector<2x8xf32> to vector<2x8x1xf32>
    %582 = vector.broadcast %581 : vector<2x8x1xf32> to vector<2x8x32xf32>
    %583 = arith.mulf %0, %582 : vector<2x8x32xf32>
    %cst_112 = arith.constant dense<0.000000e+00> : vector<2x32xf32>
    %584 = vector.multi_reduction <add>, %583, %cst_112 [1] : vector<2x8x32xf32> to vector<2x32xf32>
    %585 = tpu.concatenate %561, %584 in 1 : vector<2x32xf32>, vector<2x32xf32> -> vector<2x64xf32>
    %cst_113 = arith.constant dense<0.000000e+00> : vector<2x16xf32>
    %586 = tpu.matmul %585, %12, %cst_113 {dimension_numbers = #tpu.dot_dimension_numbers<[1], [0], [0], [1], [0, 0, 1, 1], [], []>} : vector<2x64xf32>, vector<64x16xf32>, vector<2x16xf32> -> vector<2x16xf32>
    %587 = vector.broadcast %13 : vector<1x16xf32> to vector<2x16xf32>
    %588 = arith.addf %586, %587 : vector<2x16xf32>
    %cst_114 = arith.constant dense<0xFF800000> : vector<2xf32>
    %589 = vector.multi_reduction <maximumf>, %588, %cst_114 [1] : vector<2x16xf32> to vector<2xf32>
    %590 = vector.shape_cast %589 : vector<2xf32> to vector<2x1xf32>
    %591 = vector.broadcast %590 : vector<2x1xf32> to vector<2x16xf32>
    %592 = arith.subf %588, %591 : vector<2x16xf32>
    %593 = math.exp %592 : vector<2x16xf32>
    %cst_115 = arith.constant dense<0.000000e+00> : vector<2xf32>
    %594 = vector.multi_reduction <add>, %593, %cst_115 [1] : vector<2x16xf32> to vector<2xf32>
    %595 = vector.shape_cast %594 : vector<2xf32> to vector<2x1xf32>
    %596 = math.log %595 : vector<2x1xf32>
    %597 = vector.broadcast %596 : vector<2x1xf32> to vector<2x16xf32>
    %598 = arith.subf %592, %597 : vector<2x16xf32>
    %599 = tpu.concatenate %598, %584 in 1 : vector<2x16xf32>, vector<2x32xf32> -> vector<2x48xf32>
    %600 = vector.extract_strided_slice %599 {offsets = [0, 0], sizes = [1, 48], strides = [1, 1]} : vector<2x48xf32> to vector<1x48xf32>
    %601 = tpu.concatenate %600, %542 in 1 : vector<1x48xf32>, vector<1x32xf32> -> vector<1x80xf32>
    %cst_116 = arith.constant dense<0.000000e+00> : vector<1x128xf32>
    %602 = tpu.matmul %601, %15, %cst_116 {dimension_numbers = #tpu.dot_dimension_numbers<[1], [0], [0], [1], [0, 0, 1, 1], [], []>} : vector<1x80xf32>, vector<80x128xf32>, vector<1x128xf32> -> vector<1x128xf32>
    %603 = arith.addf %602, %19 : vector<1x128xf32>
    %604 = arith.negf %603 : vector<1x128xf32>
    %605 = math.exp %604 : vector<1x128xf32>
    %cst_117 = arith.constant 1.000000e+00 : f32
    %606 = vector.broadcast %cst_117 : f32 to vector<1x128xf32>
    %607 = arith.addf %606, %605 : vector<1x128xf32>
    %608 = arith.divf %606, %607 : vector<1x128xf32>
    %609 = math.tanh %603 : vector<1x128xf32>
    %610 = vector.extract_strided_slice %608 {offsets = [0, 0], sizes = [1, 32], strides = [1, 1]} : vector<1x128xf32> to vector<1x32xf32>
    %611 = vector.extract_strided_slice %608 {offsets = [0, 32], sizes = [1, 32], strides = [1, 1]} : vector<1x128xf32> to vector<1x32xf32>
    %612 = vector.extract_strided_slice %609 {offsets = [0, 64], sizes = [1, 32], strides = [1, 1]} : vector<1x128xf32> to vector<1x32xf32>
    %613 = vector.extract_strided_slice %608 {offsets = [0, 96], sizes = [1, 32], strides = [1, 1]} : vector<1x128xf32> to vector<1x32xf32>
    %614 = arith.mulf %611, %540 : vector<1x32xf32>
    %615 = arith.mulf %610, %612 : vector<1x32xf32>
    %616 = arith.addf %614, %615 : vector<1x32xf32>
    %617 = math.tanh %616 : vector<1x32xf32>
    %618 = arith.mulf %613, %617 : vector<1x32xf32>
    %619 = tpu.concatenate %618, %34, %560 in 1 : vector<1x32xf32>, vector<1x16xf32>, vector<1x32xf32> -> vector<1x80xf32>
    %cst_118 = arith.constant dense<0.000000e+00> : vector<1x128xf32>
    %620 = tpu.matmul %619, %17, %cst_118 {dimension_numbers = #tpu.dot_dimension_numbers<[1], [0], [0], [1], [0, 0, 1, 1], [], []>} : vector<1x80xf32>, vector<80x128xf32>, vector<1x128xf32> -> vector<1x128xf32>
    %621 = arith.addf %620, %21 : vector<1x128xf32>
    %622 = arith.negf %621 : vector<1x128xf32>
    %623 = math.exp %622 : vector<1x128xf32>
    %cst_119 = arith.constant 1.000000e+00 : f32
    %624 = vector.broadcast %cst_119 : f32 to vector<1x128xf32>
    %625 = arith.addf %624, %623 : vector<1x128xf32>
    %626 = arith.divf %624, %625 : vector<1x128xf32>
    %627 = math.tanh %621 : vector<1x128xf32>
    %628 = vector.extract_strided_slice %626 {offsets = [0, 0], sizes = [1, 32], strides = [1, 1]} : vector<1x128xf32> to vector<1x32xf32>
    %629 = vector.extract_strided_slice %626 {offsets = [0, 32], sizes = [1, 32], strides = [1, 1]} : vector<1x128xf32> to vector<1x32xf32>
    %630 = vector.extract_strided_slice %627 {offsets = [0, 64], sizes = [1, 32], strides = [1, 1]} : vector<1x128xf32> to vector<1x32xf32>
    %631 = vector.extract_strided_slice %626 {offsets = [0, 96], sizes = [1, 32], strides = [1, 1]} : vector<1x128xf32> to vector<1x32xf32>
    %632 = arith.mulf %629, %558 : vector<1x32xf32>
    %633 = arith.mulf %628, %630 : vector<1x32xf32>
    %634 = arith.addf %632, %633 : vector<1x32xf32>
    %635 = math.tanh %634 : vector<1x32xf32>
    %636 = arith.mulf %631, %635 : vector<1x32xf32>
    %637 = vector.extract_strided_slice %599 {offsets = [1, 0], sizes = [1, 48], strides = [1, 1]} : vector<2x48xf32> to vector<1x48xf32>
    %638 = tpu.concatenate %637, %618 in 1 : vector<1x48xf32>, vector<1x32xf32> -> vector<1x80xf32>
    %cst_120 = arith.constant dense<0.000000e+00> : vector<1x128xf32>
    %639 = tpu.matmul %638, %15, %cst_120 {dimension_numbers = #tpu.dot_dimension_numbers<[1], [0], [0], [1], [0, 0, 1, 1], [], []>} : vector<1x80xf32>, vector<80x128xf32>, vector<1x128xf32> -> vector<1x128xf32>
    %640 = arith.addf %639, %19 : vector<1x128xf32>
    %641 = arith.negf %640 : vector<1x128xf32>
    %642 = math.exp %641 : vector<1x128xf32>
    %cst_121 = arith.constant 1.000000e+00 : f32
    %643 = vector.broadcast %cst_121 : f32 to vector<1x128xf32>
    %644 = arith.addf %643, %642 : vector<1x128xf32>
    %645 = arith.divf %643, %644 : vector<1x128xf32>
    %646 = math.tanh %640 : vector<1x128xf32>
    %647 = vector.extract_strided_slice %645 {offsets = [0, 0], sizes = [1, 32], strides = [1, 1]} : vector<1x128xf32> to vector<1x32xf32>
    %648 = vector.extract_strided_slice %645 {offsets = [0, 32], sizes = [1, 32], strides = [1, 1]} : vector<1x128xf32> to vector<1x32xf32>
    %649 = vector.extract_strided_slice %646 {offsets = [0, 64], sizes = [1, 32], strides = [1, 1]} : vector<1x128xf32> to vector<1x32xf32>
    %650 = vector.extract_strided_slice %645 {offsets = [0, 96], sizes = [1, 32], strides = [1, 1]} : vector<1x128xf32> to vector<1x32xf32>
    %651 = arith.mulf %648, %616 : vector<1x32xf32>
    %652 = arith.mulf %647, %649 : vector<1x32xf32>
    %653 = arith.addf %651, %652 : vector<1x32xf32>
    %654 = math.tanh %653 : vector<1x32xf32>
    %655 = arith.mulf %650, %654 : vector<1x32xf32>
    %656 = tpu.concatenate %655, %34, %636 in 1 : vector<1x32xf32>, vector<1x16xf32>, vector<1x32xf32> -> vector<1x80xf32>
    %cst_122 = arith.constant dense<0.000000e+00> : vector<1x128xf32>
    %657 = tpu.matmul %656, %17, %cst_122 {dimension_numbers = #tpu.dot_dimension_numbers<[1], [0], [0], [1], [0, 0, 1, 1], [], []>} : vector<1x80xf32>, vector<80x128xf32>, vector<1x128xf32> -> vector<1x128xf32>
    %658 = arith.addf %657, %21 : vector<1x128xf32>
    %659 = arith.negf %658 : vector<1x128xf32>
    %660 = math.exp %659 : vector<1x128xf32>
    %cst_123 = arith.constant 1.000000e+00 : f32
    %661 = vector.broadcast %cst_123 : f32 to vector<1x128xf32>
    %662 = arith.addf %661, %660 : vector<1x128xf32>
    %663 = arith.divf %661, %662 : vector<1x128xf32>
    %664 = math.tanh %658 : vector<1x128xf32>
    %665 = vector.extract_strided_slice %663 {offsets = [0, 0], sizes = [1, 32], strides = [1, 1]} : vector<1x128xf32> to vector<1x32xf32>
    %666 = vector.extract_strided_slice %663 {offsets = [0, 32], sizes = [1, 32], strides = [1, 1]} : vector<1x128xf32> to vector<1x32xf32>
    %667 = vector.extract_strided_slice %664 {offsets = [0, 64], sizes = [1, 32], strides = [1, 1]} : vector<1x128xf32> to vector<1x32xf32>
    %668 = vector.extract_strided_slice %663 {offsets = [0, 96], sizes = [1, 32], strides = [1, 1]} : vector<1x128xf32> to vector<1x32xf32>
    %669 = arith.mulf %666, %634 : vector<1x32xf32>
    %670 = arith.mulf %665, %667 : vector<1x32xf32>
    %671 = arith.addf %669, %670 : vector<1x32xf32>
    %672 = math.tanh %671 : vector<1x32xf32>
    %673 = arith.mulf %668, %672 : vector<1x32xf32>
    %674 = tpu.concatenate %636, %673 in 0 : vector<1x32xf32>, vector<1x32xf32> -> vector<2x32xf32>
    %cst_124 = arith.constant dense<0.000000e+00> : vector<2x32xf32>
    %675 = tpu.matmul %674, %10, %cst_124 {dimension_numbers = #tpu.dot_dimension_numbers<[1], [0], [0], [1], [0, 0, 1, 1], [], []>} : vector<2x32xf32>, vector<32x32xf32>, vector<2x32xf32> -> vector<2x32xf32>
    %676 = vector.broadcast %11 : vector<1x32xf32> to vector<2x32xf32>
    %677 = arith.addf %675, %676 : vector<2x32xf32>
    %cst_125 = arith.constant 0.000000e+00 : f32
    %678 = vector.broadcast %cst_125 : f32 to vector<2x32xf32>
    %679 = arith.maximumf %677, %678 : vector<2x32xf32>
    %680 = vector.shape_cast %679 : vector<2x32xf32> to vector<2x1x32xf32>
    %681 = vector.broadcast %680 : vector<2x1x32xf32> to vector<2x8x32xf32>
    %682 = arith.mulf %681, %9 : vector<2x8x32xf32>
    %cst_126 = arith.constant dense<0.000000e+00> : vector<2x8xf32>
    %683 = vector.multi_reduction <add>, %682, %cst_126 [2] : vector<2x8x32xf32> to vector<2x8xf32>
    %cst_127 = arith.constant dense<0xFF800000> : vector<2xf32>
    %684 = vector.multi_reduction <maximumf>, %683, %cst_127 [1] : vector<2x8xf32> to vector<2xf32>
    %685 = vector.shape_cast %684 : vector<2xf32> to vector<2x1xf32>
    %686 = vector.broadcast %685 : vector<2x1xf32> to vector<2x8xf32>
    %687 = arith.subf %683, %686 : vector<2x8xf32>
    %688 = math.exp %687 : vector<2x8xf32>
    %cst_128 = arith.constant dense<0.000000e+00> : vector<2xf32>
    %689 = vector.multi_reduction <add>, %688, %cst_128 [1] : vector<2x8xf32> to vector<2xf32>
    %690 = vector.shape_cast %689 : vector<2xf32> to vector<2x1xf32>
    %691 = tpu.reciprocal %690 {approx = true} : vector<2x1xf32> -> vector<2x1xf32>
    %692 = vector.broadcast %691 : vector<2x1xf32> to vector<2x8xf32>
    %693 = arith.mulf %688, %692 : vector<2x8xf32>
    %694 = vector.shape_cast %693 : vector<2x8xf32> to vector<2x8x1xf32>
    %695 = vector.broadcast %694 : vector<2x8x1xf32> to vector<2x8x32xf32>
    %696 = arith.mulf %0, %695 : vector<2x8x32xf32>
    %cst_129 = arith.constant dense<0.000000e+00> : vector<2x32xf32>
    %697 = vector.multi_reduction <add>, %696, %cst_129 [1] : vector<2x8x32xf32> to vector<2x32xf32>
    %698 = tpu.concatenate %674, %697 in 1 : vector<2x32xf32>, vector<2x32xf32> -> vector<2x64xf32>
    %cst_130 = arith.constant dense<0.000000e+00> : vector<2x16xf32>
    %699 = tpu.matmul %698, %12, %cst_130 {dimension_numbers = #tpu.dot_dimension_numbers<[1], [0], [0], [1], [0, 0, 1, 1], [], []>} : vector<2x64xf32>, vector<64x16xf32>, vector<2x16xf32> -> vector<2x16xf32>
    %700 = vector.broadcast %13 : vector<1x16xf32> to vector<2x16xf32>
    %701 = arith.addf %699, %700 : vector<2x16xf32>
    %cst_131 = arith.constant dense<0xFF800000> : vector<2xf32>
    %702 = vector.multi_reduction <maximumf>, %701, %cst_131 [1] : vector<2x16xf32> to vector<2xf32>
    %703 = vector.shape_cast %702 : vector<2xf32> to vector<2x1xf32>
    %704 = vector.broadcast %703 : vector<2x1xf32> to vector<2x16xf32>
    %705 = arith.subf %701, %704 : vector<2x16xf32>
    %706 = math.exp %705 : vector<2x16xf32>
    %cst_132 = arith.constant dense<0.000000e+00> : vector<2xf32>
    %707 = vector.multi_reduction <add>, %706, %cst_132 [1] : vector<2x16xf32> to vector<2xf32>
    %708 = vector.shape_cast %707 : vector<2xf32> to vector<2x1xf32>
    %709 = math.log %708 : vector<2x1xf32>
    %710 = vector.broadcast %709 : vector<2x1xf32> to vector<2x16xf32>
    %711 = arith.subf %705, %710 : vector<2x16xf32>
    %712 = vector.shape_cast %146 : vector<2x16xf32> to vector<1x2x16xf32>
    %713 = vector.shape_cast %259 : vector<2x16xf32> to vector<1x2x16xf32>
    %714 = vector.shape_cast %372 : vector<2x16xf32> to vector<1x2x16xf32>
    %715 = vector.shape_cast %485 : vector<2x16xf32> to vector<1x2x16xf32>
    %716 = vector.shape_cast %598 : vector<2x16xf32> to vector<1x2x16xf32>
    %717 = vector.shape_cast %711 : vector<2x16xf32> to vector<1x2x16xf32>
    %718 = tpu.concatenate %712, %713, %714, %715, %716, %717 in 0 : vector<1x2x16xf32>, vector<1x2x16xf32>, vector<1x2x16xf32>, vector<1x2x16xf32>, vector<1x2x16xf32>, vector<1x2x16xf32> -> vector<6x2x16xf32>
    %c0_133 = arith.constant 0 : index
    %c0_134 = arith.constant 0 : index
    %c0_135 = arith.constant 0 : index
    %719 = vector.load %arg9[%c0_133, %c0_134, %c0_135] : memref<6x2x16xf32, #tpu.memory_space<vmem>>, vector<6x2x16xf32>
    tpu.vector_store %arg9[%c0_133, %c0_134, %c0_135], %718 {strides = array<i32>} : memref<6x2x16xf32, #tpu.memory_space<vmem>>, vector<6x2x16xf32>,
    %720 = vector.shape_cast %128 : vector<2x8xf32> to vector<1x2x8xf32>
    %721 = vector.shape_cast %241 : vector<2x8xf32> to vector<1x2x8xf32>
    %722 = vector.shape_cast %354 : vector<2x8xf32> to vector<1x2x8xf32>
    %723 = vector.shape_cast %467 : vector<2x8xf32> to vector<1x2x8xf32>
    %724 = vector.shape_cast %580 : vector<2x8xf32> to vector<1x2x8xf32>
    %725 = vector.shape_cast %693 : vector<2x8xf32> to vector<1x2x8xf32>
    %726 = tpu.concatenate %720, %721, %722, %723, %724, %725 in 0 : vector<1x2x8xf32>, vector<1x2x8xf32>, vector<1x2x8xf32>, vector<1x2x8xf32>, vector<1x2x8xf32>, vector<1x2x8xf32> -> vector<6x2x8xf32>
    %c0_136 = arith.constant 0 : index
    %c0_137 = arith.constant 0 : index
    %c0_138 = arith.constant 0 : index
    %727 = vector.load %arg10[%c0_136, %c0_137, %c0_138] : memref<6x2x8xf32, #tpu.memory_space<vmem>>, vector<6x2x8xf32>
    tpu.vector_store %arg10[%c0_136, %c0_137, %c0_138], %726 {strides = array<i32>} : memref<6x2x8xf32, #tpu.memory_space<vmem>>, vector<6x2x8xf32>,
    return
  }
}

</mosaic_0001>

<bundles_post_ra>
// kernel: speller_forward.1
= control target key start
LH: loop header
LB: loop body
LE: loop exit
PB: predicated region body
PF: predicated region fallthrough
CT: control target
= control target key end

     0   :  { %16 = vsyncpa [#allocation3], 0  ;;  %s8070_s0 = inlined_call_operand.vmem [shape: f32[2,8,32], index: 0, kind: input, shape index: {}]   ;;  %s8071_s1 = inlined_call_operand.hbm [shape: f32[2,80,128], index: 1, kind: input, shape index: {}]   ;;  %s8072_s2 = inlined_call_operand.vmem [shape: f32[2,1,128], index: 2, kind: input, shape index: {}]   ;;  %s8073_s3 = inlined_call_operand.vmem [shape: f32[32,32], index: 3, kind: input, shape index: {}]   ;;  %s8074_s4 = inlined_call_operand.vmem [shape: f32[1,32], index: 4, kind: input, shape index: {}]   ;;  %s8075_s5 = inlined_call_operand.vmem [shape: f32[32,32], index: 5, kind: input, shape index: {}]   ;;  %s8076_s6 = inlined_call_operand.vmem [shape: f32[1,32], index: 6, kind: input, shape index: {}]   ;;  %s8077_s7 = inlined_call_operand.vmem [shape: f32[64,16], index: 7, kind: input, shape index: {}]   ;;  %s8078_s8 = inlined_call_operand.vmem [shape: f32[1,16], index: 8, kind: input, shape index: {}]   ;;  %s8079_s9 = inlined_call_operand.hbm [shape: f32[6,2,16], index: 9, kind: output, shape index: {0}]   ;;  %s8080_s10 = inlined_call_operand.hbm [shape: f32[6,2,8], index: 10, kind: output, shape index: {1}]  }
   0x1   :  { %17 = vsyncpa [#allocation4], 0 }
   0x2   :  { %18 = vsyncpa [#allocation7], 0  ;;  %s6265_s13 = smov [#allocation2]  }
   0x3   :  { %s26_s14 = sshll.u32 %s6265_s13, 4  ;;  %s27_s14 = int_to_ptr.vmem [resolvable:$true] %s26_s14 }
   0x4   :  { %s6207_s15 = scalar_lea.vmem %s27_s14, 2560  ;;  %p6212_p1 = scmp.lt.s32.totalorder %s27_s14, %s27_s14 }
   0x5   :  { %p6208_p0 = scmp.ne.s32.totalorder %s27_s14, %s6207_s15  ;;  %p6213_p2 = scmp.lt.s32.totalorder %s6207_s15, %s6207_s15 }
   0x7   :  { %p6214_p3 = por %p6213_p2, %p6212_p1 }
   0x9   :  { %p6215_p4 = pnand %p6214_p3, %p6208_p0 }
   0xb   :  { %6218 = shalt.err (!%p6215_p4)
}
   0xc   :  { %s6266_s16 = smov 128   ;;  %s6267_s17 = smov 8  }
   0xd   :  { %32 = dma.hbm_to_vmem [thread:$0]  %s8071_s1, 2560, %s27_s14, [#allocation3], %s6266_s16, %s6266_s16, %s6267_s17  }
   0xe   :  { %6259 = dma.done.wait [#allocation3], 2560  }
   0xf   :  { %6260 = vsyncadd [#allocation3], 4294964736  ;;  %v185_v0 = vlaneseq  ;;  %v6268_v1 = vmov 0.0   ;;  %vm6269_vm0 = vmmov 0   ;;  %v6348_v5 = vld [vmem:[%s8070_s0] sm:$0xff]  ;;  %v6353_v6 = vld [vmem:[%s8070_s0 + $0x8] sm:$0xff] }
  0x10   :  { %5111 = vmatprep.subr.mxu1 %v6268_v1  ;;  %5131 = vmatprep.mubr.msk.f32.mxu1 %vm6269_vm0, %v6268_v1  ;;  %vm191_vm1 = vcmask 1041409   ;;  %v6355_v7 = vld [vmem:[#allocation2 + $0x48] sm:$0xff]  ;;  %v190_v8 = vrot.slane %v6353_v6, 7  ;;  %v6359_v9 = vld [vmem:[#allocation2 + $0x40] sm:$0xff]  ;;  %v6362_v10 = vld [vmem:[#allocation2 + $0x38] sm:$0xff]  ;;  %s6270_s23 = smov 16  }
  0x11   :  { %v186_v2 = vand.u32 127, %v185_v0  ;;  %v6338_v3 = vshrl.u32 %v185_v0, 7  ;;  %5112 = vmatpush3.msra.mxu1 %v6355_v7  ;;  %v6369_v12 = vld [vmem:[#allocation2 + $0x30] sm:$0xff]  ;;  %v6373_v13 = vld [vmem:[#allocation2 + $0x28] sm:$0xff]  ;;  %v6377_v14 = vld [vmem:[#allocation2 + $0x20] sm:$0xff]  ;;  %vm196_vm3 = vcmask 130048  }
  0x12   :  { %5113 = vmatprep.subr.mxu1 %v6268_v1  ;;  %v192_v11 = vsel %vm191_vm1, %v190_v8, %v6348_v5  ;;  %v6381_v15 = vld [vmem:[#allocation2 + $0x18] sm:$0xff]  ;;  %v6385_v16 = vld [vmem:[#allocation2 + $0x10] sm:$0xff]  ;;  %v6389_v17 = vld [vmem:[#allocation2 + $0x8] sm:$0xff]  ;;  %vm198_vm4 = vcmask 392192   ;;  %vm200_vm5 = vcmask 654336   ;;  %s6271_s26 = smov 64  }
  0x13   :  { %v6343_v4 = vsub.s32 %v186_v2, %v6338_v3  ;;  %5114 = vmatpush3.msra.mxu1 %v6359_v9  ;;  %193 = vrot.lane.b32.xlu0 %v192_v11, %s6270_s23  ;;  %v6393_v18 = vld [vmem:[#allocation2] sm:$0xff]  ;;  %vm187_vm2 = vcmp.eq.s32.totalorder %v186_v2, 0  ;;  %s6272_s27 = smov 32   ;;  %v55_v37 = vld [vmem:[%s8075_s5 + $0x18] sm:$0xff]  ;;  %v54_v38 = vld [vmem:[%s8075_s5 + $0x10] sm:$0xff]  ;;  %vm63_vm6 = vcmask 261120  }
  0x14   :  { %5115 = vmatprep.subr.mxu1 %v6268_v1  ;;  %v4683_v19 = vsel %vm187_vm2, 1.0, %v6268_v1  ;;  %v6431_v23 = vld [vmem:[%s8072_s2] sm:$0x1]  ;;  %5100 = vmatprep.subr.mxu0 %v55_v37  ;;  %v53_v39 = vld [vmem:[%s8075_s5 + $0x8] sm:$0xff]  ;;  %v6453_v42 = vld [vmem:[#allocation2 + $0x98] sm:$0xff]  ;;  %vm614_vm7 = vcmask 1040384  }
  0x15   :  { %5116 = vmatpush3.msra.mxu1 %v6362_v10  ;;  %5108 = vmatprep.mubr.msk.f32.mxu0 %vm63_vm6, %v6348_v5  ;;  %v52_v40 = vld [vmem:[%s8075_s5] sm:$0xff]  ;;  %v6459_v43 = vld [vmem:[#allocation2 + $0x90] sm:$0xff]  ;;  %v6465_v44 = vld [vmem:[#allocation2 + $0x88] sm:$0xff]  ;;  %s6273_s5 = smov 80   ;;  %vm751_vm8 = vcmask 58368   ;;  %vm847_vm9 = vcmask 523264  }
  0x16   :  { %5117 = vmatprep.subr.mxu1 %v6268_v1  ;;  %5101 = vmatpush3.msra.mxu0 %v55_v37  ;;  %v6469_v45 = vld [vmem:[#allocation2 + $0x80] sm:$0xff]  ;;  %v6473_v46 = vld [vmem:[#allocation2 + $0x78] sm:$0xff]  ;;  %v6477_v47 = vld [vmem:[#allocation2 + $0x70] sm:$0xff]  ;;  %vm921_vm10 = vcmask 123904  }
  0x17   :  { %5118 = vmatpush3.msra.mxu1 %v6369_v12  ;;  %5102 = vmatprep.subr.mxu0 %v54_v38  ;;  %v6481_v48 = vld [vmem:[#allocation2 + $0x68] sm:$0xff]  ;;  %v6485_v49 = vld [vmem:[#allocation2 + $0x60] sm:$0xff]  ;;  %v6491_v50 = vld [vmem:[#allocation2 + $0x58] sm:$0xff] }
  0x18   :  { %5119 = vmatprep.subr.mxu1 %v6268_v1  ;;  %5103 = vmatpush3.msra.mxu0 %v54_v38  ;;  %v6495_v51 = vld [vmem:[#allocation2 + $0x50] sm:$0xff]  ;;  %v6538_v63 = vld [vmem:[%s8072_s2 + $0x1] sm:$0x1] }
  0x19   :  { %5120 = vmatpush3.msra.mxu1 %v6373_v13  ;;  %5104 = vmatprep.subr.mxu0 %v53_v39 }
  0x1a   :  { %5121 = vmatprep.subr.mxu1 %v6268_v1  ;;  %5105 = vmatpush3.msra.mxu0 %v53_v39 }
  0x1b   :  { %5122 = vmatpush3.msra.mxu1 %v6377_v14  ;;  %5106 = vmatprep.subr.mxu0 %v52_v40 }
  0x1c   :  { %5123 = vmatprep.subr.mxu1 %v6268_v1  ;;  %5107 = vmatpush3.msra.mxu0 %v52_v40 }
  0x1d   :  { %5124 = vmatpush3.msra.mxu1 %v6381_v15  ;;  %5134 = vmatprep.subr.mxu0 %v6268_v1 }
  0x1e   :  { %5125 = vmatprep.subr.mxu1 %v6268_v1  ;;  %5109 = vmatmul.mubr.msk.f32.vlgmr.msra.gmra.mxu0 %vm63_vm6, %v6353_v6 }
  0x1f   :  { %5126 = vmatpush3.msra.mxu1 %v6385_v16  ;;  %5135 = vmatpush3.msra.mxu0 %v6453_v42 }
  0x20   :  { %5127 = vmatprep.subr.mxu1 %v6268_v1  ;;  %5154 = vmatprep.mubr.msk.f32.mxu0 %vm6269_vm0, %v6268_v1 }
  0x21   :  { %5128 = vmatpush3.msra.mxu1 %v6389_v17  ;;  %5136 = vmatprep.subr.mxu0 %v6268_v1 }
  0x22   :  { %5129 = vmatprep.subr.mxu1 %v6268_v1  ;;  %5137 = vmatpush3.msra.mxu0 %v6459_v43 }
  0x23   :  { %5130 = vmatpush3.msra.mxu1 %v6393_v18  ;;  %5138 = vmatprep.subr.mxu0 %v6268_v1 }
  0x24   :  { %5157 = vmatprep.subr.mxu1 %v6268_v1  ;;  %5139 = vmatpush3.msra.mxu0 %v6465_v44 }
  0x25   :  { %5140 = vmatprep.subr.mxu0 %v6268_v1 }
  0x26   :  { %5141 = vmatpush3.msra.mxu0 %v6469_v45 }
  0x27   :  { %5142 = vmatprep.subr.mxu0 %v6268_v1 }
  0x28   :  { %5143 = vmatpush3.msra.mxu0 %v6473_v46 }
  0x29   :  { %5144 = vmatprep.subr.mxu0 %v6268_v1 }
  0x2a   :  { %5145 = vmatpush3.msra.mxu0 %v6477_v47 }
  0x2b   :  { %5146 = vmatprep.subr.mxu0 %v6268_v1 }
  0x2c   :  { %5147 = vmatpush3.msra.mxu0 %v6481_v48 }
  0x2d   :  { %5148 = vmatprep.subr.mxu0 %v6268_v1 }
  0x2e   :  { %5149 = vmatpush3.msra.mxu0 %v6485_v49 }
  0x2f   :  { %5150 = vmatprep.subr.mxu0 %v6268_v1 }
  0x30   :  { %5151 = vmatpush3.msra.mxu0 %v6491_v50 }
  0x31   :  { %5152 = vmatprep.subr.mxu0 %v6268_v1 }
  0x32   :  { %5153 = vmatpush3.msra.mxu0 %v6495_v51 }
  0x33   :  { %5180 = vmatprep.subr.mxu0 %v6268_v1 }
  0x85   :  { %v194_v20 = vpop.permute.xlu0 %193 }
  0x86   :  { %v6401_v21 = vsel %vm196_vm3, %v4683_v19, %v194_v20 }
  0x87   :  { %v199_v22 = vsel %vm198_vm4, %v6401_v21, 0.0 }
  0x88   :  { %5132 = vmatmul.mubr.msk.f32.vlgmr.msra.gmra.mxu1 %vm200_vm5, %v199_v22 }
  0x89   :  { %5158 = vmatpush3.msra.mxu1 %v6355_v7  ;;  %5177 = vmatprep.mubr.msk.f32.mxu1 %vm6269_vm0, %v6268_v1 }
  0x8a   :  { %5159 = vmatprep.subr.mxu1 %v6268_v1 }
  0x8b   :  { %5160 = vmatpush3.msra.mxu1 %v6359_v9 }
  0x8c   :  { %5161 = vmatprep.subr.mxu1 %v6268_v1 }
  0x8d   :  { %5162 = vmatpush3.msra.mxu1 %v6362_v10 }
  0x8e   :  { %5163 = vmatprep.subr.mxu1 %v6268_v1 }
  0x8f   :  { %5164 = vmatpush3.msra.mxu1 %v6369_v12 }
  0x90   :  { %5165 = vmatprep.subr.mxu1 %v6268_v1 }
  0x91   :  { %5166 = vmatpush3.msra.mxu1 %v6373_v13 }
  0x92   :  { %5167 = vmatprep.subr.mxu1 %v6268_v1 }
  0x93   :  { %5168 = vmatpush3.msra.mxu1 %v6377_v14 }
  0x94   :  { %5169 = vmatprep.subr.mxu1 %v6268_v1 }
  0x95   :  { %5170 = vmatpush3.msra.mxu1 %v6381_v15 }
  0x96   :  { %5171 = vmatprep.subr.mxu1 %v6268_v1 }
  0x97   :  { %5172 = vmatpush3.msra.mxu1 %v6385_v16 }
  0x98   :  { %5173 = vmatprep.subr.mxu1 %v6268_v1 }
  0x99   :  { %5174 = vmatpush3.msra.mxu1 %v6389_v17 }
  0x9a   :  { %5175 = vmatprep.subr.mxu1 %v6268_v1 }
  0x9b   :  { %5176 = vmatpush3.msra.mxu1 %v6393_v18 }
  0x9c   :  { %5203 = vmatprep.subr.mxu1 %v6268_v1 }
  0xde   :  { %v6531_v61 = vpop.f32.mrf.mxu0 }
  0xe0   :  { %v6533_v62 = vpop.f32.mrf.mxu0 }
 0x148   :  { %v270_v24 = vpop.f32.mrf.mxu1 }
 0x149   :  { %v271_v25 = vadd.f32 %v270_v24, %v6431_v23 }
 0x14a   :  { %v5133_v26 = vpop.f32.mrf.mxu1 }
 0x14b   :  { %5859 = vtanh.f32 %v271_v25  ;;  %v4685_v28 = vmul.f32 -1.442695, %v271_v25 }
 0x14d   :  { %5861 = vpow2.f32 %v4685_v28 }
 0x158   :  { %v5860_v27 = vpop.eup %5859 }
 0x159   :  { %283 = vrot.lane.b32.xlu0 %v5860_v27, %s6271_s26 }
 0x15a   :  { %v5862_v29 = vpop.eup %5861 }
 0x15b   :  { %v277_v30 = vadd.f32 1.0, %v5862_v29 }
 0x15d   :  { %5863 = vrcp.f32 %v277_v30 }
 0x16a   :  { %v5864_v31 = vpop.eup %5863 }
 0x16b   :  { %v281_v34 = vmul.f32 0.0, %v5864_v31 }
 0x1cb   :  { %v284_v32 = vpop.permute.xlu0 %283 }
 0x1cc   :  { %v286_v33 = vmul.f32 %v5864_v31, %v284_v32 }
 0x1ce   :  { %288 = vrot.lane.b32.xlu1 %v286_v33, %s6272_s27 }
 0x240   :  { %v289_v35 = vpop.permute.xlu1 %288 }
 0x241   :  { %v6436_v36 = vadd.f32 %v289_v35, %v281_v34 }
 0x243   :  { %5865 = vtanh.f32 %v6436_v36 }
 0x250   :  { %v5866_v41 = vpop.eup %5865 }
 0x251   :  { %294 = vrot.lane.b32.xlu1 %v5866_v41, %s6271_s26 }
 0x2c3   :  { %v295_v52 = vpop.permute.xlu1 %294 }
 0x2c4   :  { %v297_v53 = vmul.f32 %v5864_v31, %v295_v52 }
 0x2c6   :  { %v401_v54 = vrot.slane %v297_v53, 7  ;;  %299 = vrot.lane.b32.xlu1 %v297_v53, %s6272_s27 }
 0x2c8   :  { %402 = vrot.lane.b32.xlu0 %v401_v54, %s6273_s5 }
 0x338   :  { %v300_v55 = vpop.permute.xlu1 %299 }
 0x339   :  { %v302_v56 = vsel %vm63_vm6, %v300_v55, 0.0 }
 0x33a   :  { %v303_v57 = vsel %vm198_vm4, %v302_v56, 0.0  ;;  %v403_v58 = vpop.permute.xlu0 %402 }
 0x33b   :  { %v405_v59 = vsel %vm198_vm4, %v6401_v21, %v403_v58  ;;  %5155 = vmatmul.mubr.msk.f32.vlgmr.msra.gmra.mxu0 %vm200_vm5, %v303_v57 }
 0x33c   :  { %v407_v60 = vrot.slane %v405_v59, 1  ;;  %5181 = vmatpush3.msra.mxu0 %v6453_v42  ;;  %5200 = vmatprep.mubr.msk.f32.mxu0 %vm6269_vm0, %v6268_v1 }
 0x33d   :  { %5182 = vmatprep.subr.mxu0 %v6268_v1 }
 0x33e   :  { %5178 = vmatmul.mubr.msk.f32.vlgmr.msra.gmra.mxu1 %vm200_vm5, %v407_v60  ;;  %5183 = vmatpush3.msra.mxu0 %v6459_v43 }
 0x33f   :  { %5184 = vmatprep.subr.mxu0 %v6268_v1  ;;  %5211 = vmatprep.mubr.msk.f32.mxu1 %vm6269_vm0, %v6268_v1 }
 0x340   :  { %5185 = vmatpush3.msra.mxu0 %v6465_v44 }
 0x341   :  { %5186 = vmatprep.subr.mxu0 %v6268_v1 }
 0x342   :  { %5187 = vmatpush3.msra.mxu0 %v6469_v45 }
 0x343   :  { %5188 = vmatprep.subr.mxu0 %v6268_v1 }
 0x344   :  { %5189 = vmatpush3.msra.mxu0 %v6473_v46 }
 0x345   :  { %5190 = vmatprep.subr.mxu0 %v6268_v1 }
 0x346   :  { %5191 = vmatpush3.msra.mxu0 %v6477_v47 }
 0x347   :  { %5192 = vmatprep.subr.mxu0 %v6268_v1 }
 0x348   :  { %5193 = vmatpush3.msra.mxu0 %v6481_v48 }
 0x349   :  { %5194 = vmatprep.subr.mxu0 %v6268_v1 }
 0x34a   :  { %5195 = vmatpush3.msra.mxu0 %v6485_v49 }
 0x34b   :  { %5196 = vmatprep.subr.mxu0 %v6268_v1 }
 0x34c   :  { %5197 = vmatpush3.msra.mxu0 %v6491_v50 }
 0x34d   :  { %5198 = vmatprep.subr.mxu0 %v6268_v1 }
 0x34e   :  { %5199 = vmatpush3.msra.mxu0 %v6495_v51 }
 0x34f   :  { %5214 = vmatprep.subr.mxu0 %v6268_v1 }
 0x3fb   :  { %v373_v0 = vpop.f32.mrf.mxu0 }
 0x3fc   :  { %v374_v2 = vadd.f32 %v6538_v63, %v373_v0 }
 0x3fd   :  { %v5156_v8 = vpop.f32.mrf.mxu0 }
 0x3fe   :  { %5867 = vtanh.f32 %v374_v2  ;;  %v476_v11 = vpop.f32.mrf.mxu1  ;;  %v4687_v24 = vmul.f32 -1.442695, %v374_v2 }
 0x3ff   :  { %v477_v19 = vadd.f32 %v476_v11, %v6431_v23 }
 0x400   :  { %v5179_v20 = vpop.f32.mrf.mxu1 }
 0x401   :  { %5869 = vtanh.f32 %v477_v19  ;;  %v4689_v25 = vmul.f32 -1.442695, %v477_v19 }
 0x402   :  { %5871 = vpow2.f32 %v4687_v24 }
 0x403   :  { %5873 = vpow2.f32 %v4689_v25 }
 0x40b   :  { %v5868_v21 = vpop.eup %5867 }
 0x40c   :  { %386 = vrot.lane.b32.xlu1 %v5868_v21, %s6271_s26 }
 0x40e   :  { %v5870_v22 = vpop.eup %5869 }
 0x40f   :  { %489 = vrot.lane.b32.xlu0 %v5870_v22, %s6271_s26  ;;  %v5872_v26 = vpop.eup %5871 }
 0x410   :  { %v5874_v27 = vpop.eup %5873  ;;  %v380_v28 = vadd.f32 1.0, %v5872_v26 }
 0x411   :  { %v483_v29 = vadd.f32 1.0, %v5874_v27 }
 0x412   :  { %5875 = vrcp.f32 %v380_v28 }
 0x413   :  { %5877 = vrcp.f32 %v483_v29 }
 0x41f   :  { %v5876_v30 = vpop.eup %5875 }
 0x420   :  { %v5878_v33 = vpop.eup %5877  ;;  %v384_v37 = vmul.f32 0.0, %v5876_v30 }
 0x421   :  { %v487_v40 = vmul.f32 %v5878_v33, %v6436_v36 }
 0x47e   :  { %v387_v31 = vpop.permute.xlu1 %386 }
 0x47f   :  { %v389_v32 = vmul.f32 %v5876_v30, %v387_v31  ;;  %v6576_v31 = vld [vmem:[%s8073_s3 + $0x10] sm:$0xff] }
 0x481   :  { %v490_v34 = vpop.permute.xlu0 %489  ;;  %391 = vrot.lane.b32.xlu1 %v389_v32, %s6272_s27  ;;  %v6583_v32 = vld [vmem:[%s8073_s3 + $0x8] sm:$0xff] }
 0x482   :  { %v492_v35 = vmul.f32 %v5878_v33, %v490_v34 }
 0x484   :  { %494 = vrot.lane.b32.xlu0 %v492_v35, %s6272_s27 }
 0x4f3   :  { %v392_v38 = vpop.permute.xlu1 %391 }
 0x4f4   :  { %v394_v39 = vadd.f32 %v392_v38, %v384_v37 }
 0x4f6   :  { %5879 = vtanh.f32 %v394_v39  ;;  %v495_v41 = vpop.permute.xlu0 %494 }
 0x4f7   :  { %v6547_v52 = vadd.f32 %v495_v41, %v487_v40  ;;  %v6274_v41 = vmov 1966171168  }
 0x4f9   :  { %5881 = vtanh.f32 %v6547_v52 }
 0x503   :  { %v5880_v53 = vpop.eup %5879 }
 0x504   :  { %397 = vrot.lane.b32.xlu1 %v5880_v53, %s6271_s26  ;;  %v700_v53 = vunpack.c.l.s4 %v6274_v41 }
 0x506   :  { %v5882_v54 = vpop.eup %5881 }
 0x507   :  { %500 = vrot.lane.b32.xlu0 %v5882_v54, %s6271_s26  ;;  %v701_v54 = vunpack.c.0.s8 %v700_v53 }
 0x576   :  { %v398_v55 = vpop.permute.xlu1 %397 }
 0x577   :  { %v400_v56 = vmul.f32 %v5876_v30, %v398_v55  ;;  %v6571_v30 = vld [vmem:[%s8073_s3 + $0x18] sm:$0xff]  ;;  %v6631_v55 = vld [vmem:[%s8074_s4] ss:$0 sm:$0xff] }
 0x578   :  { %5204 = vmatpush3.msra.mxu1 %v6571_v30 }
 0x579   :  { %v501_v57 = vpop.permute.xlu0 %500  ;;  %509 = vrot.lane.b32.xlu1 %v400_v56, %s6273_s5  ;;  %5205 = vmatprep.subr.mxu1 %v6268_v1 }
 0x57a   :  { %v6553_v58 = vmul.f32 %v5878_v33, %v501_v57  ;;  %5206 = vmatpush3.msra.mxu1 %v6576_v31  ;;  %v6590_v33 = vld [vmem:[%s8073_s3] sm:$0xff]  ;;  %v6634_v57 = vsub.s32 %v701_v54, %v6338_v3 }
 0x57b   :  { %5207 = vmatprep.subr.mxu1 %v6268_v1 }
 0x57c   :  { %505 = vrot.lane.b32.xlu0 %v6553_v58, %s6272_s27  ;;  %5208 = vmatpush3.msra.mxu1 %v6583_v32 }
 0x57d   :  { %5209 = vmatprep.subr.mxu1 %v6268_v1 }
 0x57e   :  { %5210 = vmatpush3.msra.mxu1 %v6590_v33 }
 0x57f   :  { %5233 = vmatprep.subr.mxu1 %v6268_v1 }
 0x5eb   :  { %v510_v59 = vpop.permute.xlu1 %509 }
 0x5ee   :  { %v506_v36 = vpop.permute.xlu0 %505 }
 0x5ef   :  { %v512_v60 = vsel %vm63_vm6, %v506_v36, 0.0 }
 0x5f0   :  { %v513_v0 = vsel %vm198_vm4, %v512_v60, %v510_v59  ;;  %v4679_v59 = vld [vmem:[%s8076_s6] ss:$0 sm:$0xff] }
 0x5f1   :  { %5201 = vmatmul.mubr.msk.f32.vlgmr.msra.gmra.mxu0 %vm200_vm5, %v513_v0 }
 0x5f2   :  { %5230 = vmatprep.mubr.msk.f32.mxu0 %vm6269_vm0, %v6268_v1 }
 0x6b1   :  { %v583_v2 = vpop.f32.mrf.mxu0 }
 0x6b2   :  { %v584_v8 = vadd.f32 %v6538_v63, %v583_v2  ;;  %v6641_v2 = vsub.s32 0, %v6338_v3 }
 0x6b3   :  { %v5202_v11 = vpop.f32.mrf.mxu0 }
 0x6b4   :  { %5883 = vtanh.f32 %v584_v8  ;;  %v4691_v20 = vmul.f32 -1.442695, %v584_v8  ;;  %v137_v8 = vadd.f32 %v4679_v59, %v6533_v62 }
 0x6b6   :  { %5885 = vpow2.f32 %v4691_v20 }
 0x6c1   :  { %v5884_v19 = vpop.eup %5883 }
 0x6c2   :  { %596 = vrot.lane.b32.xlu0 %v5884_v19, %s6271_s26  ;;  %v142_v19 = vadd.f32 %v6531_v61, %v4679_v59 }
 0x6c3   :  { %v5886_v21 = vpop.eup %5885 }
 0x6c4   :  { %v590_v22 = vadd.f32 1.0, %v5886_v21 }
 0x6c6   :  { %5887 = vrcp.f32 %v590_v22  ;;  %v6647_v22 = vmax.f32 %v137_v8, 0.0 }
 0x6d3   :  { %v5888_v24 = vpop.eup %5887 }
 0x6d4   :  { %v594_v27 = vmul.f32 %v5888_v24, %v394_v39 }
 0x734   :  { %v597_v25 = vpop.permute.xlu0 %596 }
 0x735   :  { %v599_v26 = vmul.f32 %v5888_v24, %v597_v25 }
 0x737   :  { %601 = vrot.lane.b32.xlu1 %v599_v26, %s6272_s27  ;;  %v6651_v26 = vmax.f32 %v142_v19, 0.0 }
 0x7a9   :  { %v602_v28 = vpop.permute.xlu1 %601 }
 0x7aa   :  { %v6565_v29 = vadd.f32 %v602_v28, %v594_v27 }
 0x7ac   :  { %5889 = vtanh.f32 %v6565_v29 }
 0x7b9   :  { %v5890_v34 = vpop.eup %5889 }
 0x7ba   :  { %607 = vrot.lane.b32.xlu0 %v5890_v34, %s6271_s26 }
 0x82c   :  { %v608_v35 = vpop.permute.xlu0 %607 }
 0x82d   :  { %v6597_v37 = vmul.f32 %v5888_v24, %v608_v35 }
 0x82f   :  { %v612_v38 = vrot.slane %v6597_v37, 7 }
 0x831   :  { %v615_v39 = vsel %vm614_vm7, %v400_v56, %v612_v38 }
 0x832   :  { %623 = vrot.lane.b32.xlu1 %v615_v39, %s6272_s27 }
 0x8a4   :  { %v6602_v40 = vpop.permute.xlu1 %623 }
 0x8a5   :  { %5212 = vmatmul.mubr.msk.f32.vlgmr.msra.gmra.mxu1 %vm63_vm6, %v6602_v40 }
 0x8a6   :  { %5234 = vmatpush3.msra.mxu1 %v6355_v7  ;;  %5253 = vmatprep.mubr.msk.f32.mxu1 %vm6269_vm0, %v6268_v1 }
 0x8a7   :  { %5235 = vmatprep.subr.mxu1 %v6268_v1 }
 0x8a8   :  { %5236 = vmatpush3.msra.mxu1 %v6359_v9 }
 0x8a9   :  { %5237 = vmatprep.subr.mxu1 %v6268_v1 }
 0x8aa   :  { %5238 = vmatpush3.msra.mxu1 %v6362_v10 }
 0x8ab   :  { %5239 = vmatprep.subr.mxu1 %v6268_v1 }
 0x8ac   :  { %5240 = vmatpush3.msra.mxu1 %v6369_v12 }
 0x8ad   :  { %5241 = vmatprep.subr.mxu1 %v6268_v1 }
 0x8ae   :  { %5242 = vmatpush3.msra.mxu1 %v6373_v13 }
 0x8af   :  { %5243 = vmatprep.subr.mxu1 %v6268_v1 }
 0x8b0   :  { %5244 = vmatpush3.msra.mxu1 %v6377_v14 }
 0x8b1   :  { %5245 = vmatprep.subr.mxu1 %v6268_v1 }
 0x8b2   :  { %5246 = vmatpush3.msra.mxu1 %v6381_v15 }
 0x8b3   :  { %5247 = vmatprep.subr.mxu1 %v6268_v1 }
 0x8b4   :  { %5248 = vmatpush3.msra.mxu1 %v6385_v16 }
 0x8b5   :  { %5249 = vmatprep.subr.mxu1 %v6268_v1 }
 0x8b6   :  { %5250 = vmatpush3.msra.mxu1 %v6389_v17 }
 0x8b7   :  { %5251 = vmatprep.subr.mxu1 %v6268_v1 }
 0x8b8   :  { %5252 = vmatpush3.msra.mxu1 %v6393_v18 }
 0x8b9   :  { %5279 = vmatprep.subr.mxu1 %v6268_v1 }
 0x965   :  { %v693_v56 = vpop.f32.mrf.mxu1 }
 0x966   :  { %v694_v36 = vadd.f32 %v6631_v55, %v693_v56  ;;  %v6275_v56 = vmov 0  }
 0x967   :  { %v5213_v60 = vpop.f32.mrf.mxu1  ;;  %5858 = vset.pattern.permute.xlu1 %v6275_v56  ;;  %5857 = vset.pattern.permute.xlu0 %v6275_v56  ;;  %v6681_v56 = vld [vmem:[%s8077_s7 + $0x30] sm:$0xff] }
 0x968   :  { %v697_v0 = vmax.f32 %v694_v36, 0.0  ;;  %v6663_v36 = vsub.s32 1, %v6338_v3 }
 0x96a   :  { %v705_v11 = vrot.slane %v697_v0, %v6634_v57 }
 0x96c   :  { %v706_v20 = vcombine.high %v705_v11, %v705_v11  ;;  %v713_v21 = vrot.slane %v705_v11, %v6634_v57 }
 0x96e   :  { %v724_v24 = vrot.slane %v713_v21, %v6641_v2  ;;  %v720_v25 = vrot.slane %v706_v20, %v6634_v57 }
 0x970   :  { %v731_v27 = vmul.f32 %v724_v24, %v6647_v22  ;;  %v728_v28 = vrot.slane %v720_v25, %v6641_v2 }
 0x972   :  { %v733_v62 = vsel %vm63_vm6, %v731_v27, 0.0  ;;  %v732_v34 = vmul.f32 %v728_v28, %v6651_v26 }
 0x973   :  { %734 = vadd.xlane.f32.xlu0 %v733_v62 }
 0x974   :  { %v736_v61 = vsel %vm63_vm6, %v732_v34, 0.0 }
 0x975   :  { %737 = vadd.xlane.f32.xlu1 %v736_v61 }
 0x9fc   :  { %v735_v35 = vpop.xlane.xlu0 %734 }
 0x9fd   :  { %v744_v39 = vrot.slane %v735_v35, %v6343_v4 }
 0x9fe   :  { %v738_v38 = vpop.xlane.xlu1 %737 }
 0x9ff   :  { %v748_v41 = vrot.slane %v738_v38, %v6343_v4 }
 0xa01   :  { %v749_v53 = vsel %vm191_vm1, %v748_v41, %v744_v39 }
 0xa02   :  { %v752_v54 = vsel %vm751_vm8, %v749_v53, -inf }
 0xa03   :  { %753 = vmax.xlane.f32.xlu0 %v752_v54  ;;  %v6676_v54 = vld [vmem:[%s8077_s7 + $0x38] sm:$0xff] }
 0xa04   :  { %5215 = vmatpush3.msra.mxu0 %v6676_v54 }
 0xa05   :  { %5216 = vmatprep.subr.mxu0 %v6268_v1 }
 0xa06   :  { %5217 = vmatpush3.msra.mxu0 %v6681_v56 }
 0xa07   :  { %5218 = vmatprep.subr.mxu0 %v6268_v1 }
 0xa8c   :  { %v754_v59 = vpop.xlane.xlu0 %753 }
 0xa8d   :  { %v759_v60 = vrot.slane %v754_v59, %v6641_v2  ;;  %v763_v0 = vrot.slane %v754_v59, %v6663_v36  ;;  %v6688_v59 = vld [vmem:[%s8077_s7 + $0x28] sm:$0xff] }
 0xa8e   :  { %5219 = vmatpush3.msra.mxu0 %v6688_v59 }
 0xa8f   :  { %v766_v8 = vsub.f32 %v735_v35, %v759_v60  ;;  %v767_v11 = vsub.f32 %v738_v38, %v763_v0  ;;  %v6695_v60 = vld [vmem:[%s8077_s7 + $0x20] sm:$0xff]  ;;  %5220 = vmatprep.subr.mxu0 %v6268_v1  ;;  %v6702_v0 = vld [vmem:[%s8077_s7 + $0x18] sm:$0xff] }
 0xa90   :  { %5221 = vmatpush3.msra.mxu0 %v6695_v60 }
 0xa91   :  { %v768_v19 = vmul.f32 1.442695, %v766_v8  ;;  %v770_v20 = vmul.f32 1.442695, %v767_v11  ;;  %5222 = vmatprep.subr.mxu0 %v6268_v1  ;;  %v6709_v8 = vld [vmem:[%s8077_s7 + $0x10] sm:$0xff]  ;;  %v6716_v11 = vld [vmem:[%s8077_s7 + $0x8] sm:$0xff] }
 0xa92   :  { %5223 = vmatpush3.msra.mxu0 %v6702_v0 }
 0xa93   :  { %5891 = vpow2.f32 %v768_v19  ;;  %5224 = vmatprep.subr.mxu0 %v6268_v1 }
 0xa94   :  { %5893 = vpow2.f32 %v770_v20  ;;  %5225 = vmatpush3.msra.mxu0 %v6709_v8 }
 0xa95   :  { %5226 = vmatprep.subr.mxu0 %v6268_v1 }
 0xa96   :  { %5227 = vmatpush3.msra.mxu0 %v6716_v11 }
 0xa97   :  { %5228 = vmatprep.subr.mxu0 %v6268_v1 }
 0xaa0   :  { %v5892_v21 = vpop.eup %5891 }
 0xaa1   :  { %v5894_v24 = vpop.eup %5893  ;;  %775 = vperm.xlu0 %5857, %v5892_v21  }
 0xaa2   :  { %778 = vperm.xlu1 %5858, %v5894_v24  }
 0xb1c   :  { %v776_v25 = vpop.permute.xlu0 %775 }
 0xb1d   :  { %v779_v27 = vpop.permute.xlu1 %778  ;;  %v783_v3 = vrot.slane %v776_v25, %v6343_v4 }
 0xb1e   :  { %v787_v28 = vrot.slane %v779_v27, %v6343_v4 }
 0xb20   :  { %v788_v62 = vsel %vm191_vm1, %v787_v28, %v783_v3 }
 0xb21   :  { %v790_v34 = vsel %vm751_vm8, %v788_v62, 0.0 }
 0xb22   :  { %791 = vadd.xlane.f32.xlu1 %v790_v34 }
 0xbab   :  { %v792_v61 = vpop.xlane.xlu1 %791 }
 0xbac   :  { %5895 = vrcp.f32 %v792_v61 }
 0xbb9   :  { %v5896_v35 = vpop.eup %5895 }
 0xbba   :  { %v798_v38 = vrot.slane %v5896_v35, %v6641_v2  ;;  %v802_v41 = vrot.slane %v5896_v35, %v6663_v36  ;;  %v6732_v35 = vld [vmem:[%s8077_s7] sm:$0xff] }
 0xbbb   :  { %5229 = vmatpush3.msra.mxu0 %v6732_v35 }
 0xbbc   :  { %v805_v39 = vmul.f32 %v5892_v21, %v798_v38  ;;  %v806_v53 = vmul.f32 %v5894_v24, %v802_v41  ;;  %5256 = vmatprep.subr.mxu0 %v6268_v1 }
 0xbbe   :  { %809 = vperm.xlu0 %5857, %v805_v39  }
 0xbc2   :  { %814 = vperm.xlu0 %5857, %v806_v53  }
 0xc39   :  { %v810_v19 = vpop.permute.xlu0 %809 }
 0xc3a   :  { %v817_v20 = vmul.f32 %v810_v19, %v6348_v5  ;;  %v4583_v27 = vrot.slane %v810_v19, %v6343_v4 }
 0xc3c   :  { %v819_v21 = vsel %vm63_vm6, %v817_v20, 0.0 }
 0xc3d   :  { %v820_v24 = vrot.slane %v819_v21, 4  ;;  %v815_v25 = vpop.permute.xlu0 %814 }
 0xc3e   :  { %v818_v3 = vmul.f32 %v815_v25, %v6353_v6  ;;  %v4587_v28 = vrot.slane %v815_v25, %v6343_v4 }
 0xc3f   :  { %v821_v62 = vadd.f32 %v820_v24, %v819_v21 }
 0xc40   :  { %v826_v34 = vsel %vm63_vm6, %v818_v3, 0.0  ;;  %v4628_v61 = vsel %vm191_vm1, %v4587_v28, %v4583_v27 }
 0xc41   :  { %v822_v5 = vrot.slane %v821_v62, 2  ;;  %v827_v38 = vrot.slane %v826_v34, 4  ;;  %4640 = vst.msk [vmem:[#allocation6] sm:$0x3] %vm751_vm8, %v4628_v61 }
 0xc43   :  { %v828_v6 = vadd.f32 %v827_v38, %v826_v34  ;;  %v823_v39 = vadd.f32 %v822_v5, %v821_v62 }
 0xc45   :  { %v829_v41 = vrot.slane %v828_v6, 2  ;;  %v824_v53 = vrot.slane %v823_v39, 1 }
 0xc47   :  { %v830_v19 = vadd.f32 %v829_v41, %v828_v6  ;;  %v825_v21 = vadd.f32 %v824_v53, %v823_v39 }
 0xc49   :  { %v831_v20 = vrot.slane %v830_v19, 1 }
 0xc4b   :  { %v832_v24 = vadd.f32 %v831_v20, %v830_v19 }
 0xc4d   :  { %v836_v25 = vsel %vm191_vm1, %v832_v24, %v825_v21 }
 0xc4e   :  { %837 = vrot.lane.b32.xlu0 %v836_v25, %s6272_s27 }
 0xcc0   :  { %v838_v27 = vpop.permute.xlu0 %837 }
 0xcc1   :  { %v840_v3 = vsel %vm63_vm6, %v6602_v40, %v838_v27  ;;  %v6767_v40 = vld [vmem:[%s8078_s8] ss:$0 sm:$0xff] }
 0xcc2   :  { %5231 = vmatmul.mubr.msk.f32.vlgmr.msra.gmra.mxu0 %vm847_vm9, %v840_v3 }
 0xcc3   :  { %5257 = vmatpush3.msra.mxu0 %v6453_v42  ;;  %5276 = vmatprep.mubr.msk.f32.mxu0 %vm6269_vm0, %v6268_v1 }
 0xcc4   :  { %5258 = vmatprep.subr.mxu0 %v6268_v1 }
 0xcc5   :  { %5259 = vmatpush3.msra.mxu0 %v6459_v43 }
 0xcc6   :  { %5260 = vmatprep.subr.mxu0 %v6268_v1 }
 0xcc7   :  { %5261 = vmatpush3.msra.mxu0 %v6465_v44 }
 0xcc8   :  { %5262 = vmatprep.subr.mxu0 %v6268_v1 }
 0xcc9   :  { %5263 = vmatpush3.msra.mxu0 %v6469_v45 }
 0xcca   :  { %5264 = vmatprep.subr.mxu0 %v6268_v1 }
 0xccb   :  { %5265 = vmatpush3.msra.mxu0 %v6473_v46 }
 0xccc   :  { %5266 = vmatprep.subr.mxu0 %v6268_v1 }
 0xccd   :  { %5267 = vmatpush3.msra.mxu0 %v6477_v47 }
 0xcce   :  { %5268 = vmatprep.subr.mxu0 %v6268_v1 }
 0xccf   :  { %5269 = vmatpush3.msra.mxu0 %v6481_v48 }
 0xcd0   :  { %5270 = vmatprep.subr.mxu0 %v6268_v1 }
 0xcd1   :  { %5271 = vmatpush3.msra.mxu0 %v6485_v49 }
 0xcd2   :  { %5272 = vmatprep.subr.mxu0 %v6268_v1 }
 0xcd3   :  { %5273 = vmatpush3.msra.mxu0 %v6491_v50 }
 0xcd4   :  { %5274 = vmatprep.subr.mxu0 %v6268_v1 }
 0xcd5   :  { %5275 = vmatpush3.msra.mxu0 %v6495_v51 }
 0xcd6   :  { %5302 = vmatprep.subr.mxu0 %v6268_v1 }
 0xd82   :  { %v917_v28 = vpop.f32.mrf.mxu0 }
 0xd83   :  { %v918_v62 = vadd.f32 %v6767_v40, %v917_v28 }
 0xd84   :  { %v5232_v34 = vpop.f32.mrf.mxu0 }
 0xd85   :  { %v922_v61 = vsel %vm921_vm10, %v918_v62, -inf }
 0xd86   :  { %923 = vmax.xlane.f32.xlu1 %v922_v61 }
 0xd97   :  { %934 = vrot.lane.b32.xlu1 %v836_v25, %s6270_s23 }
 0xd9b   :  { %938 = vrot.lane.b32.xlu1 %v6553_v58, %s6273_s5 }
 0xe0f   :  { %v924_v5 = vpop.xlane.xlu1 %923 }
 0xe10   :  { %v925_v38 = vsub.f32 %v918_v62, %v924_v5 }
 0xe12   :  { %v926_v6 = vmul.f32 1.442695, %v925_v38 }
 0xe13   :  { %v935_v19 = vpop.permute.xlu1 %934 }
 0xe14   :  { %5897 = vpow2.f32 %v926_v6 }
 0xe17   :  { %v939_v27 = vpop.permute.xlu1 %938 }
 0xe21   :  { %v5898_v39 = vpop.eup %5897 }
 0xe22   :  { %v928_v41 = vsel %vm921_vm10, %v5898_v39, 0.0 }
 0xe23   :  { %929 = vadd.xlane.f32.xlu0 %v928_v41 }
 0xeac   :  { %v930_v53 = vpop.xlane.xlu0 %929 }
 0xead   :  { %5899 = vlog2.f32 %v930_v53 }
 0xeba   :  { %v5900_v20 = vpop.eup %5899 }
 0xebb   :  { %v932_v21 = vmul.f32 0.6931472, %v5900_v20 }
 0xebd   :  { %v933_v24 = vsub.f32 %v925_v38, %v932_v21 }
 0xebf   :  { %4574 = vst.msk [vmem:[#allocation5] sm:$0x3] %vm921_vm10, %v933_v24  ;;  %v937_v25 = vsel %vm196_vm3, %v933_v24, %v935_v19 }
 0xec0   :  { %v941_v58 = vsel %vm198_vm4, %v937_v25, %v939_v27 }
 0xec1   :  { %5254 = vmatmul.mubr.msk.f32.vlgmr.msra.gmra.mxu1 %vm200_vm5, %v941_v58 }
 0xec2   :  { %5280 = vmatpush3.msra.mxu1 %v6355_v7  ;;  %5299 = vmatprep.mubr.msk.f32.mxu1 %vm6269_vm0, %v6268_v1 }
 0xec3   :  { %5281 = vmatprep.subr.mxu1 %v6268_v1 }
 0xec4   :  { %5282 = vmatpush3.msra.mxu1 %v6359_v9 }
 0xec5   :  { %5283 = vmatprep.subr.mxu1 %v6268_v1 }
 0xec6   :  { %5284 = vmatpush3.msra.mxu1 %v6362_v10 }
 0xec7   :  { %5285 = vmatprep.subr.mxu1 %v6268_v1 }
 0xec8   :  { %5286 = vmatpush3.msra.mxu1 %v6369_v12 }
 0xec9   :  { %5287 = vmatprep.subr.mxu1 %v6268_v1 }
 0xeca   :  { %5288 = vmatpush3.msra.mxu1 %v6373_v13 }
 0xecb   :  { %5289 = vmatprep.subr.mxu1 %v6268_v1 }
 0xecc   :  { %5290 = vmatpush3.msra.mxu1 %v6377_v14 }
 0xecd   :  { %5291 = vmatprep.subr.mxu1 %v6268_v1 }
 0xece   :  { %5292 = vmatpush3.msra.mxu1 %v6381_v15 }
 0xecf   :  { %5293 = vmatprep.subr.mxu1 %v6268_v1 }
 0xed0   :  { %5294 = vmatpush3.msra.mxu1 %v6385_v16 }
 0xed1   :  { %5295 = vmatprep.subr.mxu1 %v6268_v1 }
 0xed2   :  { %5296 = vmatpush3.msra.mxu1 %v6389_v17 }
 0xed3   :  { %5297 = vmatprep.subr.mxu1 %v6268_v1 }
 0xed4   :  { %5298 = vmatpush3.msra.mxu1 %v6393_v18 }
 0xed5   :  { %5325 = vmatprep.subr.mxu1 %v6268_v1 }
 0xf81   :  { %v1011_v7 = vpop.f32.mrf.mxu1 }
 0xf82   :  { %v1012_v9 = vadd.f32 %v1011_v7, %v6431_v23 }
 0xf83   :  { %v5255_v10 = vpop.f32.mrf.mxu1 }
 0xf84   :  { %5901 = vtanh.f32 %v1012_v9  ;;  %v4697_v13 = vmul.f32 -1.442695, %v1012_v9 }
 0xf86   :  { %5903 = vpow2.f32 %v4697_v13 }
 0xf91   :  { %v5902_v12 = vpop.eup %5901 }
 0xf92   :  { %1024 = vrot.lane.b32.xlu1 %v5902_v12, %s6271_s26 }
 0xf93   :  { %v5904_v14 = vpop.eup %5903 }
 0xf94   :  { %v1018_v15 = vadd.f32 1.0, %v5904_v14 }
 0xf96   :  { %5905 = vrcp.f32 %v1018_v15 }
 0xfa3   :  { %v5906_v16 = vpop.eup %5905 }
 0xfa4   :  { %v1022_v18 = vmul.f32 %v5906_v16, %v6547_v52 }
0x1004   :  { %v1025_v17 = vpop.permute.xlu1 %1024 }
0x1005   :  { %v1027_v3 = vmul.f32 %v5906_v16, %v1025_v17 }
0x1007   :  { %1029 = vrot.lane.b32.xlu1 %v1027_v3, %s6272_s27 }
0x1079   :  { %v1030_v28 = vpop.permute.xlu1 %1029 }
0x107a   :  { %v6805_v62 = vadd.f32 %v1030_v28, %v1022_v18 }
0x107c   :  { %5907 = vtanh.f32 %v6805_v62 }
0x1089   :  { %v5908_v34 = vpop.eup %5907 }
0x108a   :  { %1035 = vrot.lane.b32.xlu0 %v5908_v34, %s6271_s26 }
0x10fc   :  { %v1036_v61 = vpop.permute.xlu0 %1035 }
0x10fd   :  { %v1038_v5 = vmul.f32 %v5906_v16, %v1036_v61  ;;  %v6877_v61 = vld [vmem:[#allocation2 + $0x48] sm:$0xff] }
0x10ff   :  { %1040 = vrot.lane.b32.xlu1 %v1038_v5, %s6272_s27  ;;  %v1145_v38 = vrot.slane %v1038_v5, 7  ;;  %v6883_v5 = vld [vmem:[#allocation2 + $0x40] sm:$0xff] }
0x1103   :  { %1146 = vrot.lane.b32.xlu1 %v1145_v38, %s6273_s5  ;;  %v6887_v38 = vld [vmem:[#allocation2 + $0x38] sm:$0xff] }
0x1107   :  { %1043 = vrot.lane.b32.xlu1 %v6597_v37, %s6273_s5 }
0x1171   :  { %v1041_v6 = vpop.permute.xlu1 %1040 }
0x1172   :  { %v1046_v53 = vsel %vm63_vm6, %v1041_v6, 0.0  ;;  %v6891_v6 = vld [vmem:[#allocation2 + $0x30] sm:$0xff] }
0x1175   :  { %v1147_v52 = vpop.permute.xlu1 %1146 }
0x1176   :  { %v1149_v39 = vsel %vm198_vm4, %v937_v25, %v1147_v52  ;;  %v6895_v52 = vld [vmem:[#allocation2 + $0x28] sm:$0xff] }
0x1177   :  { %v1151_v41 = vrot.slane %v1149_v39, 1  ;;  %v6899_v39 = vld [vmem:[#allocation2 + $0x20] sm:$0xff] }
0x1179   :  { %5300 = vmatmul.mubr.msk.f32.vlgmr.msra.gmra.mxu1 %vm200_vm5, %v1151_v41  ;;  %v1044_v19 = vpop.permute.xlu1 %1043  ;;  %v6903_v41 = vld [vmem:[#allocation2 + $0x18] sm:$0xff] }
0x117a   :  { %v1047_v20 = vsel %vm198_vm4, %v1046_v53, %v1044_v19  ;;  %5326 = vmatpush3.msra.mxu1 %v6571_v30  ;;  %5333 = vmatprep.mubr.msk.f32.mxu1 %vm6269_vm0, %v6268_v1  ;;  %v6907_v53 = vld [vmem:[#allocation2 + $0x10] sm:$0xff]  ;;  %v6911_v19 = vld [vmem:[#allocation2 + $0x8] sm:$0xff] }
0x117b   :  { %5277 = vmatmul.mubr.msk.f32.vlgmr.msra.gmra.mxu0 %vm200_vm5, %v1047_v20  ;;  %5327 = vmatprep.subr.mxu1 %v6268_v1  ;;  %v6915_v20 = vld [vmem:[#allocation2] sm:$0xff] }
0x117c   :  { %5303 = vmatpush3.msra.mxu0 %v6453_v42  ;;  %5322 = vmatprep.mubr.msk.f32.mxu0 %vm6269_vm0, %v6268_v1 }
0x117d   :  { %5304 = vmatprep.subr.mxu0 %v6268_v1  ;;  %5328 = vmatpush3.msra.mxu1 %v6576_v31 }
0x117e   :  { %5305 = vmatpush3.msra.mxu0 %v6459_v43  ;;  %5329 = vmatprep.subr.mxu1 %v6268_v1 }
0x117f   :  { %5306 = vmatprep.subr.mxu0 %v6268_v1  ;;  %5330 = vmatpush3.msra.mxu1 %v6583_v32 }
0x1180   :  { %5307 = vmatpush3.msra.mxu0 %v6465_v44  ;;  %5331 = vmatprep.subr.mxu1 %v6268_v1 }
0x1181   :  { %5308 = vmatprep.subr.mxu0 %v6268_v1  ;;  %5332 = vmatpush3.msra.mxu1 %v6590_v33 }
0x1182   :  { %5309 = vmatpush3.msra.mxu0 %v6469_v45  ;;  %5336 = vmatprep.subr.mxu1 %v6268_v1 }
0x1183   :  { %5310 = vmatprep.subr.mxu0 %v6268_v1 }
0x1184   :  { %5311 = vmatpush3.msra.mxu0 %v6473_v46 }
0x1185   :  { %5312 = vmatprep.subr.mxu0 %v6268_v1 }
0x1186   :  { %5313 = vmatpush3.msra.mxu0 %v6477_v47 }
0x1187   :  { %5314 = vmatprep.subr.mxu0 %v6268_v1 }
0x1188   :  { %5315 = vmatpush3.msra.mxu0 %v6481_v48 }
0x1189   :  { %5316 = vmatprep.subr.mxu0 %v6268_v1 }
0x118a   :  { %5317 = vmatpush3.msra.mxu0 %v6485_v49 }
0x118b   :  { %5318 = vmatprep.subr.mxu0 %v6268_v1 }
0x118c   :  { %5319 = vmatpush3.msra.mxu0 %v6491_v50 }
0x118d   :  { %5320 = vmatprep.subr.mxu0 %v6268_v1 }
0x118e   :  { %5321 = vmatpush3.msra.mxu0 %v6495_v51 }
0x118f   :  { %5355 = vmatprep.subr.mxu0 %v6268_v1 }
0x1239   :  { %v1220_v42 = vpop.f32.mrf.mxu1 }
0x123a   :  { %v1221_v43 = vadd.f32 %v1220_v42, %v6431_v23 }
0x123b   :  { %v1117_v44 = vpop.f32.mrf.mxu0  ;;  %v5301_v45 = vpop.f32.mrf.mxu1 }
0x123c   :  { %5909 = vtanh.f32 %v1221_v43  ;;  %v1118_v46 = vadd.f32 %v6538_v63, %v1117_v44  ;;  %v4701_v50 = vmul.f32 -1.442695, %v1221_v43 }
0x123d   :  { %v5278_v47 = vpop.f32.mrf.mxu0 }
0x123e   :  { %5911 = vtanh.f32 %v1118_v46  ;;  %v4699_v51 = vmul.f32 -1.442695, %v1118_v46 }
0x123f   :  { %5913 = vpow2.f32 %v4701_v50 }
0x1240   :  { %5915 = vpow2.f32 %v4699_v51 }
0x1249   :  { %v5910_v48 = vpop.eup %5909 }
0x124a   :  { %1233 = vrot.lane.b32.xlu1 %v5910_v48, %s6271_s26 }
0x124b   :  { %v5912_v49 = vpop.eup %5911 }
0x124c   :  { %v5914_v30 = vpop.eup %5913 }
0x124d   :  { %v1227_v31 = vadd.f32 1.0, %v5914_v30  ;;  %v5916_v23 = vpop.eup %5915 }
0x124e   :  { %1130 = vrot.lane.b32.xlu1 %v5912_v49, %s6271_s26  ;;  %v1124_v32 = vadd.f32 1.0, %v5916_v23 }
0x124f   :  { %5917 = vrcp.f32 %v1227_v31 }
0x1250   :  { %5919 = vrcp.f32 %v1124_v32 }
0x125c   :  { %v5918_v33 = vpop.eup %5917 }
0x125d   :  { %v5920_v24 = vpop.eup %5919  ;;  %v1231_v58 = vmul.f32 %v5918_v33, %v6805_v62 }
0x125e   :  { %v1128_v10 = vmul.f32 %v5920_v24, %v6565_v29 }
0x12bc   :  { %v1234_v37 = vpop.permute.xlu1 %1233 }
0x12bd   :  { %v1236_v21 = vmul.f32 %v5918_v33, %v1234_v37 }
0x12bf   :  { %1238 = vrot.lane.b32.xlu1 %v1236_v21, %s6272_s27 }
0x12c0   :  { %v1131_v27 = vpop.permute.xlu1 %1130 }
0x12c1   :  { %v1133_v25 = vmul.f32 %v5920_v24, %v1131_v27 }
0x12c3   :  { %1135 = vrot.lane.b32.xlu0 %v1133_v25, %s6272_s27 }
0x1331   :  { %v1239_v7 = vpop.permute.xlu1 %1238 }
0x1332   :  { %v6857_v9 = vadd.f32 %v1239_v7, %v1231_v58 }
0x1334   :  { %5921 = vtanh.f32 %v6857_v9 }
0x1335   :  { %v1136_v12 = vpop.permute.xlu0 %1135 }
0x1336   :  { %v6861_v13 = vadd.f32 %v1136_v12, %v1128_v10 }
0x1338   :  { %5923 = vtanh.f32 %v6861_v13 }
0x1341   :  { %v5922_v14 = vpop.eup %5921 }
0x1342   :  { %1244 = vrot.lane.b32.xlu1 %v5922_v14, %s6271_s26 }
0x1345   :  { %v5924_v15 = vpop.eup %5923 }
0x1346   :  { %1141 = vrot.lane.b32.xlu0 %v5924_v15, %s6271_s26 }
0x13b4   :  { %v1245_v16 = vpop.permute.xlu1 %1244 }
0x13b5   :  { %v6866_v17 = vmul.f32 %v5918_v33, %v1245_v16 }
0x13b7   :  { %1249 = vrot.lane.b32.xlu1 %v6866_v17, %s6272_s27 }
0x13b8   :  { %v1142_v3 = vpop.permute.xlu0 %1141 }
0x13b9   :  { %v6870_v18 = vmul.f32 %v5920_v24, %v1142_v3 }
0x13bb   :  { %1253 = vrot.lane.b32.xlu0 %v6870_v18, %s6273_s5 }
0x1429   :  { %v1250_v29 = vpop.permute.xlu1 %1249 }
0x142a   :  { %v1256_v28 = vsel %vm63_vm6, %v1250_v29, 0.0 }
0x142d   :  { %v1254_v62 = vpop.permute.xlu0 %1253 }
0x142e   :  { %v1257_v34 = vsel %vm198_vm4, %v1256_v28, %v1254_v62 }
0x142f   :  { %5323 = vmatmul.mubr.msk.f32.vlgmr.msra.gmra.mxu0 %vm200_vm5, %v1257_v34 }
0x1430   :  { %5356 = vmatpush3.msra.mxu0 %v6877_v61  ;;  %5375 = vmatprep.mubr.msk.f32.mxu0 %vm6269_vm0, %v6268_v1 }
0x1431   :  { %5357 = vmatprep.subr.mxu0 %v6268_v1 }
0x1432   :  { %5358 = vmatpush3.msra.mxu0 %v6883_v5 }
0x1433   :  { %5359 = vmatprep.subr.mxu0 %v6268_v1 }
0x1434   :  { %5360 = vmatpush3.msra.mxu0 %v6887_v38 }
0x1435   :  { %5361 = vmatprep.subr.mxu0 %v6268_v1 }
0x1436   :  { %5362 = vmatpush3.msra.mxu0 %v6891_v6 }
0x1437   :  { %5363 = vmatprep.subr.mxu0 %v6268_v1 }
0x1438   :  { %5364 = vmatpush3.msra.mxu0 %v6895_v52 }
0x1439   :  { %5365 = vmatprep.subr.mxu0 %v6268_v1 }
0x143a   :  { %5366 = vmatpush3.msra.mxu0 %v6899_v39 }
0x143b   :  { %5367 = vmatprep.subr.mxu0 %v6268_v1 }
0x143c   :  { %5368 = vmatpush3.msra.mxu0 %v6903_v41 }
0x143d   :  { %5369 = vmatprep.subr.mxu0 %v6268_v1 }
0x143e   :  { %5370 = vmatpush3.msra.mxu0 %v6907_v53 }
0x143f   :  { %5371 = vmatprep.subr.mxu0 %v6268_v1 }
0x1440   :  { %5372 = vmatpush3.msra.mxu0 %v6911_v19 }
0x1441   :  { %5373 = vmatprep.subr.mxu0 %v6268_v1 }
0x1442   :  { %5374 = vmatpush3.msra.mxu0 %v6915_v20 }
0x1443   :  { %5401 = vmatprep.subr.mxu0 %v6268_v1 }
0x14ef   :  { %v1327_v42 = vpop.f32.mrf.mxu0 }
0x14f0   :  { %v1328_v43 = vadd.f32 %v6538_v63, %v1327_v42 }
0x14f1   :  { %v5324_v44 = vpop.f32.mrf.mxu0 }
0x14f2   :  { %5925 = vtanh.f32 %v1328_v43  ;;  %v4703_v46 = vmul.f32 -1.442695, %v1328_v43 }
0x14f4   :  { %5927 = vpow2.f32 %v4703_v46 }
0x14ff   :  { %v5926_v45 = vpop.eup %5925 }
0x1500   :  { %1340 = vrot.lane.b32.xlu1 %v5926_v45, %s6271_s26 }
0x1501   :  { %v5928_v47 = vpop.eup %5927 }
0x1502   :  { %v1334_v48 = vadd.f32 1.0, %v5928_v47 }
0x1504   :  { %5929 = vrcp.f32 %v1334_v48 }
0x1511   :  { %v5930_v49 = vpop.eup %5929 }
0x1512   :  { %v1338_v30 = vmul.f32 %v5930_v49, %v6861_v13 }
0x1572   :  { %v1341_v50 = vpop.permute.xlu1 %1340 }
0x1573   :  { %v1343_v51 = vmul.f32 %v5930_v49, %v1341_v50 }
0x1575   :  { %1345 = vrot.lane.b32.xlu0 %v1343_v51, %s6272_s27 }
0x15e7   :  { %v1346_v31 = vpop.permute.xlu0 %1345 }
0x15e8   :  { %v6923_v23 = vadd.f32 %v1346_v31, %v1338_v30 }
0x15ea   :  { %5931 = vtanh.f32 %v6923_v23 }
0x15f7   :  { %v5932_v63 = vpop.eup %5931 }
0x15f8   :  { %1351 = vrot.lane.b32.xlu1 %v5932_v63, %s6271_s26 }
0x166a   :  { %v1352_v32 = vpop.permute.xlu1 %1351 }
0x166b   :  { %v6927_v33 = vmul.f32 %v5930_v49, %v1352_v32 }
0x166d   :  { %v1356_v37 = vrot.slane %v6927_v33, 7 }
0x166f   :  { %v1358_v21 = vsel %vm614_vm7, %v6870_v18, %v1356_v37 }
0x1670   :  { %1360 = vrot.lane.b32.xlu0 %v1358_v21, %s6272_s27 }
0x16e2   :  { %v6933_v24 = vpop.permute.xlu0 %1360 }
0x16e3   :  { %5334 = vmatmul.mubr.msk.f32.vlgmr.msra.gmra.mxu1 %vm63_vm6, %v6933_v24 }
0x16e4   :  { %5337 = vmatpush3.msra.mxu1 %v6676_v54  ;;  %5352 = vmatprep.mubr.msk.f32.mxu1 %vm6269_vm0, %v6268_v1 }
0x16e5   :  { %5338 = vmatprep.subr.mxu1 %v6268_v1 }
0x16e6   :  { %5339 = vmatpush3.msra.mxu1 %v6681_v56 }
0x16e7   :  { %5340 = vmatprep.subr.mxu1 %v6268_v1 }
0x16e8   :  { %5341 = vmatpush3.msra.mxu1 %v6688_v59 }
0x16e9   :  { %5342 = vmatprep.subr.mxu1 %v6268_v1 }
0x16ea   :  { %5343 = vmatpush3.msra.mxu1 %v6695_v60 }
0x16eb   :  { %5344 = vmatprep.subr.mxu1 %v6268_v1 }
0x16ec   :  { %5345 = vmatpush3.msra.mxu1 %v6702_v0 }
0x16ed   :  { %5346 = vmatprep.subr.mxu1 %v6268_v1 }
0x16ee   :  { %5347 = vmatpush3.msra.mxu1 %v6709_v8 }
0x16ef   :  { %5348 = vmatprep.subr.mxu1 %v6268_v1 }
0x16f0   :  { %5349 = vmatpush3.msra.mxu1 %v6716_v11 }
0x16f1   :  { %5350 = vmatprep.subr.mxu1 %v6268_v1 }
0x16f2   :  { %5351 = vmatpush3.msra.mxu1 %v6732_v35 }
0x16f3   :  { %5378 = vmatprep.subr.mxu1 %v6268_v1 }
0x17a3   :  { %v1430_v54 = vpop.f32.mrf.mxu1 }
0x17a4   :  { %v1431_v56 = vadd.f32 %v6631_v55, %v1430_v54 }
0x17a5   :  { %v5335_v59 = vpop.f32.mrf.mxu1 }
0x17a6   :  { %v1434_v60 = vmax.f32 %v1431_v56, 0.0  ;;  %v6980_v56 = vld [vmem:[%s8070_s0] sm:$0xff] }
0x17a8   :  { %v1442_v0 = vrot.slane %v1434_v60, %v6634_v57 }
0x17aa   :  { %v1443_v27 = vcombine.high %v1442_v0, %v1442_v0  ;;  %v1450_v8 = vrot.slane %v1442_v0, %v6634_v57 }
0x17ac   :  { %v1461_v25 = vrot.slane %v1450_v8, %v6641_v2  ;;  %v1457_v11 = vrot.slane %v1443_v27, %v6634_v57 }
0x17ae   :  { %v1468_v58 = vmul.f32 %v1461_v25, %v6647_v22  ;;  %v1465_v35 = vrot.slane %v1457_v11, %v6641_v2  ;;  %v6988_v25 = vld [vmem:[%s8070_s0 + $0x8] sm:$0xff] }
0x17b0   :  { %v1470_v7 = vsel %vm63_vm6, %v1468_v58, 0.0  ;;  %v1469_v10 = vmul.f32 %v1465_v35, %v6651_v26 }
0x17b1   :  { %1471 = vadd.xlane.f32.xlu1 %v1470_v7 }
0x17b2   :  { %v1473_v55 = vsel %vm63_vm6, %v1469_v10, 0.0 }
0x17b3   :  { %1474 = vadd.xlane.f32.xlu0 %v1473_v55 }
0x183a   :  { %v1472_v12 = vpop.xlane.xlu1 %1471 }
0x183b   :  { %v1481_v14 = vrot.slane %v1472_v12, %v6343_v4 }
0x183c   :  { %v1475_v13 = vpop.xlane.xlu0 %1474 }
0x183d   :  { %v1485_v15 = vrot.slane %v1475_v13, %v6343_v4 }
0x183f   :  { %v1486_v16 = vsel %vm191_vm1, %v1485_v15, %v1481_v14 }
0x1840   :  { %v1488_v3 = vsel %vm751_vm8, %v1486_v16, -inf }
0x1841   :  { %1489 = vmax.xlane.f32.xlu0 %v1488_v3 }
0x18ca   :  { %v1490_v18 = vpop.xlane.xlu0 %1489 }
0x18cb   :  { %v1495_v29 = vrot.slane %v1490_v18, %v6641_v2  ;;  %v1499_v28 = vrot.slane %v1490_v18, %v6663_v36 }
0x18cd   :  { %v1502_v62 = vsub.f32 %v1472_v12, %v1495_v29  ;;  %v1503_v34 = vsub.f32 %v1475_v13, %v1499_v28 }
0x18cf   :  { %v1504_v42 = vmul.f32 1.442695, %v1502_v62  ;;  %v1506_v43 = vmul.f32 1.442695, %v1503_v34 }
0x18d1   :  { %5933 = vpow2.f32 %v1504_v42 }
0x18d2   :  { %5935 = vpow2.f32 %v1506_v43  ;;  %v7000_v43 = vld [vmem:[#allocation2 + $0x98] sm:$0xff] }
0x18de   :  { %v5934_v44 = vpop.eup %5933 }
0x18df   :  { %v5936_v45 = vpop.eup %5935  ;;  %1511 = vperm.xlu1 %5858, %v5934_v44  }
0x18e0   :  { %1514 = vperm.xlu0 %5857, %v5936_v45  }
0x195a   :  { %v1512_v46 = vpop.permute.xlu1 %1511 }
0x195b   :  { %v1515_v47 = vpop.permute.xlu0 %1514  ;;  %v1519_v48 = vrot.slane %v1512_v46, %v6343_v4  ;;  %v7018_v46 = vld [vmem:[#allocation2 + $0x78] sm:$0xff] }
0x195c   :  { %v1523_v49 = vrot.slane %v1515_v47, %v6343_v4  ;;  %v7022_v47 = vld [vmem:[#allocation2 + $0x70] sm:$0xff] }
0x195e   :  { %v1524_v50 = vsel %vm191_vm1, %v1523_v49, %v1519_v48  ;;  %v7026_v48 = vld [vmem:[#allocation2 + $0x68] sm:$0xff]  ;;  %v7030_v49 = vld [vmem:[#allocation2 + $0x60] sm:$0xff] }
0x195f   :  { %v1526_v51 = vsel %vm751_vm8, %v1524_v50, 0.0  ;;  %v7034_v50 = vld [vmem:[#allocation2 + $0x58] sm:$0xff] }
0x1960   :  { %1527 = vadd.xlane.f32.xlu1 %v1526_v51  ;;  %v7038_v51 = vld [vmem:[#allocation2 + $0x50] sm:$0xff] }
0x19e9   :  { %v1528_v30 = vpop.xlane.xlu1 %1527 }
0x19ea   :  { %5937 = vrcp.f32 %v1528_v30 }
0x19f7   :  { %v5938_v31 = vpop.eup %5937 }
0x19f8   :  { %v1534_v63 = vrot.slane %v5938_v31, %v6641_v2  ;;  %v1538_v37 = vrot.slane %v5938_v31, %v6663_v36 }
0x19fa   :  { %v1541_v32 = vmul.f32 %v5934_v44, %v1534_v63  ;;  %v1542_v21 = vmul.f32 %v5936_v45, %v1538_v37  ;;  %v7006_v44 = vld [vmem:[#allocation2 + $0x90] sm:$0xff]  ;;  %v7010_v45 = vld [vmem:[#allocation2 + $0x88] sm:$0xff] }
0x19fc   :  { %1545 = vperm.xlu0 %5857, %v1541_v32  }
0x1a00   :  { %1550 = vperm.xlu0 %5857, %v1542_v21  }
0x1a77   :  { %v1546_v54 = vpop.permute.xlu0 %1545 }
0x1a78   :  { %v1553_v59 = vmul.f32 %v6980_v56, %v1546_v54  ;;  %v4591_v8 = vrot.slane %v1546_v54, %v6343_v4 }
0x1a7a   :  { %v1555_v60 = vsel %vm63_vm6, %v1553_v59, 0.0 }
0x1a7b   :  { %v1556_v0 = vrot.slane %v1555_v60, 4  ;;  %v1551_v27 = vpop.permute.xlu0 %1550 }
0x1a7c   :  { %v1554_v11 = vmul.f32 %v6988_v25, %v1551_v27  ;;  %v4595_v58 = vrot.slane %v1551_v27, %v6343_v4 }
0x1a7d   :  { %v1557_v35 = vadd.f32 %v1556_v0, %v1555_v60 }
0x1a7e   :  { %v1562_v7 = vsel %vm63_vm6, %v1554_v11, 0.0  ;;  %v4629_v10 = vsel %vm191_vm1, %v4595_v58, %v4591_v8 }
0x1a7f   :  { %v1558_v55 = vrot.slane %v1557_v35, 2  ;;  %v1563_v12 = vrot.slane %v1562_v7, 4  ;;  %4641 = vst.msk [vmem:[#allocation6 + $0x2] sm:$0x3] %vm751_vm8, %v4629_v10  ;;  %v7077_v10 = vld [vmem:[%s8072_s2] sm:$0x1] }
0x1a81   :  { %v1564_v13 = vadd.f32 %v1563_v12, %v1562_v7  ;;  %v1559_v14 = vadd.f32 %v1558_v55, %v1557_v35 }
0x1a83   :  { %v1565_v15 = vrot.slane %v1564_v13, 2  ;;  %v1560_v16 = vrot.slane %v1559_v14, 1 }
0x1a85   :  { %v1566_v3 = vadd.f32 %v1565_v15, %v1564_v13  ;;  %v1561_v29 = vadd.f32 %v1560_v16, %v1559_v14 }
0x1a87   :  { %v1567_v18 = vrot.slane %v1566_v3, 1 }
0x1a89   :  { %v1568_v28 = vadd.f32 %v1567_v18, %v1566_v3 }
0x1a8b   :  { %v1572_v62 = vsel %vm191_vm1, %v1568_v28, %v1561_v29 }
0x1a8c   :  { %1573 = vrot.lane.b32.xlu0 %v1572_v62, %s6272_s27 }
0x1afe   :  { %v1574_v34 = vpop.permute.xlu0 %1573 }
0x1aff   :  { %v1576_v42 = vsel %vm63_vm6, %v6933_v24, %v1574_v34  ;;  %v7014_v24 = vld [vmem:[#allocation2 + $0x80] sm:$0xff] }
0x1b00   :  { %5353 = vmatmul.mubr.msk.f32.vlgmr.msra.gmra.mxu1 %vm847_vm9, %v1576_v42 }
0x1b01   :  { %5379 = vmatpush3.msra.mxu1 %v7000_v43  ;;  %5398 = vmatprep.mubr.msk.f32.mxu1 %vm6269_vm0, %v6268_v1 }
0x1b02   :  { %5380 = vmatprep.subr.mxu1 %v6268_v1 }
0x1b03   :  { %5381 = vmatpush3.msra.mxu1 %v7006_v44 }
0x1b04   :  { %5382 = vmatprep.subr.mxu1 %v6268_v1 }
0x1b05   :  { %5383 = vmatpush3.msra.mxu1 %v7010_v45 }
0x1b06   :  { %5384 = vmatprep.subr.mxu1 %v6268_v1 }
0x1b07   :  { %5385 = vmatpush3.msra.mxu1 %v7014_v24 }
0x1b08   :  { %5386 = vmatprep.subr.mxu1 %v6268_v1 }
0x1b09   :  { %5387 = vmatpush3.msra.mxu1 %v7018_v46 }
0x1b0a   :  { %5388 = vmatprep.subr.mxu1 %v6268_v1 }
0x1b0b   :  { %5389 = vmatpush3.msra.mxu1 %v7022_v47 }
0x1b0c   :  { %5390 = vmatprep.subr.mxu1 %v6268_v1 }
0x1b0d   :  { %5391 = vmatpush3.msra.mxu1 %v7026_v48 }
0x1b0e   :  { %5392 = vmatprep.subr.mxu1 %v6268_v1 }
0x1b0f   :  { %5393 = vmatpush3.msra.mxu1 %v7030_v49 }
0x1b10   :  { %5394 = vmatprep.subr.mxu1 %v6268_v1 }
0x1b11   :  { %5395 = vmatpush3.msra.mxu1 %v7034_v50 }
0x1b12   :  { %5396 = vmatprep.subr.mxu1 %v6268_v1 }
0x1b13   :  { %5397 = vmatpush3.msra.mxu1 %v7038_v51 }
0x1b14   :  { %5424 = vmatprep.subr.mxu1 %v6268_v1 }
0x1bc0   :  { %v1646_v30 = vpop.f32.mrf.mxu1 }
0x1bc1   :  { %v1647_v31 = vadd.f32 %v6767_v40, %v1646_v30 }
0x1bc2   :  { %v5354_v63 = vpop.f32.mrf.mxu1 }
0x1bc3   :  { %v1650_v32 = vsel %vm921_vm10, %v1647_v31, -inf }
0x1bc4   :  { %1651 = vmax.xlane.f32.xlu0 %v1650_v32 }
0x1bda   :  { %1666 = vrot.lane.b32.xlu0 %v6866_v17, %s6273_s5 }
0x1c4d   :  { %v1652_v37 = vpop.xlane.xlu0 %1651 }
0x1c4e   :  { %v1653_v21 = vsub.f32 %v1647_v31, %v1652_v37 }
0x1c50   :  { %v1654_v54 = vmul.f32 1.442695, %v1653_v21 }
0x1c51   :  { %v1667_v58 = vpop.permute.xlu0 %1666 }
0x1c52   :  { %5939 = vpow2.f32 %v1654_v54 }
0x1c5f   :  { %v5940_v59 = vpop.eup %5939 }
0x1c60   :  { %v1656_v60 = vsel %vm921_vm10, %v5940_v59, 0.0 }
0x1c61   :  { %1657 = vadd.xlane.f32.xlu1 %v1656_v60 }
0x1c72   :  { %1662 = vrot.lane.b32.xlu1 %v1572_v62, %s6270_s23 }
0x1cea   :  { %v1658_v0 = vpop.xlane.xlu1 %1657 }
0x1ceb   :  { %5941 = vlog2.f32 %v1658_v0  ;;  %v7098_v0 = vld [vmem:[%s8073_s3 + $0x18] sm:$0xff] }
0x1cee   :  { %v1663_v11 = vpop.permute.xlu1 %1662 }
0x1cf8   :  { %v5942_v40 = vpop.eup %5941 }
0x1cf9   :  { %v1660_v27 = vmul.f32 0.6931472, %v5942_v40  ;;  %v7121_v40 = vld [vmem:[%s8073_s3 + $0x8] sm:$0xff] }
0x1cfb   :  { %v1661_v8 = vsub.f32 %v1653_v21, %v1660_v27  ;;  %v7130_v27 = vld [vmem:[%s8073_s3] sm:$0xff] }
0x1cfd   :  { %4575 = vst.msk [vmem:[#allocation5 + $0x2] sm:$0x3] %vm921_vm10, %v1661_v8  ;;  %v1665_v17 = vsel %vm196_vm3, %v1661_v8, %v1663_v11 }
0x1cfe   :  { %v1669_v35 = vsel %vm198_vm4, %v1665_v17, %v1667_v58 }
0x1cff   :  { %5376 = vmatmul.mubr.msk.f32.vlgmr.msra.gmra.mxu0 %vm200_vm5, %v1669_v35  ;;  %v7152_v35 = vld [vmem:[%s8072_s2 + $0x1] sm:$0x1] }
0x1d00   :  { %5402 = vmatpush3.msra.mxu0 %v6877_v61  ;;  %5421 = vmatprep.mubr.msk.f32.mxu0 %vm6269_vm0, %v6268_v1 }
0x1d01   :  { %5403 = vmatprep.subr.mxu0 %v6268_v1 }
0x1d02   :  { %5404 = vmatpush3.msra.mxu0 %v6883_v5 }
0x1d03   :  { %5405 = vmatprep.subr.mxu0 %v6268_v1 }
0x1d04   :  { %5406 = vmatpush3.msra.mxu0 %v6887_v38 }
0x1d05   :  { %5407 = vmatprep.subr.mxu0 %v6268_v1 }
0x1d06   :  { %5408 = vmatpush3.msra.mxu0 %v6891_v6 }
0x1d07   :  { %5409 = vmatprep.subr.mxu0 %v6268_v1 }
0x1d08   :  { %5410 = vmatpush3.msra.mxu0 %v6895_v52 }
0x1d09   :  { %5411 = vmatprep.subr.mxu0 %v6268_v1 }
0x1d0a   :  { %5412 = vmatpush3.msra.mxu0 %v6899_v39 }
0x1d0b   :  { %5413 = vmatprep.subr.mxu0 %v6268_v1 }
0x1d0c   :  { %5414 = vmatpush3.msra.mxu0 %v6903_v41 }
0x1d0d   :  { %5415 = vmatprep.subr.mxu0 %v6268_v1 }
0x1d0e   :  { %5416 = vmatpush3.msra.mxu0 %v6907_v53 }
0x1d0f   :  { %5417 = vmatprep.subr.mxu0 %v6268_v1 }
0x1d10   :  { %5418 = vmatpush3.msra.mxu0 %v6911_v19 }
0x1d11   :  { %5419 = vmatprep.subr.mxu0 %v6268_v1 }
0x1d12   :  { %5420 = vmatpush3.msra.mxu0 %v6915_v20 }
0x1d13   :  { %5447 = vmatprep.subr.mxu0 %v6268_v1 }
0x1dbf   :  { %v1739_v7 = vpop.f32.mrf.mxu0 }
0x1dc0   :  { %v1740_v55 = vadd.f32 %v7077_v10, %v1739_v7 }
0x1dc1   :  { %v5377_v12 = vpop.f32.mrf.mxu0 }
0x1dc2   :  { %5943 = vtanh.f32 %v1740_v55  ;;  %v4707_v14 = vmul.f32 -1.442695, %v1740_v55 }
0x1dc4   :  { %5945 = vpow2.f32 %v4707_v14 }
0x1dcf   :  { %v5944_v13 = vpop.eup %5943 }
0x1dd0   :  { %1752 = vrot.lane.b32.xlu1 %v5944_v13, %s6271_s26 }
0x1dd1   :  { %v5946_v15 = vpop.eup %5945 }
0x1dd2   :  { %v1746_v16 = vadd.f32 1.0, %v5946_v15 }
0x1dd4   :  { %5947 = vrcp.f32 %v1746_v16 }
0x1de1   :  { %v5948_v3 = vpop.eup %5947 }
0x1de2   :  { %v1750_v28 = vmul.f32 %v5948_v3, %v6857_v9 }
0x1e42   :  { %v1753_v18 = vpop.permute.xlu1 %1752 }
0x1e43   :  { %v1755_v29 = vmul.f32 %v5948_v3, %v1753_v18 }
0x1e45   :  { %1757 = vrot.lane.b32.xlu1 %v1755_v29, %s6272_s27 }
0x1eb7   :  { %v1758_v62 = vpop.permute.xlu1 %1757 }
0x1eb8   :  { %v7083_v34 = vadd.f32 %v1758_v62, %v1750_v28 }
0x1eba   :  { %5949 = vtanh.f32 %v7083_v34 }
0x1ec7   :  { %v5950_v42 = vpop.eup %5949 }
0x1ec8   :  { %1763 = vrot.lane.b32.xlu1 %v5950_v42, %s6271_s26 }
0x1f3a   :  { %v1764_v30 = vpop.permute.xlu1 %1763 }
0x1f3b   :  { %v1766_v31 = vmul.f32 %v5948_v3, %v1764_v30 }
0x1f3d   :  { %v1873_v63 = vrot.slane %v1766_v31, 7  ;;  %1768 = vrot.lane.b32.xlu0 %v1766_v31, %s6272_s27 }
0x1f3f   :  { %1874 = vrot.lane.b32.xlu1 %v1873_v63, %s6273_s5 }
0x1f43   :  { %1771 = vrot.lane.b32.xlu1 %v6927_v33, %s6273_s5  ;;  %v7112_v33 = vld [vmem:[%s8073_s3 + $0x10] sm:$0xff] }
0x1faf   :  { %v1769_v9 = vpop.permute.xlu0 %1768 }
0x1fb0   :  { %v1774_v54 = vsel %vm63_vm6, %v1769_v9, 0.0 }
0x1fb1   :  { %v1875_v32 = vpop.permute.xlu1 %1874 }
0x1fb2   :  { %v1877_v37 = vsel %vm198_vm4, %v1665_v17, %v1875_v32 }
0x1fb3   :  { %v1879_v21 = vrot.slane %v1877_v37, 1 }
0x1fb5   :  { %5422 = vmatmul.mubr.msk.f32.vlgmr.msra.gmra.mxu0 %vm200_vm5, %v1879_v21  ;;  %v1772_v59 = vpop.permute.xlu1 %1771 }
0x1fb6   :  { %v1775_v60 = vsel %vm198_vm4, %v1774_v54, %v1772_v59  ;;  %5448 = vmatpush3.msra.mxu0 %v7098_v0  ;;  %5455 = vmatprep.mubr.msk.f32.mxu0 %vm6269_vm0, %v6268_v1 }
0x1fb7   :  { %5399 = vmatmul.mubr.msk.f32.vlgmr.msra.gmra.mxu1 %vm200_vm5, %v1775_v60  ;;  %5449 = vmatprep.subr.mxu0 %v6268_v1 }
0x1fb8   :  { %5425 = vmatpush3.msra.mxu1 %v7000_v43  ;;  %5444 = vmatprep.mubr.msk.f32.mxu1 %vm6269_vm0, %v6268_v1 }
0x1fb9   :  { %5426 = vmatprep.subr.mxu1 %v6268_v1  ;;  %5450 = vmatpush3.msra.mxu0 %v7112_v33 }
0x1fba   :  { %5427 = vmatpush3.msra.mxu1 %v7006_v44  ;;  %5451 = vmatprep.subr.mxu0 %v6268_v1 }
0x1fbb   :  { %5428 = vmatprep.subr.mxu1 %v6268_v1  ;;  %5452 = vmatpush3.msra.mxu0 %v7121_v40 }
0x1fbc   :  { %5429 = vmatpush3.msra.mxu1 %v7010_v45  ;;  %5453 = vmatprep.subr.mxu0 %v6268_v1 }
0x1fbd   :  { %5430 = vmatprep.subr.mxu1 %v6268_v1  ;;  %5454 = vmatpush3.msra.mxu0 %v7130_v27 }
0x1fbe   :  { %5431 = vmatpush3.msra.mxu1 %v7014_v24  ;;  %5458 = vmatprep.subr.mxu0 %v6268_v1 }
0x1fbf   :  { %5432 = vmatprep.subr.mxu1 %v6268_v1 }
0x1fc0   :  { %5433 = vmatpush3.msra.mxu1 %v7018_v46 }
0x1fc1   :  { %5434 = vmatprep.subr.mxu1 %v6268_v1 }
0x1fc2   :  { %5435 = vmatpush3.msra.mxu1 %v7022_v47 }
0x1fc3   :  { %5436 = vmatprep.subr.mxu1 %v6268_v1 }
0x1fc4   :  { %5437 = vmatpush3.msra.mxu1 %v7026_v48 }
0x1fc5   :  { %5438 = vmatprep.subr.mxu1 %v6268_v1 }
0x1fc6   :  { %5439 = vmatpush3.msra.mxu1 %v7030_v49 }
0x1fc7   :  { %5440 = vmatprep.subr.mxu1 %v6268_v1 }
0x1fc8   :  { %5441 = vmatpush3.msra.mxu1 %v7034_v50 }
0x1fc9   :  { %5442 = vmatprep.subr.mxu1 %v6268_v1 }
0x1fca   :  { %5443 = vmatpush3.msra.mxu1 %v7038_v51 }
0x1fcb   :  { %5477 = vmatprep.subr.mxu1 %v6268_v1 }
0x2075   :  { %v1948_v8 = vpop.f32.mrf.mxu0 }
0x2076   :  { %v1949_v11 = vadd.f32 %v7077_v10, %v1948_v8 }
0x2077   :  { %v1845_v58 = vpop.f32.mrf.mxu1  ;;  %v5423_v17 = vpop.f32.mrf.mxu0 }
0x2078   :  { %5951 = vtanh.f32 %v1949_v11  ;;  %v1846_v7 = vadd.f32 %v7152_v35, %v1845_v58  ;;  %v4711_v14 = vmul.f32 -1.442695, %v1949_v11 }
0x2079   :  { %v5400_v55 = vpop.f32.mrf.mxu1 }
0x207a   :  { %5953 = vtanh.f32 %v1846_v7  ;;  %v4709_v15 = vmul.f32 -1.442695, %v1846_v7 }
0x207b   :  { %5955 = vpow2.f32 %v4711_v14 }
0x207c   :  { %5957 = vpow2.f32 %v4709_v15 }
0x2085   :  { %v5952_v12 = vpop.eup %5951 }
0x2086   :  { %1961 = vrot.lane.b32.xlu0 %v5952_v12, %s6271_s26 }
0x2087   :  { %v5954_v13 = vpop.eup %5953 }
0x2088   :  { %1858 = vrot.lane.b32.xlu1 %v5954_v13, %s6271_s26  ;;  %v5956_v16 = vpop.eup %5955 }
0x2089   :  { %v5958_v3 = vpop.eup %5957  ;;  %v1955_v18 = vadd.f32 1.0, %v5956_v16 }
0x208a   :  { %v1852_v29 = vadd.f32 1.0, %v5958_v3 }
0x208b   :  { %5959 = vrcp.f32 %v1955_v18 }
0x208c   :  { %5961 = vrcp.f32 %v1852_v29 }
0x2098   :  { %v5960_v28 = vpop.eup %5959 }
0x2099   :  { %v5962_v30 = vpop.eup %5961  ;;  %v1959_v32 = vmul.f32 %v5960_v28, %v7083_v34 }
0x209a   :  { %v1856_v21 = vmul.f32 %v5962_v30, %v6923_v23 }
0x20f8   :  { %v1962_v62 = vpop.permute.xlu0 %1961 }
0x20f9   :  { %v1964_v42 = vmul.f32 %v5960_v28, %v1962_v62 }
0x20fa   :  { %v1859_v31 = vpop.permute.xlu1 %1858 }
0x20fb   :  { %1966 = vrot.lane.b32.xlu0 %v1964_v42, %s6272_s27  ;;  %v1861_v63 = vmul.f32 %v5962_v30, %v1859_v31  ;;  %v7215_v42 = vld [vmem:[%s8077_s7 + $0x38] sm:$0xff]  ;;  %v7231_v31 = vld [vmem:[%s8077_s7 + $0x28] sm:$0xff] }
0x20fd   :  { %1863 = vrot.lane.b32.xlu1 %v1861_v63, %s6272_s27  ;;  %v7238_v63 = vld [vmem:[%s8077_s7 + $0x20] sm:$0xff] }
0x216d   :  { %v1967_v9 = vpop.permute.xlu0 %1966 }
0x216e   :  { %v7160_v37 = vadd.f32 %v1967_v9, %v1959_v32  ;;  %v7245_v32 = vld [vmem:[%s8077_s7 + $0x18] sm:$0xff]  ;;  %v7252_v9 = vld [vmem:[%s8077_s7 + $0x10] sm:$0xff] }
0x216f   :  { %v1864_v54 = vpop.permute.xlu1 %1863 }
0x2170   :  { %5963 = vtanh.f32 %v7160_v37  ;;  %v1866_v59 = vadd.f32 %v1864_v54, %v1856_v21  ;;  %v7259_v21 = vld [vmem:[%s8077_s7 + $0x8] sm:$0xff]  ;;  %v7266_v54 = vld [vmem:[%s8077_s7] sm:$0xff] }
0x2172   :  { %5965 = vtanh.f32 %v1866_v59 }
0x217d   :  { %v5964_v60 = vpop.eup %5963 }
0x217e   :  { %1972 = vrot.lane.b32.xlu0 %v5964_v60, %s6271_s26  ;;  %v7273_v60 = vld [vmem:[%s8074_s4] ss:$0 sm:$0xff] }
0x217f   :  { %v5966_v8 = vpop.eup %5965 }
0x2180   :  { %1869 = vrot.lane.b32.xlu1 %v5966_v8, %s6271_s26 }
0x21f0   :  { %v1973_v11 = vpop.permute.xlu0 %1972 }
0x21f1   :  { %v7166_v58 = vmul.f32 %v5960_v28, %v1973_v11 }
0x21f2   :  { %v1870_v34 = vpop.permute.xlu1 %1869 }
0x21f3   :  { %1977 = vrot.lane.b32.xlu0 %v7166_v58, %s6272_s27  ;;  %v1872_v17 = vmul.f32 %v5962_v30, %v1870_v34  ;;  %v7224_v30 = vld [vmem:[%s8077_s7 + $0x30] sm:$0xff] }
0x21f5   :  { %1981 = vrot.lane.b32.xlu1 %v1872_v17, %s6273_s5 }
0x2265   :  { %v1978_v23 = vpop.permute.xlu0 %1977 }
0x2266   :  { %v1984_v7 = vsel %vm63_vm6, %v1978_v23, 0.0 }
0x2267   :  { %v1982_v55 = vpop.permute.xlu1 %1981 }
0x2268   :  { %v1985_v12 = vsel %vm198_vm4, %v1984_v7, %v1982_v55 }
0x2269   :  { %5445 = vmatmul.mubr.msk.f32.vlgmr.msra.gmra.mxu1 %vm200_vm5, %v1985_v12 }
0x226a   :  { %5478 = vmatpush3.msra.mxu1 %v6877_v61  ;;  %5497 = vmatprep.mubr.msk.f32.mxu1 %vm6269_vm0, %v6268_v1 }
0x226b   :  { %5479 = vmatprep.subr.mxu1 %v6268_v1 }
0x226c   :  { %5480 = vmatpush3.msra.mxu1 %v6883_v5 }
0x226d   :  { %5481 = vmatprep.subr.mxu1 %v6268_v1 }
0x226e   :  { %5482 = vmatpush3.msra.mxu1 %v6887_v38 }
0x226f   :  { %5483 = vmatprep.subr.mxu1 %v6268_v1 }
0x2270   :  { %5484 = vmatpush3.msra.mxu1 %v6891_v6 }
0x2271   :  { %5485 = vmatprep.subr.mxu1 %v6268_v1 }
0x2272   :  { %5486 = vmatpush3.msra.mxu1 %v6895_v52 }
0x2273   :  { %5487 = vmatprep.subr.mxu1 %v6268_v1 }
0x2274   :  { %5488 = vmatpush3.msra.mxu1 %v6899_v39 }
0x2275   :  { %5489 = vmatprep.subr.mxu1 %v6268_v1 }
0x2276   :  { %5490 = vmatpush3.msra.mxu1 %v6903_v41 }
0x2277   :  { %5491 = vmatprep.subr.mxu1 %v6268_v1 }
0x2278   :  { %5492 = vmatpush3.msra.mxu1 %v6907_v53 }
0x2279   :  { %5493 = vmatprep.subr.mxu1 %v6268_v1 }
0x227a   :  { %5494 = vmatpush3.msra.mxu1 %v6911_v19 }
0x227b   :  { %5495 = vmatprep.subr.mxu1 %v6268_v1 }
0x227c   :  { %5496 = vmatpush3.msra.mxu1 %v6915_v20 }
0x227d   :  { %5523 = vmatprep.subr.mxu1 %v6268_v1 }
0x2329   :  { %v2055_v61 = vpop.f32.mrf.mxu1 }
0x232a   :  { %v2056_v5 = vadd.f32 %v7152_v35, %v2055_v61 }
0x232b   :  { %v5446_v38 = vpop.f32.mrf.mxu1 }
0x232c   :  { %5967 = vtanh.f32 %v2056_v5  ;;  %v4713_v52 = vmul.f32 -1.442695, %v2056_v5 }
0x232e   :  { %5969 = vpow2.f32 %v4713_v52 }
0x2339   :  { %v5968_v6 = vpop.eup %5967 }
0x233a   :  { %2068 = vrot.lane.b32.xlu0 %v5968_v6, %s6271_s26 }
0x233b   :  { %v5970_v39 = vpop.eup %5969 }
0x233c   :  { %v2062_v41 = vadd.f32 1.0, %v5970_v39 }
0x233e   :  { %5971 = vrcp.f32 %v2062_v41 }
0x234b   :  { %v5972_v53 = vpop.eup %5971 }
0x234c   :  { %v2066_v20 = vmul.f32 %v5972_v53, %v1866_v59 }
0x23ac   :  { %v2069_v19 = vpop.permute.xlu0 %2068 }
0x23ad   :  { %v2071_v13 = vmul.f32 %v5972_v53, %v2069_v19 }
0x23af   :  { %2073 = vrot.lane.b32.xlu1 %v2071_v13, %s6272_s27 }
0x2421   :  { %v2074_v14 = vpop.permute.xlu1 %2073 }
0x2422   :  { %v7199_v15 = vadd.f32 %v2074_v14, %v2066_v20 }
0x2424   :  { %5973 = vtanh.f32 %v7199_v15 }
0x2431   :  { %v5974_v16 = vpop.eup %5973 }
0x2432   :  { %2079 = vrot.lane.b32.xlu0 %v5974_v16, %s6271_s26 }
0x24a4   :  { %v2080_v3 = vpop.permute.xlu0 %2079 }
0x24a5   :  { %v7203_v18 = vmul.f32 %v5972_v53, %v2080_v3 }
0x24a7   :  { %v2084_v29 = vrot.slane %v7203_v18, 7 }
0x24a9   :  { %v2086_v28 = vsel %vm614_vm7, %v1872_v17, %v2084_v29 }
0x24aa   :  { %2088 = vrot.lane.b32.xlu1 %v2086_v28, %s6272_s27 }
0x251c   :  { %v7208_v62 = vpop.permute.xlu1 %2088 }
0x251d   :  { %5456 = vmatmul.mubr.msk.f32.vlgmr.msra.gmra.mxu0 %vm63_vm6, %v7208_v62 }
0x251e   :  { %5459 = vmatpush3.msra.mxu0 %v7215_v42  ;;  %5474 = vmatprep.mubr.msk.f32.mxu0 %vm6269_vm0, %v6268_v1 }
0x251f   :  { %5460 = vmatprep.subr.mxu0 %v6268_v1 }
0x2520   :  { %5461 = vmatpush3.msra.mxu0 %v7224_v30 }
0x2521   :  { %5462 = vmatprep.subr.mxu0 %v6268_v1 }
0x2522   :  { %5463 = vmatpush3.msra.mxu0 %v7231_v31 }
0x2523   :  { %5464 = vmatprep.subr.mxu0 %v6268_v1 }
0x2524   :  { %5465 = vmatpush3.msra.mxu0 %v7238_v63 }
0x2525   :  { %5466 = vmatprep.subr.mxu0 %v6268_v1 }
0x2526   :  { %5467 = vmatpush3.msra.mxu0 %v7245_v32 }
0x2527   :  { %5468 = vmatprep.subr.mxu0 %v6268_v1 }
0x2528   :  { %5469 = vmatpush3.msra.mxu0 %v7252_v9 }
0x2529   :  { %5470 = vmatprep.subr.mxu0 %v6268_v1 }
0x252a   :  { %5471 = vmatpush3.msra.mxu0 %v7259_v21 }
0x252b   :  { %5472 = vmatprep.subr.mxu0 %v6268_v1 }
0x252c   :  { %5473 = vmatpush3.msra.mxu0 %v7266_v54 }
0x252d   :  { %5500 = vmatprep.subr.mxu0 %v6268_v1 }
0x25dd   :  { %v2158_v59 = vpop.f32.mrf.mxu0 }
0x25de   :  { %v2159_v8 = vadd.f32 %v7273_v60, %v2158_v59 }
0x25df   :  { %v5457_v11 = vpop.f32.mrf.mxu0 }
0x25e0   :  { %v2162_v34 = vmax.f32 %v2159_v8, 0.0 }
0x25e2   :  { %v2170_v17 = vrot.slane %v2162_v34, %v6634_v57 }
0x25e4   :  { %v2171_v23 = vcombine.high %v2170_v17, %v2170_v17  ;;  %v2178_v7 = vrot.slane %v2170_v17, %v6634_v57 }
0x25e6   :  { %v2189_v55 = vrot.slane %v2178_v7, %v6641_v2  ;;  %v2185_v12 = vrot.slane %v2171_v23, %v6634_v57 }
0x25e8   :  { %v2196_v61 = vmul.f32 %v2189_v55, %v6647_v22  ;;  %v2193_v5 = vrot.slane %v2185_v12, %v6641_v2 }
0x25ea   :  { %v2198_v38 = vsel %vm63_vm6, %v2196_v61, 0.0  ;;  %v2197_v6 = vmul.f32 %v2193_v5, %v6651_v26 }
0x25eb   :  { %2199 = vadd.xlane.f32.xlu0 %v2198_v38 }
0x25ec   :  { %v2201_v52 = vsel %vm63_vm6, %v2197_v6, 0.0 }
0x25ed   :  { %2202 = vadd.xlane.f32.xlu1 %v2201_v52 }
0x2674   :  { %v2200_v39 = vpop.xlane.xlu0 %2199 }
0x2675   :  { %v2209_v53 = vrot.slane %v2200_v39, %v6343_v4 }
0x2676   :  { %v2203_v41 = vpop.xlane.xlu1 %2202 }
0x2677   :  { %v2213_v19 = vrot.slane %v2203_v41, %v6343_v4 }
0x2679   :  { %v2214_v13 = vsel %vm191_vm1, %v2213_v19, %v2209_v53 }
0x267a   :  { %v2216_v20 = vsel %vm751_vm8, %v2214_v13, -inf }
0x267b   :  { %2217 = vmax.xlane.f32.xlu0 %v2216_v20 }
0x2704   :  { %v2218_v14 = vpop.xlane.xlu0 %2217 }
0x2705   :  { %v2223_v16 = vrot.slane %v2218_v14, %v6641_v2  ;;  %v2227_v3 = vrot.slane %v2218_v14, %v6663_v36 }
0x2707   :  { %v2230_v29 = vsub.f32 %v2200_v39, %v2223_v16  ;;  %v2231_v28 = vsub.f32 %v2203_v41, %v2227_v3 }
0x2709   :  { %v2232_v59 = vmul.f32 1.442695, %v2230_v29  ;;  %v2234_v8 = vmul.f32 1.442695, %v2231_v28 }
0x270b   :  { %5975 = vpow2.f32 %v2232_v59 }
0x270c   :  { %5977 = vpow2.f32 %v2234_v8 }
0x2718   :  { %v5976_v11 = vpop.eup %5975 }
0x2719   :  { %v5978_v34 = vpop.eup %5977  ;;  %2239 = vperm.xlu0 %5857, %v5976_v11  }
0x271a   :  { %2242 = vperm.xlu1 %5858, %v5978_v34  }
0x2794   :  { %v2240_v17 = vpop.permute.xlu0 %2239 }
0x2795   :  { %v2243_v23 = vpop.permute.xlu1 %2242  ;;  %v2247_v7 = vrot.slane %v2240_v17, %v6343_v4 }
0x2796   :  { %v2251_v55 = vrot.slane %v2243_v23, %v6343_v4 }
0x2798   :  { %v2252_v12 = vsel %vm191_vm1, %v2251_v55, %v2247_v7 }
0x2799   :  { %v2254_v61 = vsel %vm751_vm8, %v2252_v12, 0.0 }
0x279a   :  { %2255 = vadd.xlane.f32.xlu1 %v2254_v61 }
0x2823   :  { %v2256_v5 = vpop.xlane.xlu1 %2255 }
0x2824   :  { %5979 = vrcp.f32 %v2256_v5 }
0x2831   :  { %v5980_v38 = vpop.eup %5979 }
0x2832   :  { %v2262_v6 = vrot.slane %v5980_v38, %v6641_v2  ;;  %v2266_v39 = vrot.slane %v5980_v38, %v6663_v36 }
0x2834   :  { %v2269_v52 = vmul.f32 %v5976_v11, %v2262_v6  ;;  %v2270_v41 = vmul.f32 %v5978_v34, %v2266_v39 }
0x2836   :  { %2273 = vperm.xlu0 %5857, %v2269_v52   ;;  %v7335_v52 = vld [vmem:[%s8078_s8] ss:$0 sm:$0xff] }
0x283a   :  { %2278 = vperm.xlu0 %5857, %v2270_v41  }
0x28b1   :  { %v2274_v53 = vpop.permute.xlu0 %2273 }
0x28b2   :  { %v2281_v19 = vmul.f32 %v6980_v56, %v2274_v53  ;;  %v4599_v16 = vrot.slane %v2274_v53, %v6343_v4 }
0x28b4   :  { %v2283_v13 = vsel %vm63_vm6, %v2281_v19, 0.0 }
0x28b5   :  { %v2284_v20 = vrot.slane %v2283_v13, 4  ;;  %v2279_v14 = vpop.permute.xlu0 %2278 }
0x28b6   :  { %v2282_v3 = vmul.f32 %v6988_v25, %v2279_v14  ;;  %v4603_v29 = vrot.slane %v2279_v14, %v6343_v4 }
0x28b7   :  { %v2285_v28 = vadd.f32 %v2284_v20, %v2283_v13 }
0x28b8   :  { %v2290_v59 = vsel %vm63_vm6, %v2282_v3, 0.0  ;;  %v4630_v8 = vsel %vm191_vm1, %v4603_v29, %v4599_v16 }
0x28b9   :  { %v2286_v11 = vrot.slane %v2285_v28, 2  ;;  %v2291_v34 = vrot.slane %v2290_v59, 4  ;;  %4642 = vst.msk [vmem:[#allocation6 + $0x4] sm:$0x3] %vm751_vm8, %v4630_v8 }
0x28bb   :  { %v2292_v56 = vadd.f32 %v2291_v34, %v2290_v59  ;;  %v2287_v17 = vadd.f32 %v2286_v11, %v2285_v28 }
0x28bd   :  { %v2293_v23 = vrot.slane %v2292_v56, 2  ;;  %v2288_v7 = vrot.slane %v2287_v17, 1 }
0x28bf   :  { %v2294_v55 = vadd.f32 %v2293_v23, %v2292_v56  ;;  %v2289_v61 = vadd.f32 %v2288_v7, %v2287_v17  ;;  %v7350_v56 = vld [vmem:[#allocation2 + $0x48] sm:$0xff]  ;;  %v7356_v17 = vld [vmem:[#allocation2 + $0x40] sm:$0xff]  ;;  %v7360_v23 = vld [vmem:[#allocation2 + $0x38] sm:$0xff] }
0x28c0   :  { %v7364_v7 = vld [vmem:[#allocation2 + $0x30] sm:$0xff] }
0x28c1   :  { %v2295_v12 = vrot.slane %v2294_v55, 1 }
0x28c3   :  { %v2296_v5 = vadd.f32 %v2295_v12, %v2294_v55  ;;  %v7368_v55 = vld [vmem:[#allocation2 + $0x28] sm:$0xff]  ;;  %v7372_v12 = vld [vmem:[#allocation2 + $0x20] sm:$0xff] }
0x28c5   :  { %v2300_v25 = vsel %vm191_vm1, %v2296_v5, %v2289_v61  ;;  %v7376_v61 = vld [vmem:[#allocation2 + $0x18] sm:$0xff]  ;;  %v7380_v5 = vld [vmem:[#allocation2 + $0x10] sm:$0xff] }
0x28c6   :  { %2301 = vrot.lane.b32.xlu0 %v2300_v25, %s6272_s27 }
0x2938   :  { %v2302_v38 = vpop.permute.xlu0 %2301 }
0x2939   :  { %v2304_v6 = vsel %vm63_vm6, %v7208_v62, %v2302_v38  ;;  %v7388_v38 = vld [vmem:[#allocation2] sm:$0xff] }
0x293a   :  { %5475 = vmatmul.mubr.msk.f32.vlgmr.msra.gmra.mxu0 %vm847_vm9, %v2304_v6 }
0x293b   :  { %5501 = vmatpush3.msra.mxu0 %v7000_v43  ;;  %5520 = vmatprep.mubr.msk.f32.mxu0 %vm6269_vm0, %v6268_v1 }
0x293c   :  { %5502 = vmatprep.subr.mxu0 %v6268_v1 }
0x293d   :  { %5503 = vmatpush3.msra.mxu0 %v7006_v44 }
0x293e   :  { %5504 = vmatprep.subr.mxu0 %v6268_v1 }
0x293f   :  { %5505 = vmatpush3.msra.mxu0 %v7010_v45 }
0x2940   :  { %5506 = vmatprep.subr.mxu0 %v6268_v1 }
0x2941   :  { %5507 = vmatpush3.msra.mxu0 %v7014_v24 }
0x2942   :  { %5508 = vmatprep.subr.mxu0 %v6268_v1 }
0x2943   :  { %5509 = vmatpush3.msra.mxu0 %v7018_v46 }
0x2944   :  { %5510 = vmatprep.subr.mxu0 %v6268_v1 }
0x2945   :  { %5511 = vmatpush3.msra.mxu0 %v7022_v47 }
0x2946   :  { %5512 = vmatprep.subr.mxu0 %v6268_v1 }
0x2947   :  { %5513 = vmatpush3.msra.mxu0 %v7026_v48 }
0x2948   :  { %5514 = vmatprep.subr.mxu0 %v6268_v1 }
0x2949   :  { %5515 = vmatpush3.msra.mxu0 %v7030_v49 }
0x294a   :  { %5516 = vmatprep.subr.mxu0 %v6268_v1 }
0x294b   :  { %5517 = vmatpush3.msra.mxu0 %v7034_v50 }
0x294c   :  { %5518 = vmatprep.subr.mxu0 %v6268_v1 }
0x294d   :  { %5519 = vmatpush3.msra.mxu0 %v7038_v51 }
0x294e   :  { %5546 = vmatprep.subr.mxu0 %v6268_v1 }
0x29fa   :  { %v2374_v62 = vpop.f32.mrf.mxu0 }
0x29fb   :  { %v2375_v39 = vadd.f32 %v7335_v52, %v2374_v62 }
0x29fc   :  { %v5476_v41 = vpop.f32.mrf.mxu0 }
0x29fd   :  { %v2378_v53 = vsel %vm921_vm10, %v2375_v39, -inf }
0x29fe   :  { %2379 = vmax.xlane.f32.xlu0 %v2378_v53 }
0x2a14   :  { %2394 = vrot.lane.b32.xlu0 %v7166_v58, %s6273_s5 }
0x2a87   :  { %v2380_v19 = vpop.xlane.xlu0 %2379 }
0x2a88   :  { %v2381_v13 = vsub.f32 %v2375_v39, %v2380_v19 }
0x2a8a   :  { %v2382_v20 = vmul.f32 1.442695, %v2381_v13 }
0x2a8b   :  { %v2395_v11 = vpop.permute.xlu0 %2394 }
0x2a8c   :  { %5981 = vpow2.f32 %v2382_v20 }
0x2a99   :  { %v5982_v14 = vpop.eup %5981 }
0x2a9a   :  { %v2384_v16 = vsel %vm921_vm10, %v5982_v14, 0.0 }
0x2a9b   :  { %2385 = vadd.xlane.f32.xlu1 %v2384_v16 }
0x2aac   :  { %2390 = vrot.lane.b32.xlu1 %v2300_v25, %s6270_s23  ;;  %v7384_v25 = vld [vmem:[#allocation2 + $0x8] sm:$0xff] }
0x2b24   :  { %v2386_v3 = vpop.xlane.xlu1 %2385 }
0x2b25   :  { %5983 = vlog2.f32 %v2386_v3 }
0x2b28   :  { %v2391_v8 = vpop.permute.xlu1 %2390 }
0x2b32   :  { %v5984_v29 = vpop.eup %5983 }
0x2b33   :  { %v2388_v28 = vmul.f32 0.6931472, %v5984_v29 }
0x2b35   :  { %v2389_v59 = vsub.f32 %v2381_v13, %v2388_v28 }
0x2b37   :  { %4576 = vst.msk [vmem:[#allocation5 + $0x4] sm:$0x3] %vm921_vm10, %v2389_v59  ;;  %v7345_v58 = vsel %vm196_vm3, %v2389_v59, %v2391_v8 }
0x2b38   :  { %v2397_v34 = vsel %vm198_vm4, %v7345_v58, %v2395_v11 }
0x2b39   :  { %5498 = vmatmul.mubr.msk.f32.vlgmr.msra.gmra.mxu1 %vm200_vm5, %v2397_v34 }
0x2b3a   :  { %5524 = vmatpush3.msra.mxu1 %v7350_v56  ;;  %5543 = vmatprep.mubr.msk.f32.mxu1 %vm6269_vm0, %v6268_v1 }
0x2b3b   :  { %5525 = vmatprep.subr.mxu1 %v6268_v1 }
0x2b3c   :  { %5526 = vmatpush3.msra.mxu1 %v7356_v17 }
0x2b3d   :  { %5527 = vmatprep.subr.mxu1 %v6268_v1 }
0x2b3e   :  { %5528 = vmatpush3.msra.mxu1 %v7360_v23 }
0x2b3f   :  { %5529 = vmatprep.subr.mxu1 %v6268_v1 }
0x2b40   :  { %5530 = vmatpush3.msra.mxu1 %v7364_v7 }
0x2b41   :  { %5531 = vmatprep.subr.mxu1 %v6268_v1 }
0x2b42   :  { %5532 = vmatpush3.msra.mxu1 %v7368_v55 }
0x2b43   :  { %5533 = vmatprep.subr.mxu1 %v6268_v1 }
0x2b44   :  { %5534 = vmatpush3.msra.mxu1 %v7372_v12 }
0x2b45   :  { %5535 = vmatprep.subr.mxu1 %v6268_v1 }
0x2b46   :  { %5536 = vmatpush3.msra.mxu1 %v7376_v61 }
0x2b47   :  { %5537 = vmatprep.subr.mxu1 %v6268_v1 }
0x2b48   :  { %5538 = vmatpush3.msra.mxu1 %v7380_v5 }
0x2b49   :  { %5539 = vmatprep.subr.mxu1 %v6268_v1 }
0x2b4a   :  { %5540 = vmatpush3.msra.mxu1 %v7384_v25 }
0x2b4b   :  { %5541 = vmatprep.subr.mxu1 %v6268_v1 }
0x2b4c   :  { %5542 = vmatpush3.msra.mxu1 %v7388_v38 }
0x2b4d   :  { %5569 = vmatprep.subr.mxu1 %v6268_v1 }
0x2bf9   :  { %v2467_v6 = vpop.f32.mrf.mxu1 }
0x2bfa   :  { %v2468_v62 = vadd.f32 %v7077_v10, %v2467_v6 }
0x2bfb   :  { %v5499_v39 = vpop.f32.mrf.mxu1 }
0x2bfc   :  { %5985 = vtanh.f32 %v2468_v62  ;;  %v4717_v53 = vmul.f32 -1.442695, %v2468_v62 }
0x2bfe   :  { %5987 = vpow2.f32 %v4717_v53 }
0x2c09   :  { %v5986_v41 = vpop.eup %5985 }
0x2c0a   :  { %2480 = vrot.lane.b32.xlu1 %v5986_v41, %s6271_s26 }
0x2c0b   :  { %v5988_v19 = vpop.eup %5987 }
0x2c0c   :  { %v2474_v13 = vadd.f32 1.0, %v5988_v19 }
0x2c0e   :  { %5989 = vrcp.f32 %v2474_v13 }
0x2c1b   :  { %v5990_v20 = vpop.eup %5989 }
0x2c1c   :  { %v2478_v3 = vmul.f32 %v5990_v20, %v7160_v37 }
0x2c7c   :  { %v2481_v14 = vpop.permute.xlu1 %2480 }
0x2c7d   :  { %v2483_v16 = vmul.f32 %v5990_v20, %v2481_v14 }
0x2c7f   :  { %2485 = vrot.lane.b32.xlu1 %v2483_v16, %s6272_s27 }
0x2cf1   :  { %v2486_v29 = vpop.permute.xlu1 %2485 }
0x2cf2   :  { %v7396_v28 = vadd.f32 %v2486_v29, %v2478_v3 }
0x2cf4   :  { %5991 = vtanh.f32 %v7396_v28 }
0x2d01   :  { %v5992_v59 = vpop.eup %5991 }
0x2d02   :  { %2491 = vrot.lane.b32.xlu1 %v5992_v59, %s6271_s26 }
0x2d74   :  { %v2492_v8 = vpop.permute.xlu1 %2491 }
0x2d75   :  { %v2494_v11 = vmul.f32 %v5990_v20, %v2492_v8 }
0x2d77   :  { %v2601_v34 = vrot.slane %v2494_v11, 7  ;;  %2496 = vrot.lane.b32.xlu1 %v2494_v11, %s6272_s27 }
0x2d79   :  { %2602 = vrot.lane.b32.xlu0 %v2601_v34, %s6273_s5 }
0x2d7d   :  { %2499 = vrot.lane.b32.xlu0 %v7203_v18, %s6273_s5 }
0x2de9   :  { %v2497_v37 = vpop.permute.xlu1 %2496 }
0x2dea   :  { %v2502_v41 = vsel %vm63_vm6, %v2497_v37, 0.0 }
0x2deb   :  { %v2603_v6 = vpop.permute.xlu0 %2602 }
0x2dec   :  { %v2605_v62 = vsel %vm198_vm4, %v7345_v58, %v2603_v6 }
0x2ded   :  { %v2607_v39 = vrot.slane %v2605_v62, 1 }
0x2def   :  { %5544 = vmatmul.mubr.msk.f32.vlgmr.msra.gmra.mxu1 %vm200_vm5, %v2607_v39  ;;  %v2500_v53 = vpop.permute.xlu0 %2499 }
0x2df0   :  { %v2503_v19 = vsel %vm198_vm4, %v2502_v41, %v2500_v53  ;;  %5570 = vmatpush3.msra.mxu1 %v7098_v0  ;;  %5577 = vmatprep.mubr.msk.f32.mxu1 %vm6269_vm0, %v6268_v1 }
0x2df1   :  { %5521 = vmatmul.mubr.msk.f32.vlgmr.msra.gmra.mxu0 %vm200_vm5, %v2503_v19  ;;  %5571 = vmatprep.subr.mxu1 %v6268_v1 }
0x2df2   :  { %5547 = vmatpush3.msra.mxu0 %v7000_v43  ;;  %5566 = vmatprep.mubr.msk.f32.mxu0 %vm6269_vm0, %v6268_v1 }
0x2df3   :  { %5548 = vmatprep.subr.mxu0 %v6268_v1  ;;  %5572 = vmatpush3.msra.mxu1 %v7112_v33 }
0x2df4   :  { %5549 = vmatpush3.msra.mxu0 %v7006_v44  ;;  %5573 = vmatprep.subr.mxu1 %v6268_v1 }
0x2df5   :  { %5550 = vmatprep.subr.mxu0 %v6268_v1  ;;  %5574 = vmatpush3.msra.mxu1 %v7121_v40 }
0x2df6   :  { %5551 = vmatpush3.msra.mxu0 %v7010_v45  ;;  %5575 = vmatprep.subr.mxu1 %v6268_v1 }
0x2df7   :  { %5552 = vmatprep.subr.mxu0 %v6268_v1  ;;  %5576 = vmatpush3.msra.mxu1 %v7130_v27 }
0x2df8   :  { %5553 = vmatpush3.msra.mxu0 %v7014_v24  ;;  %5580 = vmatprep.subr.mxu1 %v6268_v1 }
0x2df9   :  { %5554 = vmatprep.subr.mxu0 %v6268_v1 }
0x2dfa   :  { %5555 = vmatpush3.msra.mxu0 %v7018_v46 }
0x2dfb   :  { %5556 = vmatprep.subr.mxu0 %v6268_v1 }
0x2dfc   :  { %5557 = vmatpush3.msra.mxu0 %v7022_v47 }
0x2dfd   :  { %5558 = vmatprep.subr.mxu0 %v6268_v1 }
0x2dfe   :  { %5559 = vmatpush3.msra.mxu0 %v7026_v48 }
0x2dff   :  { %5560 = vmatprep.subr.mxu0 %v6268_v1 }
0x2e00   :  { %5561 = vmatpush3.msra.mxu0 %v7030_v49 }
0x2e01   :  { %5562 = vmatprep.subr.mxu0 %v6268_v1 }
0x2e02   :  { %5563 = vmatpush3.msra.mxu0 %v7034_v50 }
0x2e03   :  { %5564 = vmatprep.subr.mxu0 %v6268_v1 }
0x2e04   :  { %5565 = vmatpush3.msra.mxu0 %v7038_v51 }
0x2e05   :  { %5599 = vmatprep.subr.mxu0 %v6268_v1 }
0x2eaf   :  { %v2676_v43 = vpop.f32.mrf.mxu1 }
0x2eb0   :  { %v2677_v44 = vadd.f32 %v7077_v10, %v2676_v43 }
0x2eb1   :  { %v2573_v45 = vpop.f32.mrf.mxu0  ;;  %v5545_v24 = vpop.f32.mrf.mxu1 }
0x2eb2   :  { %5993 = vtanh.f32 %v2677_v44  ;;  %v2574_v46 = vadd.f32 %v7152_v35, %v2573_v45  ;;  %v4721_v50 = vmul.f32 -1.442695, %v2677_v44 }
0x2eb3   :  { %v5522_v47 = vpop.f32.mrf.mxu0 }
0x2eb4   :  { %5995 = vtanh.f32 %v2574_v46  ;;  %v4719_v51 = vmul.f32 -1.442695, %v2574_v46 }
0x2eb5   :  { %5997 = vpow2.f32 %v4721_v50 }
0x2eb6   :  { %5999 = vpow2.f32 %v4719_v51 }
0x2ebf   :  { %v5994_v48 = vpop.eup %5993 }
0x2ec0   :  { %2689 = vrot.lane.b32.xlu1 %v5994_v48, %s6271_s26 }
0x2ec1   :  { %v5996_v49 = vpop.eup %5995 }
0x2ec2   :  { %2586 = vrot.lane.b32.xlu0 %v5996_v49, %s6271_s26  ;;  %v5998_v0 = vpop.eup %5997 }
0x2ec3   :  { %v6000_v33 = vpop.eup %5999  ;;  %v2683_v10 = vadd.f32 1.0, %v5998_v0 }
0x2ec4   :  { %v2580_v40 = vadd.f32 1.0, %v6000_v33 }
0x2ec5   :  { %6001 = vrcp.f32 %v2683_v10 }
0x2ec6   :  { %6003 = vrcp.f32 %v2580_v40 }
0x2ed2   :  { %v6002_v27 = vpop.eup %6001 }
0x2ed3   :  { %v6004_v13 = vpop.eup %6003  ;;  %v2687_v16 = vmul.f32 %v6002_v27, %v7396_v28 }
0x2ed4   :  { %v2584_v59 = vmul.f32 %v6004_v13, %v7199_v15 }
0x2f32   :  { %v2690_v18 = vpop.permute.xlu1 %2689 }
0x2f33   :  { %v2692_v58 = vmul.f32 %v6002_v27, %v2690_v18 }
0x2f34   :  { %v2587_v20 = vpop.permute.xlu0 %2586 }
0x2f35   :  { %2694 = vrot.lane.b32.xlu1 %v2692_v58, %s6272_s27  ;;  %v2589_v14 = vmul.f32 %v6004_v13, %v2587_v20 }
0x2f37   :  { %2591 = vrot.lane.b32.xlu0 %v2589_v14, %s6272_s27 }
0x2fa7   :  { %v2695_v3 = vpop.permute.xlu1 %2694 }
0x2fa8   :  { %v7449_v29 = vadd.f32 %v2695_v3, %v2687_v16 }
0x2fa9   :  { %v2592_v8 = vpop.permute.xlu0 %2591 }
0x2faa   :  { %6005 = vtanh.f32 %v7449_v29  ;;  %v2594_v11 = vadd.f32 %v2592_v8, %v2584_v59 }
0x2fac   :  { %6007 = vtanh.f32 %v2594_v11 }
0x2fb7   :  { %v6006_v34 = vpop.eup %6005 }
0x2fb8   :  { %2700 = vrot.lane.b32.xlu1 %v6006_v34, %s6271_s26 }
0x2fb9   :  { %v6008_v6 = vpop.eup %6007 }
0x2fba   :  { %2597 = vrot.lane.b32.xlu0 %v6008_v6, %s6271_s26 }
0x302a   :  { %v2701_v37 = vpop.permute.xlu1 %2700 }
0x302b   :  { %v7455_v62 = vmul.f32 %v6002_v27, %v2701_v37 }
0x302c   :  { %v2598_v28 = vpop.permute.xlu0 %2597 }
0x302d   :  { %2705 = vrot.lane.b32.xlu1 %v7455_v62, %s6272_s27  ;;  %v2600_v39 = vmul.f32 %v6004_v13, %v2598_v28 }
0x302f   :  { %2709 = vrot.lane.b32.xlu0 %v2600_v39, %s6273_s5 }
0x309f   :  { %v2706_v15 = vpop.permute.xlu1 %2705 }
0x30a0   :  { %v2712_v41 = vsel %vm63_vm6, %v2706_v15, 0.0 }
0x30a1   :  { %v2710_v53 = vpop.permute.xlu0 %2709 }
0x30a2   :  { %v2713_v19 = vsel %vm198_vm4, %v2712_v41, %v2710_v53 }
0x30a3   :  { %5567 = vmatmul.mubr.msk.f32.vlgmr.msra.gmra.mxu0 %vm200_vm5, %v2713_v19 }
0x30a4   :  { %5600 = vmatpush3.msra.mxu0 %v7350_v56  ;;  %5619 = vmatprep.mubr.msk.f32.mxu0 %vm6269_vm0, %v6268_v1 }
0x30a5   :  { %5601 = vmatprep.subr.mxu0 %v6268_v1 }
0x30a6   :  { %5602 = vmatpush3.msra.mxu0 %v7356_v17 }
0x30a7   :  { %5603 = vmatprep.subr.mxu0 %v6268_v1 }
0x30a8   :  { %5604 = vmatpush3.msra.mxu0 %v7360_v23 }
0x30a9   :  { %5605 = vmatprep.subr.mxu0 %v6268_v1 }
0x30aa   :  { %5606 = vmatpush3.msra.mxu0 %v7364_v7 }
0x30ab   :  { %5607 = vmatprep.subr.mxu0 %v6268_v1 }
0x30ac   :  { %5608 = vmatpush3.msra.mxu0 %v7368_v55 }
0x30ad   :  { %5609 = vmatprep.subr.mxu0 %v6268_v1 }
0x30ae   :  { %5610 = vmatpush3.msra.mxu0 %v7372_v12 }
0x30af   :  { %5611 = vmatprep.subr.mxu0 %v6268_v1 }
0x30b0   :  { %5612 = vmatpush3.msra.mxu0 %v7376_v61 }
0x30b1   :  { %5613 = vmatprep.subr.mxu0 %v6268_v1 }
0x30b2   :  { %5614 = vmatpush3.msra.mxu0 %v7380_v5 }
0x30b3   :  { %5615 = vmatprep.subr.mxu0 %v6268_v1 }
0x30b4   :  { %5616 = vmatpush3.msra.mxu0 %v7384_v25 }
0x30b5   :  { %5617 = vmatprep.subr.mxu0 %v6268_v1 }
0x30b6   :  { %5618 = vmatpush3.msra.mxu0 %v7388_v38 }
0x30b7   :  { %5645 = vmatprep.subr.mxu0 %v6268_v1 }
0x3163   :  { %v2783_v43 = vpop.f32.mrf.mxu0 }
0x3164   :  { %v2784_v44 = vadd.f32 %v7152_v35, %v2783_v43 }
0x3165   :  { %v5568_v45 = vpop.f32.mrf.mxu0 }
0x3166   :  { %6009 = vtanh.f32 %v2784_v44  ;;  %v4723_v46 = vmul.f32 -1.442695, %v2784_v44 }
0x3168   :  { %6011 = vpow2.f32 %v4723_v46 }
0x3173   :  { %v6010_v24 = vpop.eup %6009 }
0x3174   :  { %2796 = vrot.lane.b32.xlu1 %v6010_v24, %s6271_s26 }
0x3175   :  { %v6012_v47 = vpop.eup %6011 }
0x3176   :  { %v2790_v48 = vadd.f32 1.0, %v6012_v47 }
0x3178   :  { %6013 = vrcp.f32 %v2790_v48 }
0x3185   :  { %v6014_v49 = vpop.eup %6013 }
0x3186   :  { %v2794_v0 = vmul.f32 %v6014_v49, %v2594_v11 }
0x31e6   :  { %v2797_v50 = vpop.permute.xlu1 %2796 }
0x31e7   :  { %v2799_v51 = vmul.f32 %v6014_v49, %v2797_v50 }
0x31e9   :  { %2801 = vrot.lane.b32.xlu0 %v2799_v51, %s6272_s27 }
0x325b   :  { %v2802_v33 = vpop.permute.xlu0 %2801 }
0x325c   :  { %v7488_v10 = vadd.f32 %v2802_v33, %v2794_v0 }
0x325e   :  { %6015 = vtanh.f32 %v7488_v10 }
0x326b   :  { %v6016_v35 = vpop.eup %6015 }
0x326c   :  { %2807 = vrot.lane.b32.xlu1 %v6016_v35, %s6271_s26 }
0x32de   :  { %v2808_v40 = vpop.permute.xlu1 %2807 }
0x32df   :  { %v7492_v27 = vmul.f32 %v6014_v49, %v2808_v40 }
0x32e1   :  { %v2812_v18 = vrot.slane %v7492_v27, 7 }
0x32e3   :  { %v2814_v58 = vsel %vm614_vm7, %v2600_v39, %v2812_v18 }
0x32e4   :  { %2816 = vrot.lane.b32.xlu0 %v2814_v58, %s6272_s27 }
0x3356   :  { %v7497_v13 = vpop.permute.xlu0 %2816 }
0x3357   :  { %5578 = vmatmul.mubr.msk.f32.vlgmr.msra.gmra.mxu1 %vm63_vm6, %v7497_v13 }
0x3358   :  { %5581 = vmatpush3.msra.mxu1 %v7215_v42  ;;  %5596 = vmatprep.mubr.msk.f32.mxu1 %vm6269_vm0, %v6268_v1 }
0x3359   :  { %5582 = vmatprep.subr.mxu1 %v6268_v1 }
0x335a   :  { %5583 = vmatpush3.msra.mxu1 %v7224_v30 }
0x335b   :  { %5584 = vmatprep.subr.mxu1 %v6268_v1 }
0x335c   :  { %5585 = vmatpush3.msra.mxu1 %v7231_v31 }
0x335d   :  { %5586 = vmatprep.subr.mxu1 %v6268_v1 }
0x335e   :  { %5587 = vmatpush3.msra.mxu1 %v7238_v63 }
0x335f   :  { %5588 = vmatprep.subr.mxu1 %v6268_v1 }
0x3360   :  { %5589 = vmatpush3.msra.mxu1 %v7245_v32 }
0x3361   :  { %5590 = vmatprep.subr.mxu1 %v6268_v1 }
0x3362   :  { %5591 = vmatpush3.msra.mxu1 %v7252_v9 }
0x3363   :  { %5592 = vmatprep.subr.mxu1 %v6268_v1 }
0x3364   :  { %5593 = vmatpush3.msra.mxu1 %v7259_v21 }
0x3365   :  { %5594 = vmatprep.subr.mxu1 %v6268_v1 }
0x3366   :  { %5595 = vmatpush3.msra.mxu1 %v7266_v54 }
0x3367   :  { %5622 = vmatprep.subr.mxu1 %v6268_v1 }
0x3417   :  { %v2886_v42 = vpop.f32.mrf.mxu1 }
0x3418   :  { %v2887_v30 = vadd.f32 %v7273_v60, %v2886_v42 }
0x3419   :  { %v5579_v31 = vpop.f32.mrf.mxu1 }
0x341a   :  { %v2890_v63 = vmax.f32 %v2887_v30, 0.0  ;;  %v7544_v30 = vld [vmem:[%s8070_s0] sm:$0xff] }
0x341c   :  { %v2898_v32 = vrot.slane %v2890_v63, %v6634_v57 }
0x341e   :  { %v2899_v20 = vcombine.high %v2898_v32, %v2898_v32  ;;  %v2906_v9 = vrot.slane %v2898_v32, %v6634_v57 }
0x3420   :  { %v2913_v14 = vrot.slane %v2899_v20, %v6634_v57  ;;  %v2917_v21 = vrot.slane %v2906_v9, %v6641_v2 }
0x3422   :  { %v2924_v16 = vmul.f32 %v2917_v21, %v6647_v22  ;;  %v2921_v54 = vrot.slane %v2913_v14, %v6641_v2  ;;  %v7552_v14 = vld [vmem:[%s8070_s0 + $0x8] sm:$0xff] }
0x3424   :  { %v2926_v3 = vsel %vm63_vm6, %v2924_v16, 0.0  ;;  %v2925_v59 = vmul.f32 %v2921_v54, %v6651_v26 }
0x3425   :  { %2927 = vadd.xlane.f32.xlu1 %v2926_v3 }
0x3426   :  { %v2929_v60 = vsel %vm63_vm6, %v2925_v59, 0.0 }
0x3427   :  { %2930 = vadd.xlane.f32.xlu0 %v2929_v60 }
0x34ae   :  { %v2928_v8 = vpop.xlane.xlu1 %2927 }
0x34af   :  { %v2937_v34 = vrot.slane %v2928_v8, %v6343_v4 }
0x34b0   :  { %v2931_v11 = vpop.xlane.xlu0 %2930 }
0x34b1   :  { %v2941_v6 = vrot.slane %v2931_v11, %v6343_v4 }
0x34b3   :  { %v2942_v37 = vsel %vm191_vm1, %v2941_v6, %v2937_v34 }
0x34b4   :  { %v2944_v28 = vsel %vm751_vm8, %v2942_v37, -inf }
0x34b5   :  { %2945 = vmax.xlane.f32.xlu0 %v2944_v28 }
0x353e   :  { %v2946_v39 = vpop.xlane.xlu0 %2945 }
0x353f   :  { %v2951_v15 = vrot.slane %v2946_v39, %v6641_v2  ;;  %v2955_v41 = vrot.slane %v2946_v39, %v6663_v36 }
0x3541   :  { %v2958_v53 = vsub.f32 %v2928_v8, %v2951_v15  ;;  %v2959_v19 = vsub.f32 %v2931_v11, %v2955_v41 }
0x3543   :  { %v2960_v43 = vmul.f32 1.442695, %v2958_v53  ;;  %v2962_v44 = vmul.f32 1.442695, %v2959_v19 }
0x3545   :  { %6017 = vpow2.f32 %v2960_v43 }
0x3546   :  { %6019 = vpow2.f32 %v2962_v44  ;;  %v7564_v44 = vld [vmem:[#allocation2 + $0x98] sm:$0xff] }
0x3552   :  { %v6018_v45 = vpop.eup %6017 }
0x3553   :  { %v6020_v24 = vpop.eup %6019  ;;  %2967 = vperm.xlu1 %5858, %v6018_v45  }
0x3554   :  { %2970 = vperm.xlu0 %5857, %v6020_v24  }
0x35ce   :  { %v2968_v46 = vpop.permute.xlu1 %2967 }
0x35cf   :  { %v2971_v47 = vpop.permute.xlu0 %2970  ;;  %v2975_v48 = vrot.slane %v2968_v46, %v6343_v4  ;;  %v7582_v46 = vld [vmem:[#allocation2 + $0x78] sm:$0xff] }
0x35d0   :  { %v2979_v49 = vrot.slane %v2971_v47, %v6343_v4  ;;  %v7586_v47 = vld [vmem:[#allocation2 + $0x70] sm:$0xff] }
0x35d2   :  { %v2980_v50 = vsel %vm191_vm1, %v2979_v49, %v2975_v48  ;;  %v7590_v48 = vld [vmem:[#allocation2 + $0x68] sm:$0xff]  ;;  %v7594_v49 = vld [vmem:[#allocation2 + $0x60] sm:$0xff] }
0x35d3   :  { %v2982_v51 = vsel %vm751_vm8, %v2980_v50, 0.0  ;;  %v7598_v50 = vld [vmem:[#allocation2 + $0x58] sm:$0xff] }
0x35d4   :  { %2983 = vadd.xlane.f32.xlu1 %v2982_v51  ;;  %v7602_v51 = vld [vmem:[#allocation2 + $0x50] sm:$0xff] }
0x365d   :  { %v2984_v0 = vpop.xlane.xlu1 %2983 }
0x365e   :  { %6021 = vrcp.f32 %v2984_v0 }
0x366b   :  { %v6022_v33 = vpop.eup %6021 }
0x366c   :  { %v2990_v35 = vrot.slane %v6022_v33, %v6641_v2  ;;  %v2994_v18 = vrot.slane %v6022_v33, %v6663_v36 }
0x366e   :  { %v2997_v40 = vmul.f32 %v6018_v45, %v2990_v35  ;;  %v2998_v58 = vmul.f32 %v6020_v24, %v2994_v18  ;;  %v7570_v45 = vld [vmem:[#allocation2 + $0x90] sm:$0xff]  ;;  %v7574_v24 = vld [vmem:[#allocation2 + $0x88] sm:$0xff] }
0x3670   :  { %3001 = vperm.xlu0 %5857, %v2997_v40  }
0x3674   :  { %3006 = vperm.xlu0 %5857, %v2998_v58  }
0x36eb   :  { %v3002_v42 = vpop.permute.xlu0 %3001 }
0x36ec   :  { %v3009_v31 = vmul.f32 %v7544_v30, %v3002_v42  ;;  %v4607_v9 = vrot.slane %v3002_v42, %v6343_v4 }
0x36ee   :  { %v3011_v63 = vsel %vm63_vm6, %v3009_v31, 0.0 }
0x36ef   :  { %v3012_v32 = vrot.slane %v3011_v63, 4  ;;  %v3007_v20 = vpop.permute.xlu0 %3006 }
0x36f0   :  { %v3010_v21 = vmul.f32 %v7552_v14, %v3007_v20  ;;  %v4611_v16 = vrot.slane %v3007_v20, %v6343_v4 }
0x36f1   :  { %v3013_v54 = vadd.f32 %v3012_v32, %v3011_v63 }
0x36f2   :  { %v3018_v3 = vsel %vm63_vm6, %v3010_v21, 0.0  ;;  %v4631_v59 = vsel %vm191_vm1, %v4611_v16, %v4607_v9 }
0x36f3   :  { %v3014_v60 = vrot.slane %v3013_v54, 2  ;;  %v3019_v8 = vrot.slane %v3018_v3, 4  ;;  %4643 = vst.msk [vmem:[#allocation6 + $0x6] sm:$0x3] %vm751_vm8, %v4631_v59  ;;  %v7641_v59 = vld [vmem:[%s8072_s2] sm:$0x1] }
0x36f5   :  { %v3015_v11 = vadd.f32 %v3014_v60, %v3013_v54  ;;  %v3020_v34 = vadd.f32 %v3019_v8, %v3018_v3 }
0x36f7   :  { %v3021_v6 = vrot.slane %v3020_v34, 2  ;;  %v3016_v37 = vrot.slane %v3015_v11, 1 }
0x36f9   :  { %v3022_v28 = vadd.f32 %v3021_v6, %v3020_v34  ;;  %v3017_v15 = vadd.f32 %v3016_v37, %v3015_v11 }
0x36fb   :  { %v3023_v39 = vrot.slane %v3022_v28, 1 }
0x36fd   :  { %v3024_v41 = vadd.f32 %v3023_v39, %v3022_v28 }
0x36ff   :  { %v3028_v53 = vsel %vm191_vm1, %v3024_v41, %v3017_v15 }
0x3700   :  { %3029 = vrot.lane.b32.xlu0 %v3028_v53, %s6272_s27 }
0x3772   :  { %v3030_v19 = vpop.permute.xlu0 %3029 }
0x3773   :  { %v3032_v43 = vsel %vm63_vm6, %v7497_v13, %v3030_v19  ;;  %v7578_v13 = vld [vmem:[#allocation2 + $0x80] sm:$0xff] }
0x3774   :  { %5597 = vmatmul.mubr.msk.f32.vlgmr.msra.gmra.mxu1 %vm847_vm9, %v3032_v43 }
0x3775   :  { %5623 = vmatpush3.msra.mxu1 %v7564_v44  ;;  %5642 = vmatprep.mubr.msk.f32.mxu1 %vm6269_vm0, %v6268_v1 }
0x3776   :  { %5624 = vmatprep.subr.mxu1 %v6268_v1 }
0x3777   :  { %5625 = vmatpush3.msra.mxu1 %v7570_v45 }
0x3778   :  { %5626 = vmatprep.subr.mxu1 %v6268_v1 }
0x3779   :  { %5627 = vmatpush3.msra.mxu1 %v7574_v24 }
0x377a   :  { %5628 = vmatprep.subr.mxu1 %v6268_v1 }
0x377b   :  { %5629 = vmatpush3.msra.mxu1 %v7578_v13 }
0x377c   :  { %5630 = vmatprep.subr.mxu1 %v6268_v1 }
0x377d   :  { %5631 = vmatpush3.msra.mxu1 %v7582_v46 }
0x377e   :  { %5632 = vmatprep.subr.mxu1 %v6268_v1 }
0x377f   :  { %5633 = vmatpush3.msra.mxu1 %v7586_v47 }
0x3780   :  { %5634 = vmatprep.subr.mxu1 %v6268_v1 }
0x3781   :  { %5635 = vmatpush3.msra.mxu1 %v7590_v48 }
0x3782   :  { %5636 = vmatprep.subr.mxu1 %v6268_v1 }
0x3783   :  { %5637 = vmatpush3.msra.mxu1 %v7594_v49 }
0x3784   :  { %5638 = vmatprep.subr.mxu1 %v6268_v1 }
0x3785   :  { %5639 = vmatpush3.msra.mxu1 %v7598_v50 }
0x3786   :  { %5640 = vmatprep.subr.mxu1 %v6268_v1 }
0x3787   :  { %5641 = vmatpush3.msra.mxu1 %v7602_v51 }
0x3788   :  { %5668 = vmatprep.subr.mxu1 %v6268_v1 }
0x3834   :  { %v3102_v0 = vpop.f32.mrf.mxu1 }
0x3835   :  { %v3103_v33 = vadd.f32 %v7335_v52, %v3102_v0 }
0x3836   :  { %v5598_v35 = vpop.f32.mrf.mxu1 }
0x3837   :  { %v3106_v40 = vsel %vm921_vm10, %v3103_v33, -inf }
0x3838   :  { %3107 = vmax.xlane.f32.xlu0 %v3106_v40 }
0x384e   :  { %3122 = vrot.lane.b32.xlu0 %v7455_v62, %s6273_s5 }
0x38c1   :  { %v3108_v18 = vpop.xlane.xlu0 %3107 }
0x38c2   :  { %v3109_v58 = vsub.f32 %v3103_v33, %v3108_v18 }
0x38c4   :  { %v3110_v42 = vmul.f32 1.442695, %v3109_v58 }
0x38c5   :  { %v3123_v16 = vpop.permute.xlu0 %3122 }
0x38c6   :  { %6023 = vpow2.f32 %v3110_v42 }
0x38d3   :  { %v6024_v31 = vpop.eup %6023 }
0x38d4   :  { %v3112_v63 = vsel %vm921_vm10, %v6024_v31, 0.0 }
0x38d5   :  { %3113 = vadd.xlane.f32.xlu1 %v3112_v63 }
0x38e6   :  { %3118 = vrot.lane.b32.xlu1 %v3028_v53, %s6270_s23 }
0x395e   :  { %v3114_v32 = vpop.xlane.xlu1 %3113 }
0x395f   :  { %6025 = vlog2.f32 %v3114_v32  ;;  %v7662_v32 = vld [vmem:[%s8073_s3 + $0x18] sm:$0xff] }
0x3962   :  { %v3119_v21 = vpop.permute.xlu1 %3118 }
0x396c   :  { %v6026_v52 = vpop.eup %6025 }
0x396d   :  { %v3116_v20 = vmul.f32 0.6931472, %v6026_v52  ;;  %v7685_v52 = vld [vmem:[%s8073_s3 + $0x8] sm:$0xff] }
0x396f   :  { %v3117_v9 = vsub.f32 %v3109_v58, %v3116_v20  ;;  %v7694_v20 = vld [vmem:[%s8073_s3] sm:$0xff] }
0x3971   :  { %4577 = vst.msk [vmem:[#allocation5 + $0x6] sm:$0x3] %vm921_vm10, %v3117_v9  ;;  %v3121_v62 = vsel %vm196_vm3, %v3117_v9, %v3119_v21 }
0x3972   :  { %v3125_v54 = vsel %vm198_vm4, %v3121_v62, %v3123_v16 }
0x3973   :  { %5620 = vmatmul.mubr.msk.f32.vlgmr.msra.gmra.mxu0 %vm200_vm5, %v3125_v54  ;;  %v7716_v54 = vld [vmem:[%s8072_s2 + $0x1] sm:$0x1] }
0x3974   :  { %5646 = vmatpush3.msra.mxu0 %v7350_v56  ;;  %5665 = vmatprep.mubr.msk.f32.mxu0 %vm6269_vm0, %v6268_v1 }
0x3975   :  { %5647 = vmatprep.subr.mxu0 %v6268_v1 }
0x3976   :  { %5648 = vmatpush3.msra.mxu0 %v7356_v17 }
0x3977   :  { %5649 = vmatprep.subr.mxu0 %v6268_v1 }
0x3978   :  { %5650 = vmatpush3.msra.mxu0 %v7360_v23 }
0x3979   :  { %5651 = vmatprep.subr.mxu0 %v6268_v1 }
0x397a   :  { %5652 = vmatpush3.msra.mxu0 %v7364_v7 }
0x397b   :  { %5653 = vmatprep.subr.mxu0 %v6268_v1 }
0x397c   :  { %5654 = vmatpush3.msra.mxu0 %v7368_v55 }
0x397d   :  { %5655 = vmatprep.subr.mxu0 %v6268_v1 }
0x397e   :  { %5656 = vmatpush3.msra.mxu0 %v7372_v12 }
0x397f   :  { %5657 = vmatprep.subr.mxu0 %v6268_v1 }
0x3980   :  { %5658 = vmatpush3.msra.mxu0 %v7376_v61 }
0x3981   :  { %5659 = vmatprep.subr.mxu0 %v6268_v1 }
0x3982   :  { %5660 = vmatpush3.msra.mxu0 %v7380_v5 }
0x3983   :  { %5661 = vmatprep.subr.mxu0 %v6268_v1 }
0x3984   :  { %5662 = vmatpush3.msra.mxu0 %v7384_v25 }
0x3985   :  { %5663 = vmatprep.subr.mxu0 %v6268_v1 }
0x3986   :  { %5664 = vmatpush3.msra.mxu0 %v7388_v38 }
0x3987   :  { %5691 = vmatprep.subr.mxu0 %v6268_v1 }
0x3a33   :  { %v3195_v3 = vpop.f32.mrf.mxu0 }
0x3a34   :  { %v3196_v60 = vadd.f32 %v7641_v59, %v3195_v3 }
0x3a35   :  { %v5621_v8 = vpop.f32.mrf.mxu0 }
0x3a36   :  { %6027 = vtanh.f32 %v3196_v60  ;;  %v4727_v34 = vmul.f32 -1.442695, %v3196_v60 }
0x3a38   :  { %6029 = vpow2.f32 %v4727_v34 }
0x3a43   :  { %v6028_v11 = vpop.eup %6027 }
0x3a44   :  { %3208 = vrot.lane.b32.xlu1 %v6028_v11, %s6271_s26 }
0x3a45   :  { %v6030_v6 = vpop.eup %6029 }
0x3a46   :  { %v3202_v37 = vadd.f32 1.0, %v6030_v6 }
0x3a48   :  { %6031 = vrcp.f32 %v3202_v37 }
0x3a55   :  { %v6032_v28 = vpop.eup %6031 }
0x3a56   :  { %v3206_v41 = vmul.f32 %v6032_v28, %v7449_v29 }
0x3ab6   :  { %v3209_v39 = vpop.permute.xlu1 %3208 }
0x3ab7   :  { %v3211_v15 = vmul.f32 %v6032_v28, %v3209_v39 }
0x3ab9   :  { %3213 = vrot.lane.b32.xlu1 %v3211_v15, %s6272_s27 }
0x3b2b   :  { %v3214_v53 = vpop.permute.xlu1 %3213 }
0x3b2c   :  { %v7647_v19 = vadd.f32 %v3214_v53, %v3206_v41 }
0x3b2e   :  { %6033 = vtanh.f32 %v7647_v19 }
0x3b3b   :  { %v6034_v43 = vpop.eup %6033 }
0x3b3c   :  { %3219 = vrot.lane.b32.xlu1 %v6034_v43, %s6271_s26 }
0x3bae   :  { %v3220_v0 = vpop.permute.xlu1 %3219 }
0x3baf   :  { %v3222_v33 = vmul.f32 %v6032_v28, %v3220_v0 }
0x3bb1   :  { %v3329_v35 = vrot.slane %v3222_v33, 7  ;;  %3224 = vrot.lane.b32.xlu0 %v3222_v33, %s6272_s27 }
0x3bb3   :  { %3330 = vrot.lane.b32.xlu1 %v3329_v35, %s6273_s5 }
0x3bb7   :  { %3227 = vrot.lane.b32.xlu1 %v7492_v27, %s6273_s5  ;;  %v7676_v27 = vld [vmem:[%s8073_s3 + $0x10] sm:$0xff] }
0x3c23   :  { %v3225_v29 = vpop.permute.xlu0 %3224 }
0x3c24   :  { %v3230_v42 = vsel %vm63_vm6, %v3225_v29, 0.0 }
0x3c25   :  { %v3331_v40 = vpop.permute.xlu1 %3330 }
0x3c26   :  { %v3333_v18 = vsel %vm198_vm4, %v3121_v62, %v3331_v40 }
0x3c27   :  { %v3335_v58 = vrot.slane %v3333_v18, 1 }
0x3c29   :  { %5666 = vmatmul.mubr.msk.f32.vlgmr.msra.gmra.mxu0 %vm200_vm5, %v3335_v58  ;;  %v3228_v31 = vpop.permute.xlu1 %3227 }
0x3c2a   :  { %v3231_v63 = vsel %vm198_vm4, %v3230_v42, %v3228_v31  ;;  %5692 = vmatpush3.msra.mxu0 %v7662_v32  ;;  %5699 = vmatprep.mubr.msk.f32.mxu0 %vm6269_vm0, %v6268_v1 }
0x3c2b   :  { %5643 = vmatmul.mubr.msk.f32.vlgmr.msra.gmra.mxu1 %vm200_vm5, %v3231_v63  ;;  %5693 = vmatprep.subr.mxu0 %v6268_v1 }
0x3c2c   :  { %5669 = vmatpush3.msra.mxu1 %v7564_v44  ;;  %5688 = vmatprep.mubr.msk.f32.mxu1 %vm6269_vm0, %v6268_v1 }
0x3c2d   :  { %5670 = vmatprep.subr.mxu1 %v6268_v1  ;;  %5694 = vmatpush3.msra.mxu0 %v7676_v27 }
0x3c2e   :  { %5671 = vmatpush3.msra.mxu1 %v7570_v45  ;;  %5695 = vmatprep.subr.mxu0 %v6268_v1 }
0x3c2f   :  { %5672 = vmatprep.subr.mxu1 %v6268_v1  ;;  %5696 = vmatpush3.msra.mxu0 %v7685_v52 }
0x3c30   :  { %5673 = vmatpush3.msra.mxu1 %v7574_v24  ;;  %5697 = vmatprep.subr.mxu0 %v6268_v1 }
0x3c31   :  { %5674 = vmatprep.subr.mxu1 %v6268_v1  ;;  %5698 = vmatpush3.msra.mxu0 %v7694_v20 }
0x3c32   :  { %5675 = vmatpush3.msra.mxu1 %v7578_v13  ;;  %5702 = vmatprep.subr.mxu0 %v6268_v1 }
0x3c33   :  { %5676 = vmatprep.subr.mxu1 %v6268_v1 }
0x3c34   :  { %5677 = vmatpush3.msra.mxu1 %v7582_v46 }
0x3c35   :  { %5678 = vmatprep.subr.mxu1 %v6268_v1 }
0x3c36   :  { %5679 = vmatpush3.msra.mxu1 %v7586_v47 }
0x3c37   :  { %5680 = vmatprep.subr.mxu1 %v6268_v1 }
0x3c38   :  { %5681 = vmatpush3.msra.mxu1 %v7590_v48 }
0x3c39   :  { %5682 = vmatprep.subr.mxu1 %v6268_v1 }
0x3c3a   :  { %5683 = vmatpush3.msra.mxu1 %v7594_v49 }
0x3c3b   :  { %5684 = vmatprep.subr.mxu1 %v6268_v1 }
0x3c3c   :  { %5685 = vmatpush3.msra.mxu1 %v7598_v50 }
0x3c3d   :  { %5686 = vmatprep.subr.mxu1 %v6268_v1 }
0x3c3e   :  { %5687 = vmatpush3.msra.mxu1 %v7602_v51 }
0x3c3f   :  { %5721 = vmatprep.subr.mxu1 %v6268_v1 }
0x3ce9   :  { %v3404_v9 = vpop.f32.mrf.mxu0 }
0x3cea   :  { %v3405_v21 = vadd.f32 %v7641_v59, %v3404_v9 }
0x3ceb   :  { %v3301_v16 = vpop.f32.mrf.mxu1  ;;  %v5667_v62 = vpop.f32.mrf.mxu0 }
0x3cec   :  { %6035 = vtanh.f32 %v3405_v21  ;;  %v3302_v3 = vadd.f32 %v7716_v54, %v3301_v16  ;;  %v4731_v34 = vmul.f32 -1.442695, %v3405_v21 }
0x3ced   :  { %v5644_v60 = vpop.f32.mrf.mxu1 }
0x3cee   :  { %6037 = vtanh.f32 %v3302_v3  ;;  %v4729_v6 = vmul.f32 -1.442695, %v3302_v3 }
0x3cef   :  { %6039 = vpow2.f32 %v4731_v34 }
0x3cf0   :  { %6041 = vpow2.f32 %v4729_v6 }
0x3cf9   :  { %v6036_v8 = vpop.eup %6035 }
0x3cfa   :  { %3417 = vrot.lane.b32.xlu0 %v6036_v8, %s6271_s26 }
0x3cfb   :  { %v6038_v11 = vpop.eup %6037 }
0x3cfc   :  { %3314 = vrot.lane.b32.xlu1 %v6038_v11, %s6271_s26  ;;  %v6040_v37 = vpop.eup %6039 }
0x3cfd   :  { %v6042_v28 = vpop.eup %6041  ;;  %v3411_v39 = vadd.f32 1.0, %v6040_v37 }
0x3cfe   :  { %v3308_v15 = vadd.f32 1.0, %v6042_v28 }
0x3cff   :  { %6043 = vrcp.f32 %v3411_v39 }
0x3d00   :  { %6045 = vrcp.f32 %v3308_v15 }
0x3d0c   :  { %v6044_v41 = vpop.eup %6043 }
0x3d0d   :  { %v6046_v0 = vpop.eup %6045  ;;  %v3415_v40 = vmul.f32 %v6044_v41, %v7647_v19 }
0x3d0e   :  { %v3312_v58 = vmul.f32 %v6046_v0, %v7488_v10 }
0x3d6c   :  { %v3418_v53 = vpop.permute.xlu0 %3417 }
0x3d6d   :  { %v3420_v43 = vmul.f32 %v6044_v41, %v3418_v53 }
0x3d6e   :  { %v3315_v33 = vpop.permute.xlu1 %3314 }
0x3d6f   :  { %3422 = vrot.lane.b32.xlu0 %v3420_v43, %s6272_s27  ;;  %v3317_v35 = vmul.f32 %v6046_v0, %v3315_v33  ;;  %v7779_v43 = vld [vmem:[%s8077_s7 + $0x38] sm:$0xff]  ;;  %v7795_v33 = vld [vmem:[%s8077_s7 + $0x28] sm:$0xff] }
0x3d71   :  { %3319 = vrot.lane.b32.xlu1 %v3317_v35, %s6272_s27  ;;  %v7802_v35 = vld [vmem:[%s8077_s7 + $0x20] sm:$0xff] }
0x3de1   :  { %v3423_v29 = vpop.permute.xlu0 %3422 }
0x3de2   :  { %v7724_v18 = vadd.f32 %v3423_v29, %v3415_v40  ;;  %v7809_v40 = vld [vmem:[%s8077_s7 + $0x18] sm:$0xff]  ;;  %v7816_v29 = vld [vmem:[%s8077_s7 + $0x10] sm:$0xff] }
0x3de3   :  { %v3320_v42 = vpop.permute.xlu1 %3319 }
0x3de4   :  { %6047 = vtanh.f32 %v7724_v18  ;;  %v3322_v31 = vadd.f32 %v3320_v42, %v3312_v58  ;;  %v7823_v58 = vld [vmem:[%s8077_s7 + $0x8] sm:$0xff]  ;;  %v7830_v42 = vld [vmem:[%s8077_s7] sm:$0xff] }
0x3de6   :  { %6049 = vtanh.f32 %v3322_v31 }
0x3df1   :  { %v6048_v63 = vpop.eup %6047 }
0x3df2   :  { %3428 = vrot.lane.b32.xlu0 %v6048_v63, %s6271_s26  ;;  %v7837_v63 = vld [vmem:[%s8074_s4] ss:$0 sm:$0xff] }
0x3df3   :  { %v6050_v9 = vpop.eup %6049 }
0x3df4   :  { %3325 = vrot.lane.b32.xlu1 %v6050_v9, %s6271_s26 }
0x3e64   :  { %v3429_v21 = vpop.permute.xlu0 %3428 }
0x3e65   :  { %v7730_v16 = vmul.f32 %v6044_v41, %v3429_v21 }
0x3e66   :  { %v3326_v19 = vpop.permute.xlu1 %3325 }
0x3e67   :  { %3433 = vrot.lane.b32.xlu0 %v7730_v16, %s6272_s27  ;;  %v3328_v62 = vmul.f32 %v6046_v0, %v3326_v19  ;;  %v7788_v0 = vld [vmem:[%s8077_s7 + $0x30] sm:$0xff] }
0x3e69   :  { %3437 = vrot.lane.b32.xlu1 %v3328_v62, %s6273_s5 }
0x3ed9   :  { %v3434_v10 = vpop.permute.xlu0 %3433 }
0x3eda   :  { %v3440_v3 = vsel %vm63_vm6, %v3434_v10, 0.0 }
0x3edb   :  { %v3438_v60 = vpop.permute.xlu1 %3437 }
0x3edc   :  { %v3441_v8 = vsel %vm198_vm4, %v3440_v3, %v3438_v60 }
0x3edd   :  { %5689 = vmatmul.mubr.msk.f32.vlgmr.msra.gmra.mxu1 %vm200_vm5, %v3441_v8 }
0x3ede   :  { %5722 = vmatpush3.msra.mxu1 %v7350_v56  ;;  %5741 = vmatprep.mubr.msk.f32.mxu1 %vm6269_vm0, %v6268_v1 }
0x3edf   :  { %5723 = vmatprep.subr.mxu1 %v6268_v1 }
0x3ee0   :  { %5724 = vmatpush3.msra.mxu1 %v7356_v17 }
0x3ee1   :  { %5725 = vmatprep.subr.mxu1 %v6268_v1 }
0x3ee2   :  { %5726 = vmatpush3.msra.mxu1 %v7360_v23 }
0x3ee3   :  { %5727 = vmatprep.subr.mxu1 %v6268_v1 }
0x3ee4   :  { %5728 = vmatpush3.msra.mxu1 %v7364_v7 }
0x3ee5   :  { %5729 = vmatprep.subr.mxu1 %v6268_v1 }
0x3ee6   :  { %5730 = vmatpush3.msra.mxu1 %v7368_v55 }
0x3ee7   :  { %5731 = vmatprep.subr.mxu1 %v6268_v1 }
0x3ee8   :  { %5732 = vmatpush3.msra.mxu1 %v7372_v12 }
0x3ee9   :  { %5733 = vmatprep.subr.mxu1 %v6268_v1 }
0x3eea   :  { %5734 = vmatpush3.msra.mxu1 %v7376_v61 }
0x3eeb   :  { %5735 = vmatprep.subr.mxu1 %v6268_v1 }
0x3eec   :  { %5736 = vmatpush3.msra.mxu1 %v7380_v5 }
0x3eed   :  { %5737 = vmatprep.subr.mxu1 %v6268_v1 }
0x3eee   :  { %5738 = vmatpush3.msra.mxu1 %v7384_v25 }
0x3eef   :  { %5739 = vmatprep.subr.mxu1 %v6268_v1 }
0x3ef0   :  { %5740 = vmatpush3.msra.mxu1 %v7388_v38 }
0x3ef1   :  { %5767 = vmatprep.subr.mxu1 %v6268_v1 }
0x3f9d   :  { %v3511_v56 = vpop.f32.mrf.mxu1 }
0x3f9e   :  { %v3512_v17 = vadd.f32 %v7716_v54, %v3511_v56 }
0x3f9f   :  { %v5690_v23 = vpop.f32.mrf.mxu1 }
0x3fa0   :  { %6051 = vtanh.f32 %v3512_v17  ;;  %v4733_v55 = vmul.f32 -1.442695, %v3512_v17 }
0x3fa2   :  { %6053 = vpow2.f32 %v4733_v55 }
0x3fad   :  { %v6052_v7 = vpop.eup %6051 }
0x3fae   :  { %3524 = vrot.lane.b32.xlu0 %v6052_v7, %s6271_s26 }
0x3faf   :  { %v6054_v12 = vpop.eup %6053 }
0x3fb0   :  { %v3518_v61 = vadd.f32 1.0, %v6054_v12 }
0x3fb2   :  { %6055 = vrcp.f32 %v3518_v61 }
0x3fbf   :  { %v6056_v5 = vpop.eup %6055 }
0x3fc0   :  { %v3522_v38 = vmul.f32 %v6056_v5, %v3322_v31 }
0x4020   :  { %v3525_v25 = vpop.permute.xlu0 %3524 }
0x4021   :  { %v3527_v11 = vmul.f32 %v6056_v5, %v3525_v25 }
0x4023   :  { %3529 = vrot.lane.b32.xlu1 %v3527_v11, %s6272_s27 }
0x4095   :  { %v3530_v34 = vpop.permute.xlu1 %3529 }
0x4096   :  { %v7763_v6 = vadd.f32 %v3530_v34, %v3522_v38 }
0x4098   :  { %6057 = vtanh.f32 %v7763_v6 }
0x40a5   :  { %v6058_v37 = vpop.eup %6057 }
0x40a6   :  { %3535 = vrot.lane.b32.xlu0 %v6058_v37, %s6271_s26 }
0x4118   :  { %v3536_v28 = vpop.permute.xlu0 %3535 }
0x4119   :  { %v7767_v39 = vmul.f32 %v6056_v5, %v3536_v28 }
0x411b   :  { %v3540_v15 = vrot.slane %v7767_v39, 7 }
0x411d   :  { %v3542_v41 = vsel %vm614_vm7, %v3328_v62, %v3540_v15 }
0x411e   :  { %3544 = vrot.lane.b32.xlu1 %v3542_v41, %s6272_s27 }
0x4190   :  { %v7772_v53 = vpop.permute.xlu1 %3544 }
0x4191   :  { %5700 = vmatmul.mubr.msk.f32.vlgmr.msra.gmra.mxu0 %vm63_vm6, %v7772_v53 }
0x4192   :  { %5703 = vmatpush3.msra.mxu0 %v7779_v43  ;;  %5718 = vmatprep.mubr.msk.f32.mxu0 %vm6269_vm0, %v6268_v1 }
0x4193   :  { %5704 = vmatprep.subr.mxu0 %v6268_v1 }
0x4194   :  { %5705 = vmatpush3.msra.mxu0 %v7788_v0 }
0x4195   :  { %5706 = vmatprep.subr.mxu0 %v6268_v1 }
0x4196   :  { %5707 = vmatpush3.msra.mxu0 %v7795_v33 }
0x4197   :  { %5708 = vmatprep.subr.mxu0 %v6268_v1 }
0x4198   :  { %5709 = vmatpush3.msra.mxu0 %v7802_v35 }
0x4199   :  { %5710 = vmatprep.subr.mxu0 %v6268_v1 }
0x419a   :  { %5711 = vmatpush3.msra.mxu0 %v7809_v40 }
0x419b   :  { %5712 = vmatprep.subr.mxu0 %v6268_v1 }
0x419c   :  { %5713 = vmatpush3.msra.mxu0 %v7816_v29 }
0x419d   :  { %5714 = vmatprep.subr.mxu0 %v6268_v1 }
0x419e   :  { %5715 = vmatpush3.msra.mxu0 %v7823_v58 }
0x419f   :  { %5716 = vmatprep.subr.mxu0 %v6268_v1 }
0x41a0   :  { %5717 = vmatpush3.msra.mxu0 %v7830_v42 }
0x41a1   :  { %5744 = vmatprep.subr.mxu0 %v6268_v1 }
0x4251   :  { %v3614_v31 = vpop.f32.mrf.mxu0 }
0x4252   :  { %v3615_v9 = vadd.f32 %v7837_v63, %v3614_v31 }
0x4253   :  { %v5701_v21 = vpop.f32.mrf.mxu0 }
0x4254   :  { %v3618_v19 = vmax.f32 %v3615_v9, 0.0 }
0x4256   :  { %v3626_v62 = vrot.slane %v3618_v19, %v6634_v57 }
0x4258   :  { %v3627_v10 = vcombine.high %v3626_v62, %v3626_v62  ;;  %v3634_v3 = vrot.slane %v3626_v62, %v6634_v57 }
0x425a   :  { %v3641_v60 = vrot.slane %v3627_v10, %v6634_v57  ;;  %v3645_v8 = vrot.slane %v3634_v3, %v6641_v2 }
0x425c   :  { %v3652_v56 = vmul.f32 %v3645_v8, %v6647_v22  ;;  %v3649_v17 = vrot.slane %v3641_v60, %v6641_v2 }
0x425e   :  { %v3654_v23 = vsel %vm63_vm6, %v3652_v56, 0.0  ;;  %v3653_v7 = vmul.f32 %v3649_v17, %v6651_v26 }
0x425f   :  { %3655 = vadd.xlane.f32.xlu0 %v3654_v23 }
0x4260   :  { %v3657_v55 = vsel %vm63_vm6, %v3653_v7, 0.0 }
0x4261   :  { %3658 = vadd.xlane.f32.xlu1 %v3657_v55 }
0x42e8   :  { %v3656_v12 = vpop.xlane.xlu0 %3655 }
0x42e9   :  { %v3665_v5 = vrot.slane %v3656_v12, %v6343_v4 }
0x42ea   :  { %v3659_v61 = vpop.xlane.xlu1 %3658 }
0x42eb   :  { %v3669_v25 = vrot.slane %v3659_v61, %v6343_v4 }
0x42ed   :  { %v3670_v11 = vsel %vm191_vm1, %v3669_v25, %v3665_v5 }
0x42ee   :  { %v3672_v38 = vsel %vm751_vm8, %v3670_v11, -inf }
0x42ef   :  { %3673 = vmax.xlane.f32.xlu0 %v3672_v38 }
0x4378   :  { %v3674_v34 = vpop.xlane.xlu0 %3673 }
0x4379   :  { %v3679_v37 = vrot.slane %v3674_v34, %v6641_v2  ;;  %v3683_v28 = vrot.slane %v3674_v34, %v6663_v36 }
0x437b   :  { %v3686_v15 = vsub.f32 %v3656_v12, %v3679_v37  ;;  %v3687_v41 = vsub.f32 %v3659_v61, %v3683_v28 }
0x437d   :  { %v3688_v31 = vmul.f32 1.442695, %v3686_v15  ;;  %v3690_v9 = vmul.f32 1.442695, %v3687_v41 }
0x437f   :  { %6059 = vpow2.f32 %v3688_v31 }
0x4380   :  { %6061 = vpow2.f32 %v3690_v9 }
0x438c   :  { %v6060_v21 = vpop.eup %6059 }
0x438d   :  { %v6062_v19 = vpop.eup %6061  ;;  %3695 = vperm.xlu0 %5857, %v6060_v21  }
0x438e   :  { %3698 = vperm.xlu1 %5858, %v6062_v19  }
0x4408   :  { %v3696_v62 = vpop.permute.xlu0 %3695 }
0x4409   :  { %v3699_v10 = vpop.permute.xlu1 %3698  ;;  %v3703_v3 = vrot.slane %v3696_v62, %v6343_v4 }
0x440a   :  { %v3707_v60 = vrot.slane %v3699_v10, %v6343_v4 }
0x440c   :  { %v3708_v8 = vsel %vm191_vm1, %v3707_v60, %v3703_v3 }
0x440d   :  { %v3710_v56 = vsel %vm751_vm8, %v3708_v8, 0.0 }
0x440e   :  { %3711 = vadd.xlane.f32.xlu1 %v3710_v56 }
0x4497   :  { %v3712_v17 = vpop.xlane.xlu1 %3711 }
0x4498   :  { %6063 = vrcp.f32 %v3712_v17 }
0x44a5   :  { %v6064_v23 = vpop.eup %6063 }
0x44a6   :  { %v3718_v7 = vrot.slane %v6064_v23, %v6641_v2  ;;  %v3722_v12 = vrot.slane %v6064_v23, %v6663_v36 }
0x44a8   :  { %v3725_v55 = vmul.f32 %v6060_v21, %v3718_v7  ;;  %v3726_v61 = vmul.f32 %v6062_v19, %v3722_v12 }
0x44aa   :  { %3729 = vperm.xlu0 %5857, %v3725_v55   ;;  %v7899_v55 = vld [vmem:[%s8078_s8] ss:$0 sm:$0xff] }
0x44ae   :  { %3734 = vperm.xlu0 %5857, %v3726_v61  }
0x4525   :  { %v3730_v5 = vpop.permute.xlu0 %3729 }
0x4526   :  { %v3737_v25 = vmul.f32 %v7544_v30, %v3730_v5  ;;  %v4615_v37 = vrot.slane %v3730_v5, %v6343_v4 }
0x4528   :  { %v3739_v11 = vsel %vm63_vm6, %v3737_v25, 0.0 }
0x4529   :  { %v3740_v38 = vrot.slane %v3739_v11, 4  ;;  %v3735_v34 = vpop.permute.xlu0 %3734 }
0x452a   :  { %v3738_v28 = vmul.f32 %v7552_v14, %v3735_v34  ;;  %v4619_v15 = vrot.slane %v3735_v34, %v6343_v4 }
0x452b   :  { %v3741_v41 = vadd.f32 %v3740_v38, %v3739_v11 }
0x452c   :  { %v3746_v31 = vsel %vm63_vm6, %v3738_v28, 0.0  ;;  %v4632_v9 = vsel %vm191_vm1, %v4619_v15, %v4615_v37 }
0x452d   :  { %v3742_v21 = vrot.slane %v3741_v41, 2  ;;  %v3747_v19 = vrot.slane %v3746_v31, 4  ;;  %4644 = vst.msk [vmem:[#allocation6 + $0x8] sm:$0x3] %vm751_vm8, %v4632_v9 }
0x452f   :  { %v3743_v30 = vadd.f32 %v3742_v21, %v3741_v41  ;;  %v3748_v62 = vadd.f32 %v3747_v19, %v3746_v31 }
0x4531   :  { %v3749_v10 = vrot.slane %v3748_v62, 2  ;;  %v3744_v3 = vrot.slane %v3743_v30, 1 }
0x4533   :  { %v3750_v60 = vadd.f32 %v3749_v10, %v3748_v62  ;;  %v3745_v56 = vadd.f32 %v3744_v3, %v3743_v30  ;;  %v6187_v30 = vld [vmem:[#allocation2 + $0x48] sm:$0xff]  ;;  %v6188_v62 = vld [vmem:[#allocation2 + $0x40] sm:$0xff]  ;;  %v6189_v10 = vld [vmem:[#allocation2 + $0x38] sm:$0xff] }
0x4534   :  { %v6190_v3 = vld [vmem:[#allocation2 + $0x30] sm:$0xff] }
0x4535   :  { %v3751_v8 = vrot.slane %v3750_v60, 1 }
0x4537   :  { %v3752_v17 = vadd.f32 %v3751_v8, %v3750_v60  ;;  %v6191_v60 = vld [vmem:[#allocation2 + $0x28] sm:$0xff]  ;;  %v6192_v8 = vld [vmem:[#allocation2 + $0x20] sm:$0xff] }
0x4539   :  { %v3756_v14 = vsel %vm191_vm1, %v3752_v17, %v3745_v56  ;;  %v6193_v56 = vld [vmem:[#allocation2 + $0x18] sm:$0xff]  ;;  %v6194_v17 = vld [vmem:[#allocation2 + $0x10] sm:$0xff] }
0x453a   :  { %3757 = vrot.lane.b32.xlu0 %v3756_v14, %s6272_s27 }
0x45ac   :  { %v3758_v23 = vpop.permute.xlu0 %3757 }
0x45ad   :  { %v3760_v7 = vsel %vm63_vm6, %v7772_v53, %v3758_v23  ;;  %v6196_v23 = vld [vmem:[#allocation2] sm:$0xff] }
0x45ae   :  { %5719 = vmatmul.mubr.msk.f32.vlgmr.msra.gmra.mxu0 %vm847_vm9, %v3760_v7 }
0x45af   :  { %5745 = vmatpush3.msra.mxu0 %v7564_v44  ;;  %5764 = vmatprep.mubr.msk.f32.mxu0 %vm6269_vm0, %v6268_v1 }
0x45b0   :  { %5746 = vmatprep.subr.mxu0 %v6268_v1 }
0x45b1   :  { %5747 = vmatpush3.msra.mxu0 %v7570_v45 }
0x45b2   :  { %5748 = vmatprep.subr.mxu0 %v6268_v1 }
0x45b3   :  { %5749 = vmatpush3.msra.mxu0 %v7574_v24 }
0x45b4   :  { %5750 = vmatprep.subr.mxu0 %v6268_v1 }
0x45b5   :  { %5751 = vmatpush3.msra.mxu0 %v7578_v13 }
0x45b6   :  { %5752 = vmatprep.subr.mxu0 %v6268_v1 }
0x45b7   :  { %5753 = vmatpush3.msra.mxu0 %v7582_v46 }
0x45b8   :  { %5754 = vmatprep.subr.mxu0 %v6268_v1 }
0x45b9   :  { %5755 = vmatpush3.msra.mxu0 %v7586_v47 }
0x45ba   :  { %5756 = vmatprep.subr.mxu0 %v6268_v1 }
0x45bb   :  { %5757 = vmatpush3.msra.mxu0 %v7590_v48 }
0x45bc   :  { %5758 = vmatprep.subr.mxu0 %v6268_v1 }
0x45bd   :  { %5759 = vmatpush3.msra.mxu0 %v7594_v49 }
0x45be   :  { %5760 = vmatprep.subr.mxu0 %v6268_v1 }
0x45bf   :  { %5761 = vmatpush3.msra.mxu0 %v7598_v50 }
0x45c0   :  { %5762 = vmatprep.subr.mxu0 %v6268_v1 }
0x45c1   :  { %5763 = vmatpush3.msra.mxu0 %v7602_v51 }
0x45c2   :  { %5790 = vmatprep.subr.mxu0 %v6268_v1 }
0x466e   :  { %v3830_v53 = vpop.f32.mrf.mxu0 }
0x466f   :  { %v3831_v12 = vadd.f32 %v7899_v55, %v3830_v53 }
0x4670   :  { %v5720_v61 = vpop.f32.mrf.mxu0 }
0x4671   :  { %v3834_v5 = vsel %vm921_vm10, %v3831_v12, -inf }
0x4672   :  { %3835 = vmax.xlane.f32.xlu0 %v3834_v5 }
0x4688   :  { %3850 = vrot.lane.b32.xlu0 %v7730_v16, %s6273_s5 }
0x46fb   :  { %v3836_v25 = vpop.xlane.xlu0 %3835 }
0x46fc   :  { %v3837_v11 = vsub.f32 %v3831_v12, %v3836_v25 }
0x46fe   :  { %v3838_v38 = vmul.f32 1.442695, %v3837_v11 }
0x46ff   :  { %v3851_v21 = vpop.permute.xlu0 %3850 }
0x4700   :  { %6065 = vpow2.f32 %v3838_v38 }
0x470d   :  { %v6066_v34 = vpop.eup %6065 }
0x470e   :  { %v3840_v37 = vsel %vm921_vm10, %v6066_v34, 0.0 }
0x470f   :  { %3841 = vadd.xlane.f32.xlu1 %v3840_v37 }
0x4720   :  { %3846 = vrot.lane.b32.xlu1 %v3756_v14, %s6270_s23  ;;  %v6195_v14 = vld [vmem:[#allocation2 + $0x8] sm:$0xff] }
0x4798   :  { %v3842_v28 = vpop.xlane.xlu1 %3841 }
0x4799   :  { %6067 = vlog2.f32 %v3842_v28 }
0x479c   :  { %v3847_v9 = vpop.permute.xlu1 %3846 }
0x47a6   :  { %v6068_v15 = vpop.eup %6067 }
0x47a7   :  { %v3844_v41 = vmul.f32 0.6931472, %v6068_v15 }
0x47a9   :  { %v3845_v31 = vsub.f32 %v3837_v11, %v3844_v41 }
0x47ab   :  { %4578 = vst.msk [vmem:[#allocation5 + $0x8] sm:$0x3] %vm921_vm10, %v3845_v31  ;;  %v7909_v16 = vsel %vm196_vm3, %v3845_v31, %v3847_v9 }
0x47ac   :  { %v3853_v19 = vsel %vm198_vm4, %v7909_v16, %v3851_v21 }
0x47ad   :  { %5742 = vmatmul.mubr.msk.f32.vlgmr.msra.gmra.mxu1 %vm200_vm5, %v3853_v19 }
0x47ae   :  { %5768 = vmatpush3.msra.mxu1 %v6187_v30  ;;  %5787 = vmatprep.mubr.msk.f32.mxu1 %vm6269_vm0, %v6268_v1 }
0x47af   :  { %5769 = vmatprep.subr.mxu1 %v6268_v1 }
0x47b0   :  { %5770 = vmatpush3.msra.mxu1 %v6188_v62 }
0x47b1   :  { %5771 = vmatprep.subr.mxu1 %v6268_v1 }
0x47b2   :  { %5772 = vmatpush3.msra.mxu1 %v6189_v10 }
0x47b3   :  { %5773 = vmatprep.subr.mxu1 %v6268_v1 }
0x47b4   :  { %5774 = vmatpush3.msra.mxu1 %v6190_v3 }
0x47b5   :  { %5775 = vmatprep.subr.mxu1 %v6268_v1 }
0x47b6   :  { %5776 = vmatpush3.msra.mxu1 %v6191_v60 }
0x47b7   :  { %5777 = vmatprep.subr.mxu1 %v6268_v1 }
0x47b8   :  { %5778 = vmatpush3.msra.mxu1 %v6192_v8 }
0x47b9   :  { %5779 = vmatprep.subr.mxu1 %v6268_v1 }
0x47ba   :  { %5780 = vmatpush3.msra.mxu1 %v6193_v56 }
0x47bb   :  { %5781 = vmatprep.subr.mxu1 %v6268_v1 }
0x47bc   :  { %5782 = vmatpush3.msra.mxu1 %v6194_v17 }
0x47bd   :  { %5783 = vmatprep.subr.mxu1 %v6268_v1 }
0x47be   :  { %5784 = vmatpush3.msra.mxu1 %v6195_v14 }
0x47bf   :  { %5785 = vmatprep.subr.mxu1 %v6268_v1 }
0x47c0   :  { %5786 = vmatpush3.msra.mxu1 %v6196_v23 }
0x47c1   :  { %5813 = vmatprep.subr.mxu1 %v6268_v1 }
0x486d   :  { %v3923_v7 = vpop.f32.mrf.mxu1 }
0x486e   :  { %v3924_v53 = vadd.f32 %v7641_v59, %v3923_v7 }
0x486f   :  { %v5743_v12 = vpop.f32.mrf.mxu1 }
0x4870   :  { %6069 = vtanh.f32 %v3924_v53  ;;  %v4737_v5 = vmul.f32 -1.442695, %v3924_v53 }
0x4872   :  { %6071 = vpow2.f32 %v4737_v5 }
0x487d   :  { %v6070_v61 = vpop.eup %6069 }
0x487e   :  { %3936 = vrot.lane.b32.xlu1 %v6070_v61, %s6271_s26 }
0x487f   :  { %v6072_v25 = vpop.eup %6071 }
0x4880   :  { %v3930_v11 = vadd.f32 1.0, %v6072_v25 }
0x4882   :  { %6073 = vrcp.f32 %v3930_v11 }
0x488f   :  { %v6074_v38 = vpop.eup %6073 }
0x4890   :  { %v3934_v28 = vmul.f32 %v6074_v38, %v7724_v18 }
0x48f0   :  { %v3937_v34 = vpop.permute.xlu1 %3936 }
0x48f1   :  { %v3939_v37 = vmul.f32 %v6074_v38, %v3937_v34 }
0x48f3   :  { %3941 = vrot.lane.b32.xlu1 %v3939_v37, %s6272_s27 }
0x4965   :  { %v3942_v15 = vpop.permute.xlu1 %3941 }
0x4966   :  { %v7930_v41 = vadd.f32 %v3942_v15, %v3934_v28 }
0x4968   :  { %6075 = vtanh.f32 %v7930_v41 }
0x4975   :  { %v6076_v31 = vpop.eup %6075 }
0x4976   :  { %3947 = vrot.lane.b32.xlu1 %v6076_v31, %s6271_s26 }
0x49e8   :  { %v3948_v9 = vpop.permute.xlu1 %3947 }
0x49e9   :  { %v3950_v21 = vmul.f32 %v6074_v38, %v3948_v9 }
0x49eb   :  { %v4057_v19 = vrot.slane %v3950_v21, 7  ;;  %3952 = vrot.lane.b32.xlu1 %v3950_v21, %s6272_s27 }
0x49ed   :  { %4058 = vrot.lane.b32.xlu0 %v4057_v19, %s6273_s5 }
0x49f1   :  { %3955 = vrot.lane.b32.xlu0 %v7767_v39, %s6273_s5 }
0x4a5d   :  { %v3953_v18 = vpop.permute.xlu1 %3952 }
0x4a5e   :  { %v3958_v3 = vsel %vm63_vm6, %v3953_v18, 0.0 }
0x4a5f   :  { %v4059_v30 = vpop.permute.xlu0 %4058 }
0x4a60   :  { %v4061_v62 = vsel %vm198_vm4, %v7909_v16, %v4059_v30 }
0x4a61   :  { %v4063_v10 = vrot.slane %v4061_v62, 1 }
0x4a63   :  { %5788 = vmatmul.mubr.msk.f32.vlgmr.msra.gmra.mxu1 %vm200_vm5, %v4063_v10  ;;  %v3956_v60 = vpop.permute.xlu0 %3955 }
0x4a64   :  { %v3959_v8 = vsel %vm198_vm4, %v3958_v3, %v3956_v60  ;;  %5814 = vmatpush3.msra.mxu1 %v7662_v32  ;;  %5821 = vmatprep.mubr.msk.f32.mxu1 %vm6269_vm0, %v6268_v1 }
0x4a65   :  { %5765 = vmatmul.mubr.msk.f32.vlgmr.msra.gmra.mxu0 %vm200_vm5, %v3959_v8  ;;  %5815 = vmatprep.subr.mxu1 %v6268_v1 }
0x4a66   :  { %5791 = vmatpush3.msra.mxu0 %v7564_v44  ;;  %5810 = vmatprep.mubr.msk.f32.mxu0 %vm6269_vm0, %v6268_v1 }
0x4a67   :  { %5792 = vmatprep.subr.mxu0 %v6268_v1  ;;  %5816 = vmatpush3.msra.mxu1 %v7676_v27 }
0x4a68   :  { %5793 = vmatpush3.msra.mxu0 %v7570_v45  ;;  %5817 = vmatprep.subr.mxu1 %v6268_v1 }
0x4a69   :  { %5794 = vmatprep.subr.mxu0 %v6268_v1  ;;  %5818 = vmatpush3.msra.mxu1 %v7685_v52 }
0x4a6a   :  { %5795 = vmatpush3.msra.mxu0 %v7574_v24  ;;  %5819 = vmatprep.subr.mxu1 %v6268_v1 }
0x4a6b   :  { %5796 = vmatprep.subr.mxu0 %v6268_v1  ;;  %5820 = vmatpush3.msra.mxu1 %v7694_v20 }
0x4a6c   :  { %5797 = vmatpush3.msra.mxu0 %v7578_v13  ;;  %5824 = vmatprep.subr.mxu1 %v6268_v1 }
0x4a6d   :  { %5798 = vmatprep.subr.mxu0 %v6268_v1 }
0x4a6e   :  { %5799 = vmatpush3.msra.mxu0 %v7582_v46 }
0x4a6f   :  { %5800 = vmatprep.subr.mxu0 %v6268_v1 }
0x4a70   :  { %5801 = vmatpush3.msra.mxu0 %v7586_v47 }
0x4a71   :  { %5802 = vmatprep.subr.mxu0 %v6268_v1 }
0x4a72   :  { %5803 = vmatpush3.msra.mxu0 %v7590_v48 }
0x4a73   :  { %5804 = vmatprep.subr.mxu0 %v6268_v1 }
0x4a74   :  { %5805 = vmatpush3.msra.mxu0 %v7594_v49 }
0x4a75   :  { %5806 = vmatprep.subr.mxu0 %v6268_v1 }
0x4a76   :  { %5807 = vmatpush3.msra.mxu0 %v7598_v50 }
0x4a77   :  { %5808 = vmatprep.subr.mxu0 %v6268_v1 }
0x4a78   :  { %5809 = vmatpush3.msra.mxu0 %v7602_v51 }
0x4b23   :  { %v4132_v44 = vpop.f32.mrf.mxu1 }
0x4b24   :  { %v4133_v45 = vadd.f32 %v7641_v59, %v4132_v44 }
0x4b25   :  { %v4029_v24 = vpop.f32.mrf.mxu0  ;;  %v5789_v13 = vpop.f32.mrf.mxu1 }
0x4b26   :  { %6077 = vtanh.f32 %v4133_v45  ;;  %v4030_v46 = vadd.f32 %v7716_v54, %v4029_v24  ;;  %v4741_v50 = vmul.f32 -1.442695, %v4133_v45 }
0x4b27   :  { %v5766_v47 = vpop.f32.mrf.mxu0 }
0x4b28   :  { %6079 = vtanh.f32 %v4030_v46  ;;  %v4739_v32 = vmul.f32 -1.442695, %v4030_v46 }
0x4b29   :  { %6081 = vpow2.f32 %v4741_v50 }
0x4b2a   :  { %6083 = vpow2.f32 %v4739_v32 }
0x4b33   :  { %v6078_v48 = vpop.eup %6077 }
0x4b34   :  { %4145 = vrot.lane.b32.xlu1 %v6078_v48, %s6271_s26 }
0x4b35   :  { %v6080_v49 = vpop.eup %6079 }
0x4b36   :  { %4042 = vrot.lane.b32.xlu0 %v6080_v49, %s6271_s26  ;;  %v6082_v51 = vpop.eup %6081 }
0x4b37   :  { %v6084_v27 = vpop.eup %6083  ;;  %v4139_v59 = vadd.f32 1.0, %v6082_v51 }
0x4b38   :  { %v4036_v52 = vadd.f32 1.0, %v6084_v27 }
0x4b39   :  { %6085 = vrcp.f32 %v4139_v59 }
0x4b3a   :  { %6087 = vrcp.f32 %v4036_v52 }
0x4b46   :  { %v6086_v20 = vpop.eup %6085 }
0x4b47   :  { %v6088_v56 = vpop.eup %6087  ;;  %v4143_v23 = vmul.f32 %v6086_v20, %v7930_v41 }
0x4b48   :  { %v4040_v12 = vmul.f32 %v6088_v56, %v7763_v6 }
0x4ba6   :  { %v4146_v39 = vpop.permute.xlu1 %4145 }
0x4ba7   :  { %v4148_v16 = vmul.f32 %v6086_v20, %v4146_v39 }
0x4ba8   :  { %v4043_v17 = vpop.permute.xlu0 %4042 }
0x4ba9   :  { %4150 = vrot.lane.b32.xlu1 %v4148_v16, %s6272_s27  ;;  %v4045_v14 = vmul.f32 %v6088_v56, %v4043_v17 }
0x4bab   :  { %4047 = vrot.lane.b32.xlu0 %v4045_v14, %s6272_s27 }
0x4c1b   :  { %v4151_v7 = vpop.permute.xlu1 %4150 }
0x4c1c   :  { %v4153_v53 = vadd.f32 %v4151_v7, %v4143_v23 }
0x4c1d   :  { %v4048_v61 = vpop.permute.xlu0 %4047 }
0x4c1e   :  { %6089 = vtanh.f32 %v4153_v53  ;;  %v4050_v5 = vadd.f32 %v4048_v61, %v4040_v12 }
0x4c20   :  { %6091 = vtanh.f32 %v4050_v5 }
0x4c2b   :  { %v6090_v25 = vpop.eup %6089 }
0x4c2c   :  { %4156 = vrot.lane.b32.xlu1 %v6090_v25, %s6271_s26 }
0x4c2d   :  { %v6092_v11 = vpop.eup %6091 }
0x4c2e   :  { %4053 = vrot.lane.b32.xlu0 %v6092_v11, %s6271_s26 }
0x4c9e   :  { %v4157_v38 = vpop.permute.xlu1 %4156 }
0x4c9f   :  { %v4159_v34 = vmul.f32 %v6086_v20, %v4157_v38 }
0x4ca0   :  { %v4054_v37 = vpop.permute.xlu0 %4053 }
0x4ca1   :  { %4161 = vrot.lane.b32.xlu1 %v4159_v34, %s6272_s27  ;;  %v4056_v28 = vmul.f32 %v6088_v56, %v4054_v37 }
0x4ca3   :  { %4165 = vrot.lane.b32.xlu0 %v4056_v28, %s6273_s5 }
0x4d13   :  { %v4162_v15 = vpop.permute.xlu1 %4161 }
0x4d14   :  { %v4168_v6 = vsel %vm63_vm6, %v4162_v15, 0.0 }
0x4d15   :  { %v4166_v41 = vpop.permute.xlu0 %4165 }
0x4d16   :  { %v4169_v31 = vsel %vm198_vm4, %v4168_v6, %v4166_v41 }
0x4d17   :  { %5811 = vmatmul.mubr.msk.f32.vlgmr.msra.gmra.mxu0 %vm200_vm5, %v4169_v31 }
0x4dd7   :  { %v4239_v9 = vpop.f32.mrf.mxu0 }
0x4dd8   :  { %v4240_v21 = vadd.f32 %v7716_v54, %v4239_v9 }
0x4dd9   :  { %v5812_v19 = vpop.f32.mrf.mxu0 }
0x4dda   :  { %6093 = vtanh.f32 %v4240_v21  ;;  %v4743_v18 = vmul.f32 -1.442695, %v4240_v21  ;;  %v6197_v21 = vld [vmem:[%s8070_s0] sm:$0xff] }
0x4ddc   :  { %6095 = vpow2.f32 %v4743_v18 }
0x4de7   :  { %v6094_v30 = vpop.eup %6093 }
0x4de8   :  { %4252 = vrot.lane.b32.xlu1 %v6094_v30, %s6271_s26 }
0x4de9   :  { %v6096_v62 = vpop.eup %6095 }
0x4dea   :  { %v4246_v10 = vadd.f32 1.0, %v6096_v62 }
0x4dec   :  { %6097 = vrcp.f32 %v4246_v10 }
0x4df9   :  { %v6098_v3 = vpop.eup %6097 }
0x4dfa   :  { %v4250_v44 = vmul.f32 %v6098_v3, %v4050_v5 }
0x4e5a   :  { %v4253_v60 = vpop.permute.xlu1 %4252 }
0x4e5b   :  { %v4255_v8 = vmul.f32 %v6098_v3, %v4253_v60 }
0x4e5d   :  { %4257 = vrot.lane.b32.xlu0 %v4255_v8, %s6272_s27 }
0x4ecf   :  { %v4258_v45 = vpop.permute.xlu0 %4257 }
0x4ed0   :  { %v4260_v24 = vadd.f32 %v4258_v45, %v4250_v44 }
0x4ed2   :  { %6099 = vtanh.f32 %v4260_v24 }
0x4edf   :  { %v6100_v54 = vpop.eup %6099 }
0x4ee0   :  { %4263 = vrot.lane.b32.xlu1 %v6100_v54, %s6271_s26 }
0x4f52   :  { %v4264_v13 = vpop.permute.xlu1 %4263 }
0x4f53   :  { %v4266_v46 = vmul.f32 %v6098_v3, %v4264_v13 }
0x4f55   :  { %v4268_v47 = vrot.slane %v4266_v46, 7 }
0x4f57   :  { %v4270_v48 = vsel %vm614_vm7, %v4056_v28, %v4268_v47 }
0x4f58   :  { %4272 = vrot.lane.b32.xlu0 %v4270_v48, %s6272_s27 }
0x4fca   :  { %v7996_v49 = vpop.permute.xlu0 %4272 }
0x4fcb   :  { %5822 = vmatmul.mubr.msk.f32.vlgmr.msra.gmra.mxu1 %vm63_vm6, %v7996_v49 }
0x4fcc   :  { %5825 = vmatpush3.msra.mxu1 %v7779_v43  ;;  %5840 = vmatprep.mubr.msk.f32.mxu1 %vm6269_vm0, %v6268_v1 }
0x4fcd   :  { %5826 = vmatprep.subr.mxu1 %v6268_v1 }
0x4fce   :  { %5827 = vmatpush3.msra.mxu1 %v7788_v0 }
0x4fcf   :  { %5828 = vmatprep.subr.mxu1 %v6268_v1 }
0x4fd0   :  { %5829 = vmatpush3.msra.mxu1 %v7795_v33 }
0x4fd1   :  { %5830 = vmatprep.subr.mxu1 %v6268_v1 }
0x4fd2   :  { %5831 = vmatpush3.msra.mxu1 %v7802_v35 }
0x4fd3   :  { %5832 = vmatprep.subr.mxu1 %v6268_v1 }
0x4fd4   :  { %5833 = vmatpush3.msra.mxu1 %v7809_v40 }
0x4fd5   :  { %5834 = vmatprep.subr.mxu1 %v6268_v1 }
0x4fd6   :  { %5835 = vmatpush3.msra.mxu1 %v7816_v29 }
0x4fd7   :  { %5836 = vmatprep.subr.mxu1 %v6268_v1 }
0x4fd8   :  { %5837 = vmatpush3.msra.mxu1 %v7823_v58 }
0x4fd9   :  { %5838 = vmatprep.subr.mxu1 %v6268_v1 }
0x4fda   :  { %5839 = vmatpush3.msra.mxu1 %v7830_v42 }
0x508b   :  { %v4342_v43 = vpop.f32.mrf.mxu1 }
0x508c   :  { %v4343_v0 = vadd.f32 %v7837_v63, %v4342_v43 }
0x508d   :  { %v5823_v33 = vpop.f32.mrf.mxu1 }
0x508e   :  { %v4346_v35 = vmax.f32 %v4343_v0, 0.0 }
0x5090   :  { %v4354_v50 = vrot.slane %v4346_v35, %v6634_v57 }
0x5092   :  { %v4355_v40 = vcombine.high %v4354_v50, %v4354_v50  ;;  %v4362_v32 = vrot.slane %v4354_v50, %v6634_v57 }
0x5094   :  { %v4369_v29 = vrot.slane %v4355_v40, %v6634_v57  ;;  %v4373_v51 = vrot.slane %v4362_v32, %v6641_v2 }
0x5096   :  { %v4380_v58 = vmul.f32 %v4373_v51, %v6647_v22  ;;  %v4377_v1 = vrot.slane %v4369_v29, %v6641_v2 }
0x5098   :  { %v4382_v42 = vsel %vm63_vm6, %v4380_v58, 0.0  ;;  %v4381_v27 = vmul.f32 %v4377_v1, %v6651_v26 }
0x5099   :  { %4383 = vadd.xlane.f32.xlu1 %v4382_v42 }
0x509a   :  { %v4385_v63 = vsel %vm63_vm6, %v4381_v27, 0.0 }
0x509b   :  { %4386 = vadd.xlane.f32.xlu0 %v4385_v63 }
0x5122   :  { %v4384_v59 = vpop.xlane.xlu1 %4383 }
0x5123   :  { %v4393_v20 = vrot.slane %v4384_v59, %v6343_v4 }
0x5124   :  { %v4387_v52 = vpop.xlane.xlu0 %4386 }
0x5125   :  { %v4397_v57 = vrot.slane %v4387_v52, %v6343_v4 }
0x5127   :  { %v4398_v39 = vsel %vm191_vm1, %v4397_v57, %v4393_v20 }
0x5128   :  { %v4400_v22 = vsel %vm751_vm8, %v4398_v39, -inf }
0x5129   :  { %4401 = vmax.xlane.f32.xlu0 %v4400_v22 }
0x51b2   :  { %v4402_v16 = vpop.xlane.xlu0 %4401 }
0x51b3   :  { %v4407_v56 = vrot.slane %v4402_v16, %v6641_v2  ;;  %v4411_v26 = vrot.slane %v4402_v16, %v6663_v36 }
0x51b5   :  { %v4414_v17 = vsub.f32 %v4384_v59, %v4407_v56  ;;  %v4415_v14 = vsub.f32 %v4387_v52, %v4411_v26 }
0x51b7   :  { %v4416_v23 = vmul.f32 1.442695, %v4414_v17  ;;  %v4418_v7 = vmul.f32 1.442695, %v4415_v14 }
0x51b9   :  { %6101 = vpow2.f32 %v4416_v23 }
0x51ba   :  { %6103 = vpow2.f32 %v4418_v7 }
0x51c6   :  { %v6102_v53 = vpop.eup %6101 }
0x51c7   :  { %v6104_v12 = vpop.eup %6103  ;;  %4423 = vperm.xlu1 %5858, %v6102_v53  }
0x51c8   :  { %4426 = vperm.xlu0 %5857, %v6104_v12  }
0x5242   :  { %v4424_v61 = vpop.permute.xlu1 %4423 }
0x5243   :  { %v4427_v5 = vpop.permute.xlu0 %4426  ;;  %v4431_v25 = vrot.slane %v4424_v61, %v6343_v4 }
0x5244   :  { %v4435_v11 = vrot.slane %v4427_v5, %v6343_v4 }
0x5246   :  { %v4436_v38 = vsel %vm191_vm1, %v4435_v11, %v4431_v25 }
0x5247   :  { %v4438_v34 = vsel %vm751_vm8, %v4436_v38, 0.0 }
0x5248   :  { %4439 = vadd.xlane.f32.xlu1 %v4438_v34 }
0x52d1   :  { %v4440_v37 = vpop.xlane.xlu1 %4439 }
0x52d2   :  { %6105 = vrcp.f32 %v4440_v37 }
0x52df   :  { %v6106_v28 = vpop.eup %6105 }
0x52e0   :  { %v4446_v15 = vrot.slane %v6106_v28, %v6641_v2  ;;  %v4450_v41 = vrot.slane %v6106_v28, %v6663_v36  ;;  %v6198_v2 = vld [vmem:[%s8070_s0 + $0x8] sm:$0xff]  ;;  %s6276_s0 = smov [#allocation6]  }
0x52e1   :  { %s4663_s21 = sshll.u32 %s6276_s0, 4  ;;  %s4664_s21 = int_to_ptr.vmem [resolvable:$true] %s4663_s21 }
0x52e2   :  { %v4453_v6 = vmul.f32 %v6102_v53, %v4446_v15  ;;  %v4454_v31 = vmul.f32 %v6104_v12, %v4450_v41  ;;  %s6219_s3 = scalar_lea.vmem %s4664_s21, 192  ;;  %p6224_p6 = scmp.lt.s32.totalorder %s4664_s21, %s4664_s21 }
0x52e3   :  { %p6220_p5 = scmp.ne.s32.totalorder %s4664_s21, %s6219_s3  ;;  %p6225_p7 = scmp.lt.s32.totalorder %s6219_s3, %s6219_s3 }
0x52e4   :  { %4457 = vperm.xlu0 %5857, %v4453_v6  }
0x52e5   :  { %p6226_p8 = por %p6225_p7, %p6224_p6 }
0x52e7   :  { %p6227_p9 = pnand %p6226_p8, %p6220_p5 }
0x52e8   :  { %4462 = vperm.xlu0 %5857, %v4454_v31  }
0x535f   :  { %v4458_v9 = vpop.permute.xlu0 %4457 }
0x5360   :  { %v4465_v19 = vmul.f32 %v6197_v21, %v4458_v9  ;;  %v4623_v10 = vrot.slane %v4458_v9, %v6343_v4 }
0x5362   :  { %v4467_v30 = vsel %vm63_vm6, %v4465_v19, 0.0 }
0x5363   :  { %v4468_v18 = vrot.slane %v4467_v30, 4  ;;  %v4463_v62 = vpop.permute.xlu0 %4462 }
0x5364   :  { %v4466_v36 = vmul.f32 %v6198_v2, %v4463_v62  ;;  %v4627_v3 = vrot.slane %v4463_v62, %v6343_v4 }
0x5365   :  { %v4469_v60 = vadd.f32 %v4468_v18, %v4467_v30 }
0x5366   :  { %v4474_v8 = vsel %vm63_vm6, %v4466_v36, 0.0  ;;  %v4633_v44 = vsel %vm191_vm1, %v4627_v3, %v4623_v10 }
0x5367   :  { %v4470_v45 = vrot.slane %v4469_v60, 2  ;;  %v4475_v24 = vrot.slane %v4474_v8, 4  ;;  %4645 = vst.msk [vmem:[#allocation6 + $0xa] sm:$0x3] %vm751_vm8, %v4633_v44 }
0x5369   :  { %v4471_v54 = vadd.f32 %v4470_v45, %v4469_v60  ;;  %v4476_v13 = vadd.f32 %v4475_v24, %v4474_v8 }
0x536b   :  { %v4477_v46 = vrot.slane %v4476_v13, 2  ;;  %v4472_v47 = vrot.slane %v4471_v54, 1 }
0x536d   :  { %v4478_v48 = vadd.f32 %v4477_v46, %v4476_v13  ;;  %v4473_v0 = vadd.f32 %v4472_v47, %v4471_v54 }
0x536f   :  { %v4479_v43 = vrot.slane %v4478_v48, 1 }
0x5371   :  { %v4480_v33 = vadd.f32 %v4479_v43, %v4478_v48 }
0x5373   :  { %v4484_v35 = vsel %vm191_vm1, %v4480_v33, %v4473_v0 }
0x5374   :  { %4485 = vrot.lane.b32.xlu0 %v4484_v35, %s6272_s27 }
0x53e6   :  { %v4486_v4 = vpop.permute.xlu0 %4485 }
0x53e7   :  { %v4488_v50 = vsel %vm63_vm6, %v7996_v49, %v4486_v4 }
0x53e8   :  { %5841 = vmatmul.mubr.msk.f32.vlgmr.msra.gmra.mxu1 %vm847_vm9, %v4488_v50 }
0x54a8   :  { %v4558_v40 = vpop.f32.mrf.mxu1 }
0x54a9   :  { %v4559_v32 = vadd.f32 %v7899_v55, %v4558_v40 }
0x54aa   :  { %v5842_v29 = vpop.f32.mrf.mxu1 }
0x54ab   :  { %v4562_v51 = vsel %vm921_vm10, %v4559_v32, -inf }
0x54ac   :  { %4563 = vmax.xlane.f32.xlu0 %v4562_v51 }
0x5535   :  { %v4564_v58 = vpop.xlane.xlu0 %4563 }
0x5536   :  { %v4565_v1 = vsub.f32 %v4559_v32, %v4564_v58 }
0x5538   :  { %v4566_v42 = vmul.f32 1.442695, %v4565_v1 }
0x553a   :  { %6107 = vpow2.f32 %v4566_v42 }
0x5547   :  { %v6108_v27 = vpop.eup %6107 }
0x5548   :  { %v4568_v63 = vsel %vm921_vm10, %v6108_v27, 0.0 }
0x5549   :  { %4569 = vadd.xlane.f32.xlu1 %v4568_v63 }
0x554a   :  { %6230 = shalt.err (!%p6227_p9)
}
0x554b   :  { %s6277_s1 = smov 2   ;;  %s6278_s24 = smov [#allocation5]  }
0x554c   :  { %4669 = dma.vmem_to_hbm [thread:$0]  %s4664_s21, 192, %s8080_s10, [#allocation7], %s6272_s27, %s6272_s27, %s6277_s1  }
0x554d   :  { %s4651_s25 = sshll.u32 %s6278_s24, 4  ;;  %s4652_s25 = int_to_ptr.vmem [resolvable:$true] %s4651_s25 }
0x554e   :  { %s6239_s28 = scalar_lea.vmem %s4652_s25, 192  ;;  %p6244_p11 = scmp.lt.s32.totalorder %s4652_s25, %s4652_s25 }
0x554f   :  { %p6240_p10 = scmp.ne.s32.totalorder %s4652_s25, %s6239_s28  ;;  %p6245_p12 = scmp.lt.s32.totalorder %s6239_s28, %s6239_s28 }
0x5551   :  { %p6246_p13 = por %p6245_p12, %p6244_p11 }
0x5553   :  { %p6247_p0 = pnand %p6246_p13, %p6240_p10 }
0x55d2   :  { %v4570_v55 = vpop.xlane.xlu1 %4569 }
0x55d3   :  { %6109 = vlog2.f32 %v4570_v55 }
0x55e0   :  { %v6110_v49 = vpop.eup %6109 }
0x55e1   :  { %v4572_v59 = vmul.f32 0.6931472, %v6110_v49 }
0x55e3   :  { %v4573_v52 = vsub.f32 %v4565_v1, %v4572_v59 }
0x55e5   :  { %4579 = vst.msk [vmem:[#allocation5 + $0xa] sm:$0x3] %vm921_vm10, %v4573_v52 }
0x55e6   :  { %6250 = shalt.err (!%p6247_p0)
}
0x55e7   :  { %4657 = dma.vmem_to_hbm [thread:$0]  %s4652_s25, 192, %s8079_s9, [#allocation4], %s6272_s27, %s6272_s27, %s6277_s1  }
0x55e8   :  { %6261 = dma.done.wait [#allocation4], 192  }
0x55e9   :  { %6262 = vsyncadd [#allocation4], 4294967104 }
0x55ea   :  { %6263 = dma.done.wait [#allocation7], 192  }
0x55eb   :  { %6264 = vsyncadd [#allocation7], 4294967104 }
0x55ec   :  { %4676 = vsyncpa [#allocation3], 1 }
0x55ed   :  { %4677 = vsyncpa [#allocation4], 1 }
0x55ee   :  { %4678 = vsyncpa [#allocation7], 1 }

</bundles_post_ra>
